<compile_context>
chip_gen: v7x
topology: tpu7x:2x2x1
jax: 0.10.0
libtpu: 0.0.40
codegen_flags: <defaults>
</compile_context>

<pallas_src>
import functools

import jax
import jax.numpy as jnp
from jax.experimental import pallas as pl
from jax.experimental.pallas import tpu as pltpu


def _conv_bn_act_kernel(x_ref, w_ref, scale_ref, bias_ref, o_ref, *scratch,
                        kh, kw, stride, dilation, th, w_out, relu, use_slab):
    """One (image, C_out tile, H_out tile) step of Conv2d + BN(eval) + ReLU.

    x_ref:     (H_pad, W_pad, C_in)  padded input image (resident across co,m)
    w_ref:     (kh*kw*C_in, tn)      conv weights (NOT BN-scaled), bf16
    scale_ref: (1, tn)               folded BN scale, f32
    bias_ref:  (1, tn)               folded BN bias, f32
    o_ref:     (th, W_out, tn)       output tile
    scratch:   [(th*W_out, kh*kw*C_in)] VMEM im2col slab (only if use_slab)
    """
    c_in = x_ref.shape[-1]
    tn = o_ref.shape[-1]
    tm = th * w_out
    m = pl.program_id(2)          # H_out-tile index (innermost grid axis)
    h0 = m * th * stride          # first padded input row for this tile

    def tap_patch(i, j):
        di, dj = i * dilation, j * dilation
        if stride == 1:
            p = x_ref[pl.ds(h0 + di, th), pl.ds(dj, w_out), :]
        else:
            p = x_ref[pl.ds(h0 + di, th, stride=stride),
                      pl.ds(dj, w_out, stride=stride), :]
        return p.reshape(tm, c_in)

    if use_slab:
        # Tap-concatenated im2col slab -> one MXU matmul with K = kh*kw*C_in.
        slab_ref = scratch[0]
        for i in range(kh):
            for j in range(kw):
                t = i * kw + j
                slab_ref[:, t * c_in:(t + 1) * c_in] = tap_patch(i, j)
        acc = jnp.dot(slab_ref[...], w_ref[...],
                      preferred_element_type=jnp.float32)
    else:
        # Per-tap matmuls; K = C_in is already deep, acc tile stays in vregs.
        acc = jnp.zeros((tm, tn), jnp.float32)
        for i in range(kh):
            for j in range(kw):
                t = i * kw + j
                acc = acc + jnp.dot(tap_patch(i, j),
                                    w_ref[t * c_in:(t + 1) * c_in, :],
                                    preferred_element_type=jnp.float32)

    # BN scale/bias applied in f32 (bf16 weights stay un-scaled for accuracy).
    y = acc * scale_ref[...] + bias_ref[...]
    if relu:
        y = jnp.maximum(y, 0.0)
    o_ref[...] = y.reshape(th, w_out, tn).astype(o_ref.dtype)


def _pick_h_tile(h_out, w_out, tn):
    """Largest divisor of H_out such that the (th*W_out, tn) f32 tile ~128KB."""
    target_rows = max(64, 32768 // tn)
    th_cap = max(1, min(h_out, max(1, target_rows // max(1, w_out))))
    th = 1
    for cand in range(1, th_cap + 1):
        if h_out % cand == 0:
            th = cand
    return th


def basic_conv_forward(x_nchw, weight, gamma=None, beta=None,
                       running_mean=None, running_var=None, conv_bias=None, *,
                       stride=1, padding=0, dilation=1, groups=1, eps=1e-5,
                       relu=True, bn=True, compute_dtype=jnp.bfloat16,
                       out_dtype=jnp.float32):
    """BasicConv forward (Conv2d -> BN(eval) -> ReLU). x: NCHW, returns NCHW."""
    if groups != 1:
        # TODO(synk): grouped convolution not implemented.
        raise NotImplementedError("groups != 1 not supported")

    C_out, C_in, kh, kw = weight.shape
    N, C_in_x, H, W = x_nchw.shape
    assert C_in_x == C_in

    H_out = (H + 2 * padding - dilation * (kh - 1) - 1) // stride + 1
    W_out = (W + 2 * padding - dilation * (kw - 1) - 1) // stride + 1
    H_pad, W_pad = H + 2 * padding, W + 2 * padding
    HW = H_out * W_out
    K_tot = kh * kw * C_in

    # C_out tile width: 256 fills v6e/v7x MXUs when C_out allows, else 128.
    tn = 256 if (C_out >= 256 and C_out % 256 == 0) else 128
    C_out_pad = ((C_out + tn - 1) // tn) * tn
    n_co = C_out_pad // tn

    # H_out tile so the accumulator / output block stays register-file sized.
    th = _pick_h_tile(H_out, W_out, tn)
    tm = th * W_out
    n_m = H_out // th

    # Input: NCHW -> NHWC, spatial zero-pad, cast (thin XLA glue).
    # TODO(synk): fold the pad into the kernel / keep NHWC end-to-end.
    x_nhwc = jnp.transpose(x_nchw, (0, 2, 3, 1))
    x_pad = jnp.pad(
        x_nhwc, ((0, 0), (padding, padding), (padding, padding), (0, 0)))
    x_pad = x_pad.astype(compute_dtype)

    # Weights: (C_out, C_in, kh, kw) -> (kh*kw*C_in, C_out_pad) bf16 (unscaled).
    w = jnp.transpose(weight, (2, 3, 1, 0)).reshape(K_tot, C_out)
    if bn:
        scale = gamma.astype(jnp.float32) * jax.lax.rsqrt(
            running_var.astype(jnp.float32) + eps)
        bias = beta.astype(jnp.float32) - running_mean.astype(jnp.float32) * scale
        if conv_bias is not None:
            bias = bias + conv_bias.astype(jnp.float32) * scale
    else:
        scale = jnp.ones((C_out,), jnp.float32)
        bias = (conv_bias.astype(jnp.float32) if conv_bias is not None
                else jnp.zeros((C_out,), jnp.float32))
    if C_out_pad != C_out:
        w = jnp.pad(w, ((0, 0), (0, C_out_pad - C_out)))
        scale = jnp.pad(scale, (0, C_out_pad - C_out))
        bias = jnp.pad(bias, (0, C_out_pad - C_out))
    w = w.astype(compute_dtype)
    scale2d = scale.reshape(1, C_out_pad)
    bias2d = bias.reshape(1, C_out_pad)

    use_slab = (kh * kw > 1) and (C_in < 128)

    kernel = functools.partial(
        _conv_bn_act_kernel, kh=kh, kw=kw, stride=stride, dilation=dilation,
        th=th, w_out=W_out, relu=relu, use_slab=use_slab)

    # Grid order: avoid re-DMA of the heavier operand; m is always innermost
    # so both the image and the current weight tile stay VMEM-resident.
    dsize = jnp.dtype(compute_dtype).itemsize
    image_bytes = H_pad * W_pad * C_in * dsize
    weight_bytes = K_tot * C_out_pad * dsize
    weight_major = weight_bytes > n_co * image_bytes
    if weight_major:
        grid = (n_co, N, n_m)
        x_idx = lambda co, n, m: (n, 0, 0, 0)
        w_idx = lambda co, n, m: (0, co)
        sb_idx = lambda co, n, m: (0, co)
        o_idx = lambda co, n, m: (n, m, 0, co)
    else:
        grid = (N, n_co, n_m)
        x_idx = lambda n, co, m: (n, 0, 0, 0)
        w_idx = lambda n, co, m: (0, co)
        sb_idx = lambda n, co, m: (0, co)
        o_idx = lambda n, co, m: (n, m, 0, co)

    scratch_shapes = ([pltpu.VMEM((tm, K_tot), compute_dtype)]
                      if use_slab else [])

    out_isize = jnp.dtype(out_dtype).itemsize
    out_block_bytes = tm * tn * out_isize
    vmem_est = (2 * image_bytes + 2 * tn * K_tot * dsize + 2 * out_block_bytes
                + tm * K_tot * dsize + tm * tn * 4 + 8 * C_out_pad * 4)
    vmem_limit = int(min(64 * 1024 * 1024, max(32 * 1024 * 1024, 2 * vmem_est)))

    cost = pl.CostEstimate(
        flops=2 * N * HW * K_tot * C_out_pad,
        transcendentals=0,
        bytes_accessed=int(N * image_bytes + weight_bytes
                           + N * HW * C_out_pad * out_isize))

    out = pl.pallas_call(
        kernel,
        out_shape=jax.ShapeDtypeStruct((N, H_out, W_out, C_out_pad), out_dtype),
        grid_spec=pltpu.PrefetchScalarGridSpec(
            num_scalar_prefetch=0,
            grid=grid,
            in_specs=[
                pl.BlockSpec((None, H_pad, W_pad, C_in), x_idx),
                pl.BlockSpec((K_tot, tn), w_idx),
                pl.BlockSpec((1, tn), sb_idx),
                pl.BlockSpec((1, tn), sb_idx),
            ],
            out_specs=pl.BlockSpec((None, th, W_out, tn), o_idx),
            scratch_shapes=scratch_shapes,
        ),
        compiler_params=pltpu.CompilerParams(
            dimension_semantics=("parallel", "parallel", "parallel"),
            vmem_limit_bytes=vmem_limit),
        cost_estimate=cost,
    )(x_pad, w, scale2d, bias2d)

    out = out[:, :, :, :C_out]
    # TODO(synk): keep NHWC (and bf16) downstream; this transpose is
    # NCHW-compat glue only.
    return jnp.transpose(out, (0, 3, 1, 2))


def _reference(x, weight, gamma, beta, mean, var, conv_bias=None, *, stride,
               padding, dilation, relu, bn, eps=1e-5):
    # Reference uses bf16-rounded operands (like the kernel) with f32 accum.
    xr = x.astype(jnp.bfloat16).astype(jnp.float32)
    wr = weight.astype(jnp.bfloat16).astype(jnp.float32)
    conv = jax.lax.conv_general_dilated(
        xr, wr, window_strides=(stride, stride),
        padding=((padding, padding), (padding, padding)),
        rhs_dilation=(dilation, dilation),
        dimension_numbers=("NCHW", "OIHW", "NCHW"),
        preferred_element_type=jnp.float32)
    if conv_bias is not None:
        conv = conv + conv_bias.reshape(1, -1, 1, 1)
    if bn:
        s = gamma * jax.lax.rsqrt(var + eps)
        conv = conv * s.reshape(1, -1, 1, 1) + (beta - mean * s).reshape(1, -1, 1, 1)
    if relu:
        conv = jnp.maximum(conv, 0.0)
    return conv


def _run_case(name, seed, *, N, C_in, C_out, H, W, k, stride, padding,
              relu=True, tol=2e-2):
    ks = jax.random.split(jax.random.PRNGKey(seed), 6)
    x = jax.random.normal(ks[0], (N, C_in, H, W), jnp.float32)
    weight = 0.05 * jax.random.normal(ks[1], (C_out, C_in, k, k), jnp.float32)
    gamma = 1.0 + 0.1 * jax.random.normal(ks[2], (C_out,), jnp.float32)
    beta = 0.1 * jax.random.normal(ks[3], (C_out,), jnp.float32)
    mean = 0.1 * jax.random.normal(ks[4], (C_out,), jnp.float32)
    var = jnp.abs(jax.random.normal(ks[5], (C_out,), jnp.float32)) + 0.5

    fwd = jax.jit(functools.partial(
        basic_conv_forward, stride=stride, padding=padding, dilation=1,
        relu=relu, bn=True))
    out = fwd(x, weight, gamma, beta, mean, var)
    jax.block_until_ready(out)

    ref = _reference(x, weight, gamma, beta, mean, var, stride=stride,
                     padding=padding, dilation=1, relu=relu, bn=True)
    assert out.shape == ref.shape, (name, out.shape, ref.shape)
    err = float(jnp.max(jnp.abs(out - ref)))
    assert err < tol, (name, err)


if __name__ == "__main__":
    # 1) BasicConv default config: 3x3, stride 1, pad 1, relu+bn, bias=False.
    _run_case("base_relu", 0, N=2, C_in=4, C_out=8, H=16, W=16, k=3,
              stride=1, padding=1, relu=True)
    # 2) relu=False path.
    _run_case("base_norelu", 0, N=2, C_in=4, C_out=8, H=16, W=16, k=3,
              stride=1, padding=1, relu=False)
    # 3) Stem-like map (image-major grid order, multiple H_out tiles).
    _run_case("stem_like", 1, N=2, C_in=4, C_out=8, H=40, W=40, k=3,
              stride=1, padding=1, relu=True)
    # 4) Strided conv (stride=2) via strided ref slices.
    _run_case("stride2", 2, N=2, C_in=16, C_out=32, H=16, W=16, k=3,
              stride=2, padding=1, relu=True)
    # 5) Multiple C_out tiles + multiple H_out tiles (weight-major grid order).
    _run_case("tiled", 3, N=2, C_in=32, C_out=192, H=24, W=24, k=3,
              stride=1, padding=1, relu=True)
    # 6) Large-C_in per-tap path (no im2col slab).
    _run_case("wide_cin", 4, N=1, C_in=128, C_out=128, H=8, W=8, k=3,
              stride=1, padding=1, relu=True)

    print("KERNEL_OK")
</pallas_src>

<mosaic_0001>
module attributes {stable_mosaic.version = 11 : i64} {
  func.func @_conv_bn_act_kernel(%arg0: i32, %arg1: i32, %arg2: i32, %arg3: memref<1x18x18x4xbf16, #tpu.memory_space<vmem>>, %arg4: memref<36x128xbf16, #tpu.memory_space<vmem>>, %arg5: memref<1x128xf32, #tpu.memory_space<vmem>>, %arg6: memref<1x128xf32, #tpu.memory_space<vmem>>, %arg7: memref<1x16x16x128xf32, #tpu.memory_space<vmem>>, %arg8: memref<256x36xbf16, #tpu.memory_space<vmem>>) attributes {dimension_semantics = [#tpu.dimension_semantics<parallel>, #tpu.dimension_semantics<parallel>, #tpu.dimension_semantics<parallel>], iteration_bounds = array<i64: 1, 2, 1>, scalar_prefetch = 0 : i64, scratch_operands = 1 : i64, tpu.core_type = #tpu.core_type<tc>, window_params = [{transform_indices = @transform_0, window_bounds = array<i64: 1, 18, 18, 4>}, {transform_indices = @transform_1, window_bounds = array<i64: 36, 128>}, {transform_indices = @transform_2, window_bounds = array<i64: 1, 128>}, {transform_indices = @transform_3, window_bounds = array<i64: 1, 128>}, {transform_indices = @transform_4, window_bounds = array<i64: 1, 16, 16, 128>}]} {
    %c16_i32 = arith.constant 16 : i32
    %0 = arith.muli %arg2, %c16_i32 : i32
    %c1_i32 = arith.constant 1 : i32
    %1 = arith.muli %0, %c1_i32 : i32
    %c0_i32 = arith.constant 0 : i32
    %2 = arith.addi %1, %c0_i32 : i32
    %c0 = arith.constant 0 : index
    %3 = arith.index_cast %2 : i32 to index
    %c0_0 = arith.constant 0 : index
    %c0_1 = arith.constant 0 : index
    %4 = vector.load %arg3[%c0, %3, %c0_0, %c0_1] : memref<1x18x18x4xbf16, #tpu.memory_space<vmem>>, vector<1x16x16x4xbf16>
    %5 = vector.shape_cast %4 : vector<1x16x16x4xbf16> to vector<16x16x4xbf16>
    %6 = vector.shape_cast %5 : vector<16x16x4xbf16> to vector<256x4xbf16>
    %c0_2 = arith.constant 0 : index
    %c0_3 = arith.constant 0 : index
    %7 = vector.load %arg8[%c0_2, %c0_3] : memref<256x36xbf16, #tpu.memory_space<vmem>>, vector<256x4xbf16>
    tpu.vector_store %arg8[%c0_2, %c0_3], %6 {strides = array<i32>} : memref<256x36xbf16, #tpu.memory_space<vmem>>, vector<256x4xbf16>,
    %c0_i32_4 = arith.constant 0 : i32
    %8 = arith.addi %1, %c0_i32_4 : i32
    %c0_5 = arith.constant 0 : index
    %9 = arith.index_cast %8 : i32 to index
    %c1 = arith.constant 1 : index
    %c0_6 = arith.constant 0 : index
    %10 = vector.load %arg3[%c0_5, %9, %c1, %c0_6] : memref<1x18x18x4xbf16, #tpu.memory_space<vmem>>, vector<1x16x16x4xbf16>
    %11 = vector.shape_cast %10 : vector<1x16x16x4xbf16> to vector<16x16x4xbf16>
    %12 = vector.shape_cast %11 : vector<16x16x4xbf16> to vector<256x4xbf16>
    %c0_7 = arith.constant 0 : index
    %c4 = arith.constant 4 : index
    %13 = vector.load %arg8[%c0_7, %c4] : memref<256x36xbf16, #tpu.memory_space<vmem>>, vector<256x4xbf16>
    tpu.vector_store %arg8[%c0_7, %c4], %12 {strides = array<i32>} : memref<256x36xbf16, #tpu.memory_space<vmem>>, vector<256x4xbf16>,
    %c0_i32_8 = arith.constant 0 : i32
    %14 = arith.addi %1, %c0_i32_8 : i32
    %c0_9 = arith.constant 0 : index
    %15 = arith.index_cast %14 : i32 to index
    %c2 = arith.constant 2 : index
    %c0_10 = arith.constant 0 : index
    %16 = vector.load %arg3[%c0_9, %15, %c2, %c0_10] : memref<1x18x18x4xbf16, #tpu.memory_space<vmem>>, vector<1x16x16x4xbf16>
    %17 = vector.shape_cast %16 : vector<1x16x16x4xbf16> to vector<16x16x4xbf16>
    %18 = vector.shape_cast %17 : vector<16x16x4xbf16> to vector<256x4xbf16>
    %c0_11 = arith.constant 0 : index
    %c8 = arith.constant 8 : index
    %19 = vector.load %arg8[%c0_11, %c8] : memref<256x36xbf16, #tpu.memory_space<vmem>>, vector<256x4xbf16>
    tpu.vector_store %arg8[%c0_11, %c8], %18 {strides = array<i32>} : memref<256x36xbf16, #tpu.memory_space<vmem>>, vector<256x4xbf16>,
    %c1_i32_12 = arith.constant 1 : i32
    %20 = arith.addi %1, %c1_i32_12 : i32
    %c0_13 = arith.constant 0 : index
    %21 = arith.index_cast %20 : i32 to index
    %c0_14 = arith.constant 0 : index
    %c0_15 = arith.constant 0 : index
    %22 = vector.load %arg3[%c0_13, %21, %c0_14, %c0_15] : memref<1x18x18x4xbf16, #tpu.memory_space<vmem>>, vector<1x16x16x4xbf16>
    %23 = vector.shape_cast %22 : vector<1x16x16x4xbf16> to vector<16x16x4xbf16>
    %24 = vector.shape_cast %23 : vector<16x16x4xbf16> to vector<256x4xbf16>
    %c0_16 = arith.constant 0 : index
    %c12 = arith.constant 12 : index
    %25 = vector.load %arg8[%c0_16, %c12] : memref<256x36xbf16, #tpu.memory_space<vmem>>, vector<256x4xbf16>
    tpu.vector_store %arg8[%c0_16, %c12], %24 {strides = array<i32>} : memref<256x36xbf16, #tpu.memory_space<vmem>>, vector<256x4xbf16>,
    %c1_i32_17 = arith.constant 1 : i32
    %26 = arith.addi %1, %c1_i32_17 : i32
    %c0_18 = arith.constant 0 : index
    %27 = arith.index_cast %26 : i32 to index
    %c1_19 = arith.constant 1 : index
    %c0_20 = arith.constant 0 : index
    %28 = vector.load %arg3[%c0_18, %27, %c1_19, %c0_20] : memref<1x18x18x4xbf16, #tpu.memory_space<vmem>>, vector<1x16x16x4xbf16>
    %29 = vector.shape_cast %28 : vector<1x16x16x4xbf16> to vector<16x16x4xbf16>
    %30 = vector.shape_cast %29 : vector<16x16x4xbf16> to vector<256x4xbf16>
    %c0_21 = arith.constant 0 : index
    %c16 = arith.constant 16 : index
    %31 = vector.load %arg8[%c0_21, %c16] : memref<256x36xbf16, #tpu.memory_space<vmem>>, vector<256x4xbf16>
    tpu.vector_store %arg8[%c0_21, %c16], %30 {strides = array<i32>} : memref<256x36xbf16, #tpu.memory_space<vmem>>, vector<256x4xbf16>,
    %c1_i32_22 = arith.constant 1 : i32
    %32 = arith.addi %1, %c1_i32_22 : i32
    %c0_23 = arith.constant 0 : index
    %33 = arith.index_cast %32 : i32 to index
    %c2_24 = arith.constant 2 : index
    %c0_25 = arith.constant 0 : index
    %34 = vector.load %arg3[%c0_23, %33, %c2_24, %c0_25] : memref<1x18x18x4xbf16, #tpu.memory_space<vmem>>, vector<1x16x16x4xbf16>
    %35 = vector.shape_cast %34 : vector<1x16x16x4xbf16> to vector<16x16x4xbf16>
    %36 = vector.shape_cast %35 : vector<16x16x4xbf16> to vector<256x4xbf16>
    %c0_26 = arith.constant 0 : index
    %c20 = arith.constant 20 : index
    %37 = vector.load %arg8[%c0_26, %c20] : memref<256x36xbf16, #tpu.memory_space<vmem>>, vector<256x4xbf16>
    tpu.vector_store %arg8[%c0_26, %c20], %36 {strides = array<i32>} : memref<256x36xbf16, #tpu.memory_space<vmem>>, vector<256x4xbf16>,
    %c2_i32 = arith.constant 2 : i32
    %38 = arith.addi %1, %c2_i32 : i32
    %c0_27 = arith.constant 0 : index
    %39 = arith.index_cast %38 : i32 to index
    %c0_28 = arith.constant 0 : index
    %c0_29 = arith.constant 0 : index
    %40 = vector.load %arg3[%c0_27, %39, %c0_28, %c0_29] : memref<1x18x18x4xbf16, #tpu.memory_space<vmem>>, vector<1x16x16x4xbf16>
    %41 = vector.shape_cast %40 : vector<1x16x16x4xbf16> to vector<16x16x4xbf16>
    %42 = vector.shape_cast %41 : vector<16x16x4xbf16> to vector<256x4xbf16>
    %c0_30 = arith.constant 0 : index
    %c24 = arith.constant 24 : index
    %43 = vector.load %arg8[%c0_30, %c24] : memref<256x36xbf16, #tpu.memory_space<vmem>>, vector<256x4xbf16>
    tpu.vector_store %arg8[%c0_30, %c24], %42 {strides = array<i32>} : memref<256x36xbf16, #tpu.memory_space<vmem>>, vector<256x4xbf16>,
    %c2_i32_31 = arith.constant 2 : i32
    %44 = arith.addi %1, %c2_i32_31 : i32
    %c0_32 = arith.constant 0 : index
    %45 = arith.index_cast %44 : i32 to index
    %c1_33 = arith.constant 1 : index
    %c0_34 = arith.constant 0 : index
    %46 = vector.load %arg3[%c0_32, %45, %c1_33, %c0_34] : memref<1x18x18x4xbf16, #tpu.memory_space<vmem>>, vector<1x16x16x4xbf16>
    %47 = vector.shape_cast %46 : vector<1x16x16x4xbf16> to vector<16x16x4xbf16>
    %48 = vector.shape_cast %47 : vector<16x16x4xbf16> to vector<256x4xbf16>
    %c0_35 = arith.constant 0 : index
    %c28 = arith.constant 28 : index
    %49 = vector.load %arg8[%c0_35, %c28] : memref<256x36xbf16, #tpu.memory_space<vmem>>, vector<256x4xbf16>
    tpu.vector_store %arg8[%c0_35, %c28], %48 {strides = array<i32>} : memref<256x36xbf16, #tpu.memory_space<vmem>>, vector<256x4xbf16>,
    %c2_i32_36 = arith.constant 2 : i32
    %50 = arith.addi %1, %c2_i32_36 : i32
    %c0_37 = arith.constant 0 : index
    %51 = arith.index_cast %50 : i32 to index
    %c2_38 = arith.constant 2 : index
    %c0_39 = arith.constant 0 : index
    %52 = vector.load %arg3[%c0_37, %51, %c2_38, %c0_39] : memref<1x18x18x4xbf16, #tpu.memory_space<vmem>>, vector<1x16x16x4xbf16>
    %53 = vector.shape_cast %52 : vector<1x16x16x4xbf16> to vector<16x16x4xbf16>
    %54 = vector.shape_cast %53 : vector<16x16x4xbf16> to vector<256x4xbf16>
    %c0_40 = arith.constant 0 : index
    %c32 = arith.constant 32 : index
    %55 = vector.load %arg8[%c0_40, %c32] : memref<256x36xbf16, #tpu.memory_space<vmem>>, vector<256x4xbf16>
    tpu.vector_store %arg8[%c0_40, %c32], %54 {strides = array<i32>} : memref<256x36xbf16, #tpu.memory_space<vmem>>, vector<256x4xbf16>,
    %c0_41 = arith.constant 0 : index
    %c0_42 = arith.constant 0 : index
    %56 = vector.load %arg8[%c0_41, %c0_42] : memref<256x36xbf16, #tpu.memory_space<vmem>>, vector<256x36xbf16>
    %c0_43 = arith.constant 0 : index
    %c0_44 = arith.constant 0 : index
    %57 = vector.load %arg4[%c0_43, %c0_44] : memref<36x128xbf16, #tpu.memory_space<vmem>>, vector<36x128xbf16>
    %cst = arith.constant dense<0.000000e+00> : vector<256x128xf32>
    %58 = tpu.matmul %56, %57, %cst {dimension_numbers = #tpu.dot_dimension_numbers<[1], [0], [0], [1], [0, 0, 1, 1], [], []>} : vector<256x36xbf16>, vector<36x128xbf16>, vector<256x128xf32> -> vector<256x128xf32>
    %c0_45 = arith.constant 0 : index
    %c0_46 = arith.constant 0 : index
    %59 = vector.load %arg5[%c0_45, %c0_46] : memref<1x128xf32, #tpu.memory_space<vmem>>, vector<1x128xf32>
    %60 = vector.broadcast %59 : vector<1x128xf32> to vector<256x128xf32>
    %61 = arith.mulf %58, %60 : vector<256x128xf32>
    %c0_47 = arith.constant 0 : index
    %c0_48 = arith.constant 0 : index
    %62 = vector.load %arg6[%c0_47, %c0_48] : memref<1x128xf32, #tpu.memory_space<vmem>>, vector<1x128xf32>
    %63 = vector.broadcast %62 : vector<1x128xf32> to vector<256x128xf32>
    %64 = arith.addf %61, %63 : vector<256x128xf32>
    %cst_49 = arith.constant 0.000000e+00 : f32
    %65 = vector.broadcast %cst_49 : f32 to vector<256x128xf32>
    %66 = arith.maximumf %64, %65 : vector<256x128xf32>
    %67 = vector.shape_cast %66 : vector<256x128xf32> to vector<16x16x128xf32>
    %c0_50 = arith.constant 0 : index
    %c0_51 = arith.constant 0 : index
    %c0_52 = arith.constant 0 : index
    %c0_53 = arith.constant 0 : index
    %68 = vector.load %arg7[%c0_50, %c0_51, %c0_52, %c0_53] : memref<1x16x16x128xf32, #tpu.memory_space<vmem>>, vector<1x16x16x128xf32>
    %69 = vector.shape_cast %68 : vector<1x16x16x128xf32> to vector<16x16x128xf32>
    %70 = vector.shape_cast %67 : vector<16x16x128xf32> to vector<1x16x16x128xf32>
    tpu.vector_store %arg7[%c0_50, %c0_51, %c0_52, %c0_53], %70 {strides = array<i32>} : memref<1x16x16x128xf32, #tpu.memory_space<vmem>>, vector<1x16x16x128xf32>,
    return
  }
  func.func @transform_0(%arg0: i32, %arg1: i32, %arg2: i32) -> (i32, i32, i32, i32) {
    %c0_i32 = arith.constant 0 : i32
    %c0_i32_0 = arith.constant 0 : i32
    %c0_i32_1 = arith.constant 0 : i32
    %c0_i32_2 = arith.constant 0 : i32
    return %arg1, %c0_i32, %c0_i32_0, %c0_i32_1 : i32, i32, i32, i32
  }
  func.func @transform_1(%arg0: i32, %arg1: i32, %arg2: i32) -> (i32, i32) {
    %c0_i32 = arith.constant 0 : i32
    %c0_i32_0 = arith.constant 0 : i32
    return %c0_i32, %arg0 : i32, i32
  }
  func.func @transform_2(%arg0: i32, %arg1: i32, %arg2: i32) -> (i32, i32) {
    %c0_i32 = arith.constant 0 : i32
    %c0_i32_0 = arith.constant 0 : i32
    return %c0_i32, %arg0 : i32, i32
  }
  func.func @transform_3(%arg0: i32, %arg1: i32, %arg2: i32) -> (i32, i32) {
    %c0_i32 = arith.constant 0 : i32
    %c0_i32_0 = arith.constant 0 : i32
    return %c0_i32, %arg0 : i32, i32
  }
  func.func @transform_4(%arg0: i32, %arg1: i32, %arg2: i32) -> (i32, i32, i32, i32) {
    %c0_i32 = arith.constant 0 : i32
    %c0_i32_0 = arith.constant 0 : i32
    return %arg1, %arg2, %c0_i32, %arg0 : i32, i32, i32, i32
  }
}

</mosaic_0001>

<bundles_post_ra>
// kernel: basic_conv_forward.1
= control target key start
LH: loop header
LB: loop body
LE: loop exit
PB: predicated region body
PF: predicated region fallthrough
CT: control target
= control target key end

     0   :  { %s4629_s15 = smov 0   ;;  %s4631_s16 = smov 0   ;;  %s5873_s0 = inlined_call_operand.vmem [shape: bf16[2,18,18,4], index: 0, kind: input, shape index: {}]   ;;  %s5874_s1 = inlined_call_operand.vmem [shape: bf16[36,128], index: 1, kind: input, shape index: {}]   ;;  %s5875_s2 = inlined_call_operand.vmem [shape: f32[1,128], index: 2, kind: input, shape index: {}]   ;;  %s5876_s3 = inlined_call_operand.vmem [shape: f32[1,128], index: 3, kind: input, shape index: {}]   ;;  %s5877_s4 = inlined_call_operand.vmem [shape: f32[2,16,16,128], index: 4, kind: output, shape index: {}]  }
   0x1   :  { %s4633_s17 = smov 0  }
   0x2 LB: > { %s29_s18 = sadd.s32 1, %s4590_s16  ;;  %p3947_p0 = scmp.ge.s32.totalorder %s4594_s17, 1  ;;  %s4594_s17 = sphi %s4633_s17, %s14_s17   ;;  %s4590_s16 = sphi %s4631_s16, %s5883_s16   ;;  %s4586_s15 = sphi %s4629_s15, %s5882_s15  }
   0x3   : > { %p31_p1 = scmp.ge.s32.totalorder %s29_s18, 2  ;;  %p210_p2 = scmp.lt.s32.totalorder %s4594_s17, 3 }
   0x5   : > { %s5885_s18 = smov (%p31_p1, %s29_s18), 0  ;;  %p211_p3 = pnand %p3947_p0, %p210_p2 }
   0x6   : > { %p254_p4 = scmp.lt.s32.totalorder (!%p211_p3), %s4586_s15, 1  ;;  %vm1077_vm0 = vcmask (!%p211_p3), 1042432   ;;  %vm1078_vm1 = vcmask (!%p211_p3), 1046532   ;;  %s4596_s23 = smov (!%p211_p3), 12   ;;  %vm481_vm3 = vsmask.f32 (!%p211_p3), 3328 }
   0x7   : > { %214 = sbr.rel (%p211_p3) target bundleno = 663 (0x297), region = 36  ;;  %vm4655_vm2 = vmor (!%p211_p3), %vm1077_vm0, %vm1078_vm1  ;;  %vm482_vm4 = vsmask.f32 (!%p211_p3), 7440  ;;  %s4597_s24 = smov (!%p211_p3), 8   ;;  %vm416_vm6 = vcmask (!%p211_p3), 31744   ;;  %vm964_vm7 = vcmask (!%p211_p3), 64544  }
   0x8   : > { %vm4705_vm5 = vmor (!%p211_p3), %vm481_vm3, %vm482_vm4  ;;  %s4598_s25 = smov (!%p211_p3), 4   ;;  %s4599_s26 = smov (!%p211_p3), 16   ;;  %vm1288_vm8 = vcmask (!%p211_p3), 97344   ;;  %vm1469_vm9 = vcmask (!%p211_p3), 130144   ;;  %vm2014_vm10 = vcmask (!%p211_p3), 162944   ;;  %vm2335_vm11 = vcmask (!%p211_p3), 195744  }
   0x9   : > { %s4600_s27 = smov (!%p211_p3), 20   ;;  %s4601_s28 = smov (!%p211_p3), 24   ;;  %vm2516_vm12 = vcmask (!%p211_p3), 228544   ;;  %vm3061_vm13 = vcmask (!%p211_p3), 261344   ;;  %vm3382_vm14 = vcmask (!%p211_p3), 294144   ;;  %vm3435_vm15 = vcmask (!%p211_p3), 293888  }
   0xa   : > { %s4602_s29 = smov (!%p211_p3), 28   ;;  %s4603_s30 = smov (!%p211_p3), 32   ;;  %vm3484_vm0 = vcmask (!%p211_p3), 1041408  }
   0xe   : > { %s5887_s15 = smov (!%p254_p4, %s4586_s15), 1 }
   0xf   : > { %s4488_s19 = smul.u32 216, %s5887_s15 }
  0x11   : > { %s4653_s22 = scalar_lea.vmem %s5873_s0, %s4488_s19  ;;  %s4422_s19 = sshll.u32 %s5887_s15, 8 }
  0x12   : > { %v4521_v1 = vld [vmem:[%s4653_s22 + $0x6c] sm:$0xff]   ;;  %v1005_v3 = vld [vmem:[%s4653_s22 + $0x60] sm:$0xe]  ;;  %v1006_v4 = vld [vmem:[%s4653_s22 + $0x64] sm:$0xf]  ;;  %s5774_s21 = scalar_lea.vmem %s5877_s4, %s4422_s19 }
  0x13   : > { %v4522_v2 = vld [vmem:[%s4653_s22 + $0xc] sm:$0xff]   ;;  %1437 = vrot.lane.b32.xlu1 %v4521_v1, %s4596_s23  ;;  %v1007_v5 = vld [vmem:[%s4653_s22 + $0x68] sm:$0x1]  ;;  %v3991_v6 = vrot.slane %v1005_v3, 9  ;;  %v1138_v7 = vrot.slane %v1006_v4, 5 }
  0x14   : > { %1421 = vrot.lane.b32.xlu0 %v4522_v2, %s4596_s23  ;;  %v1141_v8 = vrot.slane %v1007_v5, 5  ;;  %v981_v9 = vld [vmem:[%s4653_s22] sm:$0xe]  ;;  %v982_v10 = vld [vmem:[%s4653_s22 + $0x4] sm:$0xf] }
  0x15   : > { %v983_v11 = vld [vmem:[%s4653_s22 + $0x8] sm:$0x1]  ;;  %v3983_v12 = vrot.slane %v981_v9, 9  ;;  %v1139_v13 = vsel %vm4655_vm2, %v3991_v6, %v1138_v7  ;;  %v1140_v14 = vrot.slane %v1138_v7, 4  ;;  %v1082_v15 = vrot.slane %v982_v10, 5 }
  0x16   : > { %v1085_v16 = vrot.slane %v983_v11, 5  ;;  %v1008_v17 = vld [vmem:[%s4653_s22 + $0x6c] sm:$0xe]  ;;  %v1009_v18 = vld [vmem:[%s4653_s22 + $0x70] sm:$0xf] }
  0x17   : > { %v1010_v19 = vld [vmem:[%s4653_s22 + $0x74] sm:$0x1]  ;;  %v3992_v20 = vrot.slane %v1008_v17, 9  ;;  %v1142_v21 = vsel %vm4655_vm2, %v1140_v14, %v1141_v8  ;;  %v1083_v22 = vsel %vm4655_vm2, %v3983_v12, %v1082_v15  ;;  %v1084_v23 = vrot.slane %v1082_v15, 4  ;;  %v984_v25 = vld [vmem:[%s4653_s22 + $0xc] sm:$0xe] }
  0x18   : > { %v1145_v24 = vrot.slane %v1009_v18, 5  ;;  %v985_v26 = vld [vmem:[%s4653_s22 + $0x10] sm:$0xf]  ;;  %v4007_v27 = vcombine.low %v1139_v13, %v1142_v21  ;;  %v1148_v28 = vrot.slane %v1010_v19, 5  ;;  %v986_v29 = vld [vmem:[%s4653_s22 + $0x14] sm:$0x1] }
  0x19   : > { %v3984_v30 = vrot.slane %v984_v25, 9  ;;  %v1089_v31 = vrot.slane %v985_v26, 5  ;;  %v1086_v32 = vsel %vm4655_vm2, %v1084_v23, %v1085_v16  ;;  %v1092_v35 = vrot.slane %v986_v29, 5  ;;  %v436_v36 = vld [vmem:[%s4653_s22 + $0xc] sm:$0xf] }
  0x1a   : > { %v1146_v33 = vsel %vm4655_vm2, %v3992_v20, %v1145_v24  ;;  %v1147_v34 = vrot.slane %v1145_v24, 4  ;;  %v437_v37 = vld [vmem:[%s4653_s22 + $0x10] sm:$0xf]  ;;  %1256 = vrot.lane.b32.xlu1 %v4007_v27, %s4597_s24  ;;  %v3999_v38 = vcombine.low %v1083_v22, %v1086_v32  ;;  %v438_v41 = vld [vmem:[%s4653_s22 + $0x14] sm:$0x1]  ;;  %v509_v42 = vshrl.u32 %v436_v36, 16 }
  0x1b   : > { %v1090_v39 = vsel %vm4655_vm2, %v3984_v30, %v1089_v31  ;;  %v1091_v40 = vrot.slane %v1089_v31, 4  ;;  %v433_v43 = vld [vmem:[%s4653_s22] sm:$0xf]  ;;  %v512_v45 = vshll.u32 %v436_v36, 16  ;;  %v518_v46 = vshll.u32 %v437_v37, 16 }
  0x1c   : > { %v1149_v44 = vsel %vm4655_vm2, %v1147_v34, %v1148_v28  ;;  %v522_v47 = vshrl.u32 %v437_v37, 16  ;;  %v434_v48 = vld [vmem:[%s4653_s22 + $0x4] sm:$0xf]  ;;  %1240 = vrot.lane.b32.xlu0 %v3999_v38, %s4597_s24  ;;  %v511_v51 = vrot.slane %v509_v42, 4  ;;  %v528_v52 = vshll.u32 %v438_v41, 16 }
  0x1d   : > { %v4008_v49 = vcombine.low %v1146_v33, %v1149_v44  ;;  %v1093_v50 = vsel %vm4655_vm2, %v1091_v40, %v1092_v35  ;;  %v435_v53 = vld [vmem:[%s4653_s22 + $0x8] sm:$0x1]  ;;  %v514_v55 = vrot.slane %v512_v45, 5  ;;  %v520_v56 = vrot.slane %v518_v46, 5  ;;  %v460_v58 = vld [vmem:[%s4653_s22 + $0x6c] sm:$0xf] }
  0x1e   : > { %v4000_v54 = vcombine.low %v1090_v39, %v1093_v50  ;;  %v524_v57 = vrot.slane %v522_v47, 4  ;;  %v530_v59 = vrot.slane %v528_v52, 5  ;;  %v485_v60 = vshrl.u32 %v433_v43, 16  ;;  %v461_v4 = vld [vmem:[%s4653_s22 + $0x70] sm:$0xf] }
  0x1f   : > { %1258 = vrot.lane.b32.xlu1 %v4008_v49, %s4597_s24  ;;  %v488_v61 = vshll.u32 %v433_v43, 16  ;;  %v494_v62 = vshll.u32 %v434_v48, 16  ;;  %v515_v63 = vor.u32 %v514_v55, %v511_v51  ;;  %v498_v2 = vshrl.u32 %v434_v48, 16  ;;  %v462_v9 = vld [vmem:[%s4653_s22 + $0x74] sm:$0x1] }
  0x20   : > { %v525_v1 = vor.u32 %v524_v57, %v520_v56  ;;  %v504_v3 = vshll.u32 %v435_v53, 16  ;;  %1242 = vrot.lane.b32.xlu0 %v4000_v54, %s4597_s24  ;;  %v487_v6 = vrot.slane %v485_v60, 4  ;;  %v701_v10 = vshrl.u32 %v460_v58, 16  ;;  %v457_v11 = vld [vmem:[%s4653_s22 + $0x60] sm:$0xf] }
  0x21   : > { %v490_v7 = vrot.slane %v488_v61, 5  ;;  %v496_v8 = vrot.slane %v494_v62, 5  ;;  %v516_v12 = vrot.slane %v515_v63, 4  ;;  %v500_v14 = vrot.slane %v498_v2, 4  ;;  %v458_v16 = vld [vmem:[%s4653_s22 + $0x64] sm:$0xf] }
  0x22   : > { %v526_v13 = vrot.slane %v525_v1, 4  ;;  %v506_v15 = vrot.slane %v504_v3, 5  ;;  %v703_v18 = vrot.slane %v701_v10, 4  ;;  %v704_v19 = vshll.u32 %v460_v58, 16  ;;  %v459_v35 = vld [vmem:[%s4653_s22 + $0x68] sm:$0x1] }
  0x23   : > { %v491_v17 = vor.u32 %v490_v7, %v487_v6  ;;  %v710_v20 = vshll.u32 %v461_v4, 16  ;;  %v521_v21 = vsel %vm4705_vm5, %v516_v12, %v520_v56  ;;  %v501_v23 = vor.u32 %v500_v14, %v496_v8  ;;  %v4087_v38 = vld [vmem:[%s4653_s22 + $0x6c] sm:$0xf]  ;;  %v4088_v43 = vld [vmem:[%s4653_s22 + $0x70] sm:$0xf]  ;;  %v4523_v6 = vld [vmem:[%s4653_s22 + $0x78] sm:$0xff]  }
  0x24   : > { %v531_v22 = vsel %vm4705_vm5, %v526_v13, %v530_v59  ;;  %v714_v24 = vshrl.u32 %v461_v4, 16  ;;  %v706_v27 = vrot.slane %v704_v19, 5  ;;  %v720_v31 = vshll.u32 %v462_v9, 16  ;;  %v4089_v54 = vld [vmem:[%s4653_s22 + $0x74] sm:$0x1] }
  0x25   : > { %v3968_v25 = vcombine.low %v521_v21, %v531_v22  ;;  %v492_v26 = vrot.slane %v491_v17, 4  ;;  %v712_v28 = vrot.slane %v710_v20, 5  ;;  %v502_v29 = vrot.slane %v501_v23, 4  ;;  %v4063_v57 = vld [vmem:[%s4653_s22 + $0xc] sm:$0xf] }
  0x26   : > { %v716_v30 = vrot.slane %v714_v24, 4  ;;  %v677_v32 = vshrl.u32 %v457_v11, 16  ;;  %v707_v34 = vor.u32 %v706_v27, %v703_v18  ;;  %v680_v36 = vshll.u32 %v457_v11, 16  ;;  %v4064_v62 = vld [vmem:[%s4653_s22 + $0x10] sm:$0xf] }
  0x27   : > { %918 = vrot.lane.b32.xlu1 %v3968_v25, %s4598_s25  ;;  %v497_v33 = vsel %vm4705_vm5, %v492_v26, %v496_v8  ;;  %v686_v37 = vshll.u32 %v458_v16, 16  ;;  %v507_v39 = vsel %vm4705_vm5, %v502_v29, %v506_v15  ;;  %v722_v41 = vrot.slane %v720_v31, 5  ;;  %v4065_v12 = vld [vmem:[%s4653_s22 + $0x14] sm:$0x1]  ;;  %v4090_v15 = vld [vmem:[%s4653_s22 + $0x78] sm:$0xf] }
  0x28   : > { %v717_v40 = vor.u32 %v716_v30, %v712_v28  ;;  %v679_v42 = vrot.slane %v677_v32, 4  ;;  %v3967_v44 = vcombine.low %v497_v33, %v507_v39  ;;  %v708_v45 = vrot.slane %v707_v34, 4  ;;  %v4091_v27 = vld [vmem:[%s4653_s22 + $0x7c] sm:$0xf]  ;;  %v4092_v33 = vld [vmem:[%s4653_s22 + $0x80] sm:$0x1] }
  0x29   : > { %v682_v46 = vrot.slane %v680_v36, 5  ;;  %v688_v47 = vrot.slane %v686_v37, 5  ;;  %v690_v49 = vshrl.u32 %v458_v16, 16  ;;  %v696_v50 = vshll.u32 %v459_v35, 16  ;;  %v4066_v34 = vld [vmem:[%s4653_s22 + $0x18] sm:$0xf] }
  0x2a   : > { %v718_v48 = vrot.slane %v717_v40, 4  ;;  %v1727_v51 = vshrl.u32 %v4087_v38, 16  ;;  %916 = vrot.lane.b32.xlu0 %v3967_v44, %s4598_s25  ;;  %v713_v52 = vsel %vm4705_vm5, %v708_v45, %v712_v28  ;;  %v1730_v55 = vshll.u32 %v4087_v38, 16  ;;  %v4067_v39 = vld [vmem:[%s4653_s22 + $0x1c] sm:$0xf] }
  0x2b   : > { %v683_v53 = vor.u32 %v682_v46, %v679_v42  ;;  %v1736_v56 = vshll.u32 %v4088_v43, 16  ;;  %v692_v59 = vrot.slane %v690_v49, 4  ;;  %v698_v60 = vrot.slane %v696_v50, 5  ;;  %v4524_v40 = vld [vmem:[%s4653_s22 + $0x18] sm:$0xff]   ;;  %v4068_v45 = vld [vmem:[%s4653_s22 + $0x20] sm:$0x1] }
  0x2c   : > { %v723_v58 = vsel %vm4705_vm5, %v718_v48, %v722_v41  ;;  %v1729_v61 = vrot.slane %v1727_v51, 4  ;;  %v1732_v2 = vrot.slane %v1730_v55, 5  ;;  %v1740_v7 = vshrl.u32 %v4088_v43, 16  ;;  %v4151_v50 = vld [vmem:[%s4653_s22 + $0x6c] sm:$0xe] }
  0x2d   : > { %v3976_v63 = vcombine.low %v713_v52, %v723_v58  ;;  %v684_v1 = vrot.slane %v683_v53, 4  ;;  %v1738_v3 = vrot.slane %v1736_v56, 5  ;;  %v693_v4 = vor.u32 %v692_v59, %v688_v47  ;;  %v4152_v55 = vld [vmem:[%s4653_s22 + $0x70] sm:$0xf] }
  0x2e   : > { %v1746_v8 = vshll.u32 %v4089_v54, 16  ;;  %v1535_v9 = vshrl.u32 %v4063_v57, 16  ;;  %v1733_v11 = vor.u32 %v1732_v2, %v1729_v61  ;;  %v1538_v13 = vshll.u32 %v4063_v57, 16  ;;  %v4127_v61 = vld [vmem:[%s4653_s22 + $0xc] sm:$0xe] }
  0x2f   : > { %934 = vrot.lane.b32.xlu1 %v3976_v63, %s4598_s25  ;;  %v689_v10 = vsel %vm4705_vm5, %v684_v1, %v688_v47  ;;  %v1544_v14 = vshll.u32 %v4064_v62, 16  ;;  %v694_v16 = vrot.slane %v693_v4, 4  ;;  %v1742_v17 = vrot.slane %v1740_v7, 4 }
  0x30   : > { %v1748_v18 = vrot.slane %v1746_v8, 5  ;;  %v1537_v19 = vrot.slane %v1535_v9, 4  ;;  %v1734_v20 = vrot.slane %v1733_v11, 4  ;;  %v1540_v21 = vrot.slane %v1538_v13, 5  ;;  %v4129_v9 = vld [vmem:[%s4653_s22 + $0x14] sm:$0x1] }
  0x31   : > { %v1546_v22 = vrot.slane %v1544_v14, 5  ;;  %v1548_v23 = vshrl.u32 %v4064_v62, 16  ;;  %v699_v24 = vsel %vm4705_vm5, %v694_v16, %v698_v60  ;;  %v1743_v25 = vor.u32 %v1742_v17, %v1738_v3  ;;  %v4153_v60 = vld [vmem:[%s4653_s22 + $0x74] sm:$0x1] }
  0x32   : > { %v1554_v26 = vshll.u32 %v4065_v12, 16  ;;  %v1751_v28 = vshrl.u32 %v4090_v15, 16  ;;  %v3975_v29 = vcombine.low %v689_v10, %v699_v24  ;;  %v1739_v30 = vsel %vm4705_vm5, %v1734_v20, %v1738_v3  ;;  %v4128_v3 = vld [vmem:[%s4653_s22 + $0x10] sm:$0xf] }
  0x33   : > { %1439 = vrot.lane.b32.xlu1 %v4523_v6, %s4596_s23  ;;  %v1541_v31 = vor.u32 %v1540_v21, %v1537_v19  ;;  %v1550_v32 = vrot.slane %v1548_v23, 4  ;;  %v1744_v35 = vrot.slane %v1743_v25, 4  ;;  %v1754_v38 = vshll.u32 %v4090_v15, 16 }
  0x34   : > { %v1556_v36 = vrot.slane %v1554_v26, 5  ;;  %v1753_v37 = vrot.slane %v1751_v28, 4  ;;  %932 = vrot.lane.b32.xlu0 %v3975_v29, %s4598_s25  ;;  %v1760_v43 = vshll.u32 %v4091_v27, 16  ;;  %v1764_v44 = vshrl.u32 %v4091_v27, 16  ;;  %v4155_v27 = vld [vmem:[%s4653_s22 + $0x7c] sm:$0xf] }
  0x35   : > { %v1542_v41 = vrot.slane %v1541_v31, 4  ;;  %v1551_v42 = vor.u32 %v1550_v32, %v1546_v22  ;;  %v1749_v46 = vsel %vm4705_vm5, %v1744_v35, %v1748_v18  ;;  %v1756_v47 = vrot.slane %v1754_v38, 5  ;;  %v4156_v28 = vld [vmem:[%s4653_s22 + $0x80] sm:$0x1]  ;;  %v4131_v38 = vld [vmem:[%s4653_s22 + $0x1c] sm:$0xf] }
  0x36   : > { %v1770_v48 = vshll.u32 %v4092_v33, 16  ;;  %v1559_v49 = vshrl.u32 %v4066_v34, 16  ;;  %v4119_v51 = vcombine.low %v1739_v30, %v1749_v46  ;;  %v1762_v54 = vrot.slane %v1760_v43, 5  ;;  %v4130_v33 = vld [vmem:[%s4653_s22 + $0x18] sm:$0xe] }
  0x37   : > { %v1547_v52 = vsel %vm4705_vm5, %v1542_v41, %v1546_v22  ;;  %v1552_v53 = vrot.slane %v1551_v42, 4  ;;  %v1757_v56 = vor.u32 %v1756_v47, %v1753_v37  ;;  %v1766_v57 = vrot.slane %v1764_v44, 4  ;;  %v4154_v22 = vld [vmem:[%s4653_s22 + $0x78] sm:$0xe] }
  0x38   : > { %v1772_v58 = vrot.slane %v1770_v48, 5  ;;  %v1561_v59 = vrot.slane %v1559_v49, 4  ;;  %1423 = vrot.lane.b32.xlu0 %v4524_v40, %s4596_s23  ;;  %1982 = vrot.lane.b32.xlu1 %v4119_v51, %s4599_s26  ;;  %v1562_v63 = vshll.u32 %v4066_v34, 16  ;;  %v1568_v1 = vshll.u32 %v4067_v39, 16  ;;  %v4279_v44 = vld [vmem:[%s4653_s22 + $0x78] sm:$0xf] }
  0x39   : > { %v1557_v62 = vsel %vm4705_vm5, %v1552_v53, %v1556_v36  ;;  %v1572_v2 = vshrl.u32 %v4067_v39, 16  ;;  %v1758_v6 = vrot.slane %v1757_v56, 4  ;;  %v1767_v7 = vor.u32 %v1766_v57, %v1762_v54  ;;  %v4132_v39 = vld [vmem:[%s4653_s22 + $0x20] sm:$0x1] }
  0x3a   : > { %v4111_v4 = vcombine.low %v1547_v52, %v1557_v62  ;;  %v1578_v8 = vshll.u32 %v4068_v45, 16  ;;  %v1564_v10 = vrot.slane %v1562_v63, 5  ;;  %v1570_v11 = vrot.slane %v1568_v1, 5  ;;  %v4280_v45 = vld [vmem:[%s4653_s22 + $0x7c] sm:$0xf] }
  0x3b   : > { %v1574_v12 = vrot.slane %v1572_v2, 4  ;;  %v4183_v13 = vrot.slane %v4151_v50, 9  ;;  %v1763_v14 = vsel %vm4705_vm5, %v1758_v6, %v1762_v54  ;;  %v1768_v15 = vrot.slane %v1767_v7, 4  ;;  %v4281_v54 = vld [vmem:[%s4653_s22 + $0x80] sm:$0x1] }
  0x3c   : > { %v1580_v16 = vrot.slane %v1578_v8, 5  ;;  %v2185_v17 = vrot.slane %v4152_v55, 5  ;;  %1966 = vrot.lane.b32.xlu0 %v4111_v4, %s4599_s26  ;;  %v1565_v18 = vor.u32 %v1564_v10, %v1561_v59  ;;  %v2188_v20 = vrot.slane %v4153_v60, 5  ;;  %v4255_v59 = vld [vmem:[%s4653_s22 + $0x18] sm:$0xf] }
  0x3d   : > { %v1575_v19 = vor.u32 %v1574_v12, %v1570_v11  ;;  %v4175_v21 = vrot.slane %v4127_v61, 9  ;;  %v1773_v23 = vsel %vm4705_vm5, %v1768_v15, %v1772_v58  ;;  %v2129_v26 = vrot.slane %v4128_v3, 5  ;;  %v4256_v1 = vld [vmem:[%s4653_s22 + $0x1c] sm:$0xf]  ;;  %v4257_v10 = vld [vmem:[%s4653_s22 + $0x20] sm:$0x1] }
  0x3e   : > { %v2186_v24 = vsel %vm4655_vm2, %v4183_v13, %v2185_v17  ;;  %v2187_v25 = vrot.slane %v2185_v17, 4  ;;  %v4120_v29 = vcombine.low %v1763_v14, %v1773_v23  ;;  %v1566_v30 = vrot.slane %v1565_v18, 4  ;;  %v4525_v17 = vld [vmem:[%s4653_s22 + $0x78] sm:$0xff]  }
  0x3f   : > { %v1576_v31 = vrot.slane %v1575_v19, 4  ;;  %v2132_v32 = vrot.slane %v4129_v9, 5  ;;  %v2130_v35 = vsel %vm4655_vm2, %v4175_v21, %v2129_v26  ;;  %v2131_v36 = vrot.slane %v2129_v26, 4 }
  0x40   : > { %v2189_v34 = vsel %vm4655_vm2, %v2187_v25, %v2188_v20  ;;  %v4184_v37 = vrot.slane %v4154_v22, 9  ;;  %1984 = vrot.lane.b32.xlu1 %v4120_v29, %s4599_s26  ;;  %v1571_v40 = vsel %vm4705_vm5, %v1566_v30, %v1570_v11  ;;  %v2192_v43 = vrot.slane %v4155_v27, 5  ;;  %v4283_v22 = vld [vmem:[%s4653_s22 + $0x88] sm:$0xf]  ;;  %v4526_v27 = vld [vmem:[%s4653_s22 + $0x18] sm:$0xff]  }
  0x41   : > { %v1581_v41 = vsel %vm4705_vm5, %v1576_v31, %v1580_v16  ;;  %v4199_v42 = vcombine.low %v2186_v24, %v2189_v34  ;;  %v2133_v47 = vsel %vm4655_vm2, %v2131_v36, %v2132_v32  ;;  %v2195_v48 = vrot.slane %v4156_v28, 5  ;;  %v4282_v16 = vld [vmem:[%s4653_s22 + $0x84] sm:$0xf] }
  0x42   : > { %v4112_v46 = vcombine.low %v1571_v40, %v1581_v41  ;;  %v4176_v49 = vrot.slane %v4130_v33, 9  ;;  %v4191_v50 = vcombine.low %v2130_v35, %v2133_v47  ;;  %v2193_v51 = vsel %vm4655_vm2, %v4184_v37, %v2192_v43  ;;  %v4284_v35 = vld [vmem:[%s4653_s22 + $0x8c] sm:$0x1]  ;;  %v4258_v37 = vld [vmem:[%s4653_s22 + $0x24] sm:$0xf] }
  0x43   : > { %v2194_v52 = vrot.slane %v2192_v43, 4  ;;  %v2136_v53 = vrot.slane %v4131_v38, 5  ;;  %v2139_v55 = vrot.slane %v4132_v39, 5  ;;  %v2774_v56 = vshrl.u32 %v4279_v44, 16  ;;  %v4527_v38 = vld [vmem:[%s4653_s22 + $0x84] sm:$0xff]  }
  0x44   : > { %1968 = vrot.lane.b32.xlu0 %v4112_v46, %s4599_s26  ;;  %v2777_v57 = vshll.u32 %v4279_v44, 16  ;;  %v2783_v58 = vshll.u32 %v4280_v45, 16  ;;  %2303 = vrot.lane.b32.xlu1 %v4199_v42, %s4600_s27  ;;  %v2787_v63 = vshrl.u32 %v4280_v45, 16  ;;  %v2793_v9 = vshll.u32 %v4281_v54, 16  ;;  %v4259_v43 = vld [vmem:[%s4653_s22 + $0x28] sm:$0xf] }
  0x45   : > { %v2196_v60 = vsel %vm4655_vm2, %v2194_v52, %v2195_v48  ;;  %v2137_v61 = vsel %vm4655_vm2, %v4176_v49, %v2136_v53  ;;  %v2138_v62 = vrot.slane %v2136_v53, 4  ;;  %v2776_v3 = vrot.slane %v2774_v56, 4  ;;  %v4260_v48 = vld [vmem:[%s4653_s22 + $0x2c] sm:$0x1]  ;;  %v4343_v53 = vld [vmem:[%s4653_s22 + $0x78] sm:$0xe] }
  0x46   : > { %v4200_v2 = vcombine.low %v2193_v51, %v2196_v60  ;;  %v2779_v4 = vrot.slane %v2777_v57, 5  ;;  %v2785_v6 = vrot.slane %v2783_v58, 5  ;;  %v2789_v8 = vrot.slane %v2787_v63, 4  ;;  %v4528_v54 = vld [vmem:[%s4653_s22 + $0x24] sm:$0xff]  }
  0x47   : > { %v2140_v7 = vsel %vm4655_vm2, %v2138_v62, %v2139_v55  ;;  %v2582_v11 = vshrl.u32 %v4255_v59, 16  ;;  %v2585_v14 = vshll.u32 %v4255_v59, 16  ;;  %v2591_v15 = vshll.u32 %v4256_v1, 16  ;;  %v4344_v59 = vld [vmem:[%s4653_s22 + $0x7c] sm:$0xf] }
  0x48   : > { %2287 = vrot.lane.b32.xlu0 %v4191_v50, %s4600_s27  ;;  %v4192_v12 = vcombine.low %v2137_v61, %v2140_v7  ;;  %v2780_v13 = vor.u32 %v2779_v4, %v2776_v3  ;;  %2305 = vrot.lane.b32.xlu1 %v4200_v2, %s4600_s27  ;;  %v2790_v18 = vor.u32 %v2789_v8, %v2785_v6  ;;  %v2795_v19 = vrot.slane %v2793_v9, 5  ;;  %v4319_v7 = vld [vmem:[%s4653_s22 + $0x18] sm:$0xe]  ;;  %v4320_v8 = vld [vmem:[%s4653_s22 + $0x1c] sm:$0xf] }
  0x49   : > { %v2584_v20 = vrot.slane %v2582_v11, 4  ;;  %v2595_v21 = vshrl.u32 %v4256_v1, 16  ;;  %v2587_v24 = vrot.slane %v2585_v14, 5  ;;  %v2593_v25 = vrot.slane %v2591_v15, 5  ;;  %v4345_v1 = vld [vmem:[%s4653_s22 + $0x80] sm:$0x1] }
  0x4a   : > { %v2781_v23 = vrot.slane %v2780_v13, 4  ;;  %v2601_v26 = vshll.u32 %v4257_v10, 16  ;;  %v2791_v28 = vrot.slane %v2790_v18, 4  ;;  %v2798_v30 = vshrl.u32 %v4282_v16, 16 }
  0x4b   : > { %v2597_v29 = vrot.slane %v2595_v21, 4  ;;  %v2801_v31 = vshll.u32 %v4282_v16, 16  ;;  %v2588_v33 = vor.u32 %v2587_v24, %v2584_v20  ;;  %v2807_v36 = vshll.u32 %v4283_v22, 16 }
  0x4c   : > { %2289 = vrot.lane.b32.xlu0 %v4192_v12, %s4600_s27  ;;  %v2786_v32 = vsel %vm4705_vm5, %v2781_v23, %v2785_v6  ;;  %v2603_v34 = vrot.slane %v2601_v26, 5  ;;  %2484 = vrot.lane.b32.xlu1 %v4525_v17, %s4601_s28  ;;  %v2796_v39 = vsel %vm4705_vm5, %v2791_v28, %v2795_v19  ;;  %v2800_v41 = vrot.slane %v2798_v30, 4  ;;  %v4321_v17 = vld [vmem:[%s4653_s22 + $0x20] sm:$0x1] }
  0x4d   : > { %v2598_v40 = vor.u32 %v2597_v29, %v2593_v25  ;;  %v2803_v42 = vrot.slane %v2801_v31, 5  ;;  %v4311_v44 = vcombine.low %v2786_v32, %v2796_v39  ;;  %v2589_v45 = vrot.slane %v2588_v33, 4  ;;  %v465_v32 = vld [vmem:[%s4653_s22 + $0x80] sm:$0x1] }
  0x4e   : > { %v2809_v46 = vrot.slane %v2807_v36, 5  ;;  %v2811_v47 = vshrl.u32 %v4283_v22, 16  ;;  %v2817_v51 = vshll.u32 %v4284_v35, 16  ;;  %v2606_v52 = vshrl.u32 %v4258_v37, 16  ;;  %v463_v22 = vld [vmem:[%s4653_s22 + $0x78] sm:$0xf] }
  0x4f   : > { %v2599_v49 = vrot.slane %v2598_v40, 4  ;;  %v2804_v50 = vor.u32 %v2803_v42, %v2800_v41  ;;  %v2594_v55 = vsel %vm4705_vm5, %v2589_v45, %v2593_v25  ;;  %v2609_v57 = vshll.u32 %v4258_v37, 16  ;;  %v439_v37 = vld [vmem:[%s4653_s22 + $0x18] sm:$0xf] }
  0x50   : > { %2468 = vrot.lane.b32.xlu0 %v4526_v27, %s4601_s28  ;;  %v2813_v56 = vrot.slane %v2811_v47, 4  ;;  %v2615_v58 = vshll.u32 %v4259_v43, 16  ;;  %2486 = vrot.lane.b32.xlu1 %v4527_v38, %s4601_s28  ;;  %v2819_v62 = vrot.slane %v2817_v51, 5  ;;  %v2608_v63 = vrot.slane %v2606_v52, 4  ;;  %v464_v27 = vld [vmem:[%s4653_s22 + $0x7c] sm:$0xf] }
  0x51   : > { %v2604_v60 = vsel %vm4705_vm5, %v2599_v49, %v2603_v34  ;;  %v2805_v61 = vrot.slane %v2804_v50, 4  ;;  %v2611_v4 = vrot.slane %v2609_v57, 5  ;;  %v2619_v10 = vshrl.u32 %v4259_v43, 16  ;;  %v440_v38 = vld [vmem:[%s4653_s22 + $0x1c] sm:$0xf] }
  0x52   : > { %v4303_v2 = vcombine.low %v2594_v55, %v2604_v60  ;;  %v2814_v3 = vor.u32 %v2813_v56, %v2809_v46  ;;  %v2617_v6 = vrot.slane %v2615_v58, 5  ;;  %v2625_v11 = vshll.u32 %v4260_v48, 16  ;;  %v441_v43 = vld [vmem:[%s4653_s22 + $0x20] sm:$0x1]  ;;  %v4346_v48 = vld [vmem:[%s4653_s22 + $0x84] sm:$0xe] }
  0x53   : > { %v2810_v9 = vsel %vm4705_vm5, %v2805_v61, %v2809_v46  ;;  %v4375_v12 = vrot.slane %v4343_v53, 9  ;;  %v2612_v14 = vor.u32 %v2611_v4, %v2608_v63  ;;  %v3232_v15 = vrot.slane %v4344_v59, 5  ;;  %v4347_v53 = vld [vmem:[%s4653_s22 + $0x88] sm:$0xf]  ;;  %v4322_v59 = vld [vmem:[%s4653_s22 + $0x24] sm:$0xe] }
  0x54   : > { %2470 = vrot.lane.b32.xlu0 %v4528_v54, %s4601_s28  ;;  %v2815_v13 = vrot.slane %v2814_v3, 4  ;;  %v3235_v16 = vrot.slane %v4345_v1, 5  ;;  %3029 = vrot.lane.b32.xlu1 %v4311_v44, %s4602_s29  ;;  %v2621_v18 = vrot.slane %v2619_v10, 4  ;;  %v2627_v19 = vrot.slane %v2625_v11, 5  ;;  %v4348_v54 = vld [vmem:[%s4653_s22 + $0x8c] sm:$0x1] }
  0x55   : > { %v4367_v20 = vrot.slane %v4319_v7, 9  ;;  %v3176_v21 = vrot.slane %v4320_v8, 5  ;;  %v2613_v24 = vrot.slane %v2612_v14, 4  ;;  %v3233_v25 = vsel %vm4655_vm2, %v4375_v12, %v3232_v15  ;;  %v4323_v1 = vld [vmem:[%s4653_s22 + $0x28] sm:$0xf] }
  0x56   : > { %v2820_v23 = vsel %vm4705_vm5, %v2815_v13, %v2819_v62  ;;  %v3234_v26 = vrot.slane %v3232_v15, 4  ;;  %v2622_v29 = vor.u32 %v2621_v18, %v2617_v6  ;;  %v3179_v35 = vrot.slane %v4321_v17, 5  ;;  %v4324_v7 = vld [vmem:[%s4653_s22 + $0x2c] sm:$0x1]  ;;  %v466_v12 = vld [vmem:[%s4653_s22 + $0x84] sm:$0xf] }
  0x57   : > { %v4312_v28 = vcombine.low %v2810_v9, %v2820_v23  ;;  %v3177_v30 = vsel %vm4655_vm2, %v4367_v20, %v3176_v21  ;;  %v3178_v31 = vrot.slane %v3176_v21, 4  ;;  %v2618_v33 = vsel %vm4705_vm5, %v2613_v24, %v2617_v6  ;;  %v467_v21 = vld [vmem:[%s4653_s22 + $0x88] sm:$0xf] }
  0x58   : > { %3013 = vrot.lane.b32.xlu0 %v4303_v2, %s4602_s29  ;;  %v3236_v34 = vsel %vm4655_vm2, %v3234_v26, %v3235_v16  ;;  %v725_v36 = vshrl.u32 %v463_v22, 16  ;;  %v2623_v39 = vrot.slane %v2622_v29, 4  ;;  %v728_v41 = vshll.u32 %v463_v22, 16 }
  0x59   : > { %3031 = vrot.lane.b32.xlu1 %v4312_v28, %s4602_s29  ;;  %v4391_v40 = vcombine.low %v3233_v25, %v3236_v34  ;;  %v734_v42 = vshll.u32 %v464_v27, 16  ;;  %v3180_v44 = vsel %vm4655_vm2, %v3178_v31, %v3179_v35  ;;  %v738_v46 = vshrl.u32 %v464_v27, 16 }
  0x5a   : > { %v727_v45 = vrot.slane %v725_v36, 4  ;;  %v744_v47 = vshll.u32 %v465_v32, 16  ;;  %v2628_v49 = vsel %vm4705_vm5, %v2623_v39, %v2627_v19  ;;  %v4383_v50 = vcombine.low %v3177_v30, %v3180_v44  ;;  %v442_v39 = vld [vmem:[%s4653_s22 + $0x24] sm:$0xf] }
  0x5b   : > { %v730_v51 = vrot.slane %v728_v41, 5  ;;  %v736_v52 = vrot.slane %v734_v42, 5  ;;  %v4304_v55 = vcombine.low %v2618_v33, %v2628_v49  ;;  %v740_v56 = vrot.slane %v738_v46, 4  ;;  %v468_v33 = vld [vmem:[%s4653_s22 + $0x8c] sm:$0x1] }
  0x5c   : > { %v746_v57 = vrot.slane %v744_v47, 5  ;;  %v533_v58 = vshrl.u32 %v439_v37, 16  ;;  %v536_v61 = vshll.u32 %v439_v37, 16  ;;  %v542_v62 = vshll.u32 %v440_v38, 16  ;;  %v1011_v46 = vld [vmem:[%s4653_s22 + $0x78] sm:$0xe] }
  0x5d   : > { %3350 = vrot.lane.b32.xlu1 %v4391_v40, %s4603_s30  ;;  %v731_v60 = vor.u32 %v730_v51, %v727_v45  ;;  %v546_v63 = vshrl.u32 %v440_v38, 16  ;;  %3015 = vrot.lane.b32.xlu0 %v4304_v55, %s4602_s29  ;;  %v741_v2 = vor.u32 %v740_v56, %v736_v52  ;;  %v552_v4 = vshll.u32 %v441_v43, 16  ;;  %v443_v40 = vld [vmem:[%s4653_s22 + $0x28] sm:$0xf]  ;;  %v444_v45 = vld [vmem:[%s4653_s22 + $0x2c] sm:$0x1] }
  0x5e   : > { %v535_v3 = vrot.slane %v533_v58, 4  ;;  %v4376_v6 = vrot.slane %v4346_v48, 9  ;;  %v538_v9 = vrot.slane %v536_v61, 5  ;;  %v544_v10 = vrot.slane %v542_v62, 5  ;;  %v1012_v51 = vld [vmem:[%s4653_s22 + $0x7c] sm:$0xf] }
  0x5f   : > { %v732_v8 = vrot.slane %v731_v60, 4  ;;  %v548_v11 = vrot.slane %v546_v63, 4  ;;  %v742_v13 = vrot.slane %v741_v2, 4  ;;  %v554_v14 = vrot.slane %v552_v4, 5  ;;  %v1013_v56 = vld [vmem:[%s4653_s22 + $0x80] sm:$0x1] }
  0x60   : > { %v3239_v15 = vrot.slane %v4347_v53, 5  ;;  %v3242_v16 = vrot.slane %v4348_v54, 5  ;;  %v539_v18 = vor.u32 %v538_v9, %v535_v3  ;;  %v4368_v20 = vrot.slane %v4322_v59, 9  ;;  %v987_v61 = vld [vmem:[%s4653_s22 + $0x18] sm:$0xe] }
  0x61   : > { %v737_v17 = vsel %vm4705_vm5, %v732_v8, %v736_v52  ;;  %v549_v19 = vor.u32 %v548_v11, %v544_v10  ;;  %3334 = vrot.lane.b32.xlu0 %v4383_v50, %s4603_s30  ;;  %v747_v22 = vsel %vm4705_vm5, %v742_v13, %v746_v57  ;;  %v3183_v25 = vrot.slane %v4323_v1, 5  ;;  %v988_v3 = vld [vmem:[%s4653_s22 + $0x1c] sm:$0xf]  ;;  %v989_v9 = vld [vmem:[%s4653_s22 + $0x20] sm:$0x1] }
  0x62   : > { %v3240_v23 = vsel %vm4655_vm2, %v4376_v6, %v3239_v15  ;;  %v3241_v24 = vrot.slane %v3239_v15, 4  ;;  %v3977_v26 = vcombine.low %v737_v17, %v747_v22  ;;  %v540_v27 = vrot.slane %v539_v18, 4  ;;  %v4551_v15 = vld [vmem:[%s5874_s1] sm:$0xff]  }
  0x63   : > { %v550_v28 = vrot.slane %v549_v19, 4  ;;  %v3186_v29 = vrot.slane %v4324_v7, 5  ;;  %v3184_v31 = vsel %vm4655_vm2, %v4368_v20, %v3183_v25  ;;  %v3185_v32 = vrot.slane %v3183_v25, 4  ;;  %v1015_v20 = vld [vmem:[%s4653_s22 + $0x88] sm:$0xf]  ;;  %4442 = vmatprep.subr.bf16.mxu0 %v4551_v15  ;;  %4480 = vmatprep.subr.bf16.mxu1 %v4551_v15 }
  0x64   : > { %v3243_v30 = vsel %vm4655_vm2, %v3241_v24, %v3242_v16  ;;  %v749_v34 = vshrl.u32 %v466_v12, 16  ;;  %936 = vrot.lane.b32.xlu1 %v3977_v26, %s4598_s25  ;;  %v545_v35 = vsel %vm4705_vm5, %v540_v27, %v544_v10  ;;  %v752_v38 = vshll.u32 %v466_v12, 16  ;;  %v990_v26 = vld [vmem:[%s4653_s22 + $0x24] sm:$0xe]  ;;  %v4552_v27 = vld [vmem:[%s5874_s1 + $0x8] sm:$0xff]   ;;  %4443 = vmatpush3.bf16.msra.mxu0 %v4551_v15 }
  0x65   : > { %v555_v36 = vsel %vm4705_vm5, %v550_v28, %v554_v14  ;;  %v4392_v37 = vcombine.low %v3240_v23, %v3243_v30  ;;  %v3187_v42 = vsel %vm4655_vm2, %v3185_v32, %v3186_v29  ;;  %v758_v44 = vshll.u32 %v467_v21, 16  ;;  %v1014_v14 = vld [vmem:[%s4653_s22 + $0x84] sm:$0xe]  ;;  %v991_v32 = vld [vmem:[%s4653_s22 + $0x28] sm:$0xf]  ;;  %4483 = vmatpush3.bf16.msra.mxu1 %v4551_v15  ;;  %4444 = vmatprep.subr.bf16.mxu0 %v4552_v27 }
  0x66   : > { %v3969_v41 = vcombine.low %v545_v35, %v555_v36  ;;  %v751_v43 = vrot.slane %v749_v34, 4  ;;  %v4384_v47 = vcombine.low %v3184_v31, %v3187_v42  ;;  %v754_v48 = vrot.slane %v752_v38, 5  ;;  %v4093_v42 = vld [vmem:[%s4653_s22 + $0x84] sm:$0xf]  ;;  %4481 = vmatprep.subr.bf16.mxu1 %v4552_v27 }
  0x67   : > { %v762_v49 = vshrl.u32 %v467_v21, 16  ;;  %v768_v50 = vshll.u32 %v468_v33, 16  ;;  %v760_v52 = vrot.slane %v758_v44, 5  ;;  %v557_v53 = vshrl.u32 %v442_v39, 16  ;;  %v1016_v21 = vld [vmem:[%s4653_s22 + $0x8c] sm:$0x1] }
  0x68   : > { %920 = vrot.lane.b32.xlu0 %v3969_v41, %s4598_s25  ;;  %v560_v54 = vshll.u32 %v442_v39, 16  ;;  %v566_v55 = vshll.u32 %v443_v40, 16  ;;  %3352 = vrot.lane.b32.xlu1 %v4392_v37, %s4603_s30  ;;  %v755_v57 = vor.u32 %v754_v48, %v751_v43  ;;  %v570_v60 = vshrl.u32 %v443_v40, 16  ;;  %v992_v37 = vld [vmem:[%s4653_s22 + $0x2c] sm:$0x1] }
  0x69   : > { %v764_v58 = vrot.slane %v762_v49, 4  ;;  %v770_v59 = vrot.slane %v768_v50, 5  ;;  %v559_v62 = vrot.slane %v557_v53, 4  ;;  %v576_v2 = vshll.u32 %v444_v45, 16  ;;  %v4094_v43 = vld [vmem:[%s4653_s22 + $0x88] sm:$0xf]  ;;  %4445 = vmatpush3.bf16.msra.mxu0 %v4552_v27  ;;  %4484 = vmatpush3.bf16.msra.mxu1 %v4552_v27 }
  0x6a   : > { %v562_v63 = vrot.slane %v560_v54, 5  ;;  %v568_v1 = vrot.slane %v566_v55, 5  ;;  %v756_v4 = vrot.slane %v755_v57, 4  ;;  %v572_v7 = vrot.slane %v570_v60, 4  ;;  %v4095_v48 = vld [vmem:[%s4653_s22 + $0x8c] sm:$0x1] }
  0x6b   : > { %v765_v6 = vor.u32 %v764_v58, %v760_v52  ;;  %v3993_v8 = vrot.slane %v1011_v46, 9  ;;  %v578_v11 = vrot.slane %v576_v2, 5  ;;  %v1152_v12 = vrot.slane %v1012_v51, 5  ;;  %v4069_v53 = vld [vmem:[%s4653_s22 + $0x24] sm:$0xf] }
  0x6c   : > { %3336 = vrot.lane.b32.xlu0 %v4384_v47, %s4603_s30  ;;  %v563_v10 = vor.u32 %v562_v63, %v559_v62  ;;  %v1155_v13 = vrot.slane %v1013_v56, 5  ;;  %v761_v16 = vsel %vm4705_vm5, %v756_v4, %v760_v52  ;;  %v573_v18 = vor.u32 %v572_v7, %v568_v1  ;;  %v4070_v54 = vld [vmem:[%s4653_s22 + $0x28] sm:$0xf] }
  0x6d   : > { %v766_v17 = vrot.slane %v765_v6, 4  ;;  %v3985_v19 = vrot.slane %v987_v61, 9  ;;  %v1153_v23 = vsel %vm4655_vm2, %v3993_v8, %v1152_v12  ;;  %v1154_v24 = vrot.slane %v1152_v12, 4 }
  0x6e   : > { %v564_v22 = vrot.slane %v563_v10, 4  ;;  %v1096_v25 = vrot.slane %v988_v3, 5  ;;  %v574_v29 = vrot.slane %v573_v18, 4  ;;  %v1099_v30 = vrot.slane %v989_v9, 5 }
  0x6f   : > { %v771_v28 = vsel %vm4705_vm5, %v766_v17, %v770_v59  ;;  %v3994_v31 = vrot.slane %v1014_v14, 9  ;;  %v1156_v35 = vsel %vm4655_vm2, %v1154_v24, %v1155_v13  ;;  %v1159_v41 = vrot.slane %v1015_v20, 5  ;;  %v4071_v59 = vld [vmem:[%s4653_s22 + $0x2c] sm:$0x1]  ;;  %v4529_v20 = vld [vmem:[%s4653_s22 + $0x84] sm:$0xff]  }
  0x70   : > { %v3978_v33 = vcombine.low %v761_v16, %v771_v28  ;;  %v569_v34 = vsel %vm4705_vm5, %v564_v22, %v568_v1  ;;  %v1097_v36 = vsel %vm4655_vm2, %v3985_v19, %v1096_v25  ;;  %v579_v38 = vsel %vm4705_vm5, %v574_v29, %v578_v11  ;;  %v4096_v1 = vld [vmem:[%s4653_s22 + $0x90] sm:$0xf]  ;;  %v4097_v19 = vld [vmem:[%s4653_s22 + $0x94] sm:$0xf]  ;;  %v4098_v29 = vld [vmem:[%s4653_s22 + $0x98] sm:$0x1] }
  0x71   : > { %v4009_v39 = vcombine.low %v1153_v23, %v1156_v35  ;;  %v1098_v40 = vrot.slane %v1096_v25, 4  ;;  %v3970_v44 = vcombine.low %v569_v34, %v579_v38  ;;  %v1162_v45 = vrot.slane %v1016_v21, 5  ;;  %v4072_v35 = vld [vmem:[%s4653_s22 + $0x30] sm:$0xf] }
  0x72   : > { %938 = vrot.lane.b32.xlu1 %v3978_v33, %s4598_s25  ;;  %v3986_v46 = vrot.slane %v990_v26, 9  ;;  %v1103_v47 = vrot.slane %v991_v32, 5  ;;  %v1160_v50 = vsel %vm4655_vm2, %v3994_v31, %v1159_v41  ;;  %v1161_v51 = vrot.slane %v1159_v41, 4  ;;  %v4531_v41 = vld [vmem:[%s4653_s22 + $0x90] sm:$0xff]  }
  0x73   : > { %v1100_v49 = vsel %vm4655_vm2, %v1098_v40, %v1099_v30  ;;  %v1106_v52 = vrot.slane %v992_v37, 5  ;;  %922 = vrot.lane.b32.xlu0 %v3970_v44, %s4598_s25  ;;  %v1775_v58 = vshrl.u32 %v4093_v42, 16  ;;  %v1778_v61 = vshll.u32 %v4093_v42, 16  ;;  %v4530_v30 = vld [vmem:[%s4653_s22 + $0x24] sm:$0xff]   ;;  %v4073_v40 = vld [vmem:[%s4653_s22 + $0x34] sm:$0xf] }
  0x74   : > { %v4001_v55 = vcombine.low %v1097_v36, %v1100_v49  ;;  %v1104_v56 = vsel %vm4655_vm2, %v3986_v46, %v1103_v47  ;;  %v1105_v57 = vrot.slane %v1103_v47, 4  ;;  %v1163_v60 = vsel %vm4655_vm2, %v1161_v51, %v1162_v45  ;;  %v4532_v42 = vld [vmem:[%s4653_s22 + $0x30] sm:$0xff]  }
  0x75   : > { %v1784_v62 = vshll.u32 %v4094_v43, 16  ;;  %v1788_v63 = vshrl.u32 %v4094_v43, 16  ;;  %v4010_v2 = vcombine.low %v1160_v50, %v1163_v60  ;;  %v1777_v4 = vrot.slane %v1775_v58, 4  ;;  %v4074_v50 = vld [vmem:[%s4653_s22 + $0x38] sm:$0x1] }
  0x76   : > { %1260 = vrot.lane.b32.xlu1 %v4009_v39, %s4597_s24  ;;  %v1107_v3 = vsel %vm4655_vm2, %v1105_v57, %v1106_v52  ;;  %v1794_v6 = vshll.u32 %v4095_v48, 16  ;;  %v1780_v8 = vrot.slane %v1778_v61, 5  ;;  %v1583_v12 = vshrl.u32 %v4069_v53, 16  ;;  %v4158_v57 = vld [vmem:[%s4653_s22 + $0x88] sm:$0xf] }
  0x77   : > { %v4002_v7 = vcombine.low %v1104_v56, %v1107_v3  ;;  %v1786_v9 = vrot.slane %v1784_v62, 5  ;;  %v1790_v10 = vrot.slane %v1788_v63, 4  ;;  %1244 = vrot.lane.b32.xlu0 %v4001_v55, %s4597_s24  ;;  %v1586_v13 = vshll.u32 %v4069_v53, 16  ;;  %v4157_v56 = vld [vmem:[%s4653_s22 + $0x84] sm:$0xe] }
  0x78   : > { %v1796_v11 = vrot.slane %v1794_v6, 5  ;;  %v1592_v14 = vshll.u32 %v4070_v54, 16  ;;  %v1781_v15 = vor.u32 %v1780_v8, %v1777_v4  ;;  %v1596_v17 = vshrl.u32 %v4070_v54, 16  ;;  %v4159_v62 = vld [vmem:[%s4653_s22 + $0x8c] sm:$0x1] }
  0x79   : > { %v1791_v16 = vor.u32 %v1790_v10, %v1786_v9  ;;  %v1602_v18 = vshll.u32 %v4071_v59, 16  ;;  %v1585_v21 = vrot.slane %v1583_v12, 4  ;;  %v1588_v22 = vrot.slane %v1586_v13, 5  ;;  %v4133_v63 = vld [vmem:[%s4653_s22 + $0x24] sm:$0xe] }
  0x7a   : > { %1262 = vrot.lane.b32.xlu1 %v4010_v2, %s4597_s24  ;;  %v1594_v23 = vrot.slane %v1592_v14, 5  ;;  %v1799_v24 = vshrl.u32 %v4096_v1, 16  ;;  %v1782_v25 = vrot.slane %v1781_v15, 4  ;;  %v1598_v27 = vrot.slane %v1596_v17, 4  ;;  %v4134_v6 = vld [vmem:[%s4653_s22 + $0x28] sm:$0xf] }
  0x7b   : > { %v1792_v26 = vrot.slane %v1791_v16, 4  ;;  %v1604_v28 = vrot.slane %v1602_v18, 5  ;;  %1246 = vrot.lane.b32.xlu0 %v4002_v7, %s4597_s24  ;;  %v1589_v31 = vor.u32 %v1588_v22, %v1585_v21  ;;  %v1802_v33 = vshll.u32 %v4096_v1, 16  ;;  %v4160_v16 = vld [vmem:[%s4653_s22 + $0x90] sm:$0xe] }
  0x7c   : > { %v1801_v32 = vrot.slane %v1799_v24, 4  ;;  %v1808_v34 = vshll.u32 %v4097_v19, 16  ;;  %v1787_v36 = vsel %vm4705_vm5, %v1782_v25, %v1786_v9  ;;  %v1599_v38 = vor.u32 %v1598_v27, %v1594_v23  ;;  %v4161_v17 = vld [vmem:[%s4653_s22 + $0x94] sm:$0xf]  ;;  %v4162_v22 = vld [vmem:[%s4653_s22 + $0x98] sm:$0x1] }
  0x7d   : > { %v1797_v37 = vsel %vm4705_vm5, %v1792_v26, %v1796_v11  ;;  %v1812_v39 = vshrl.u32 %v4097_v19, 16  ;;  %v1590_v44 = vrot.slane %v1589_v31, 4  ;;  %v1804_v45 = vrot.slane %v1802_v33, 5  ;;  %v4135_v11 = vld [vmem:[%s4653_s22 + $0x2c] sm:$0x1] }
  0x7e   : > { %1441 = vrot.lane.b32.xlu1 %v4529_v20, %s4596_s23  ;;  %v4121_v43 = vcombine.low %v1787_v36, %v1797_v37  ;;  %v1810_v46 = vrot.slane %v1808_v34, 5  ;;  %v1600_v47 = vrot.slane %v1599_v38, 4  ;;  %v1818_v49 = vshll.u32 %v4098_v29, 16  ;;  %v4136_v27 = vld [vmem:[%s4653_s22 + $0x30] sm:$0xe] }
  0x7f   : > { %v1814_v48 = vrot.slane %v1812_v39, 4  ;;  %v1607_v51 = vshrl.u32 %v4072_v35, 16  ;;  %1425 = vrot.lane.b32.xlu0 %v4530_v30, %s4596_s23  ;;  %v1595_v52 = vsel %vm4705_vm5, %v1590_v44, %v1594_v23  ;;  %v1805_v53 = vor.u32 %v1804_v45, %v1801_v32  ;;  %v4137_v32 = vld [vmem:[%s4653_s22 + $0x34] sm:$0xf]  ;;  %v4138_v37 = vld [vmem:[%s4653_s22 + $0x38] sm:$0x1] }
  0x80   : > { %v1610_v54 = vshll.u32 %v4072_v35, 16  ;;  %v1616_v55 = vshll.u32 %v4073_v40, 16  ;;  %v1605_v58 = vsel %vm4705_vm5, %v1600_v47, %v1604_v28  ;;  %v1820_v60 = vrot.slane %v1818_v49, 5  ;;  %v4285_v38 = vld [vmem:[%s4653_s22 + $0x90] sm:$0xf] }
  0x81   : > { %v1815_v59 = vor.u32 %v1814_v48, %v1810_v46  ;;  %v1609_v61 = vrot.slane %v1607_v51, 4  ;;  %v4113_v1 = vcombine.low %v1595_v52, %v1605_v58  ;;  %v1806_v2 = vrot.slane %v1805_v53, 4  ;;  %v4287_v44 = vld [vmem:[%s4653_s22 + $0x98] sm:$0x1]  ;;  %v4261_v45 = vld [vmem:[%s4653_s22 + $0x30] sm:$0xf] }
  0x82   : > { %1443 = vrot.lane.b32.xlu1 %v4531_v41, %s4596_s23  ;;  %v1612_v3 = vrot.slane %v1610_v54, 5  ;;  %v1618_v4 = vrot.slane %v1616_v55, 5  ;;  %v1620_v8 = vshrl.u32 %v4073_v40, 16  ;;  %v1626_v9 = vshll.u32 %v4074_v50, 16 }
  0x83   : > { %v1816_v7 = vrot.slane %v1815_v59, 4  ;;  %v4185_v10 = vrot.slane %v4157_v56, 9  ;;  %1427 = vrot.lane.b32.xlu0 %v4532_v42, %s4596_s23  ;;  %v1811_v12 = vsel %vm4705_vm5, %v1806_v2, %v1810_v46  ;;  %v2199_v14 = vrot.slane %v4158_v57, 5  ;;  %v4262_v59 = vld [vmem:[%s4653_s22 + $0x34] sm:$0xf] }
  0x84   : > { %v1613_v13 = vor.u32 %v1612_v3, %v1609_v61  ;;  %v2202_v15 = vrot.slane %v4159_v62, 5  ;;  %v1622_v19 = vrot.slane %v1620_v8, 4  ;;  %v1628_v20 = vrot.slane %v1626_v9, 5 }
  0x85   : > { %v1821_v18 = vsel %vm4705_vm5, %v1816_v7, %v1820_v60  ;;  %v4177_v21 = vrot.slane %v4133_v63, 9  ;;  %v2200_v25 = vsel %vm4655_vm2, %v4185_v10, %v2199_v14  ;;  %v2201_v26 = vrot.slane %v2199_v14, 4  ;;  %v5001_v46 = vpop.permute.xlu1 %1437 }
  0x86   : > { %1986 = vrot.lane.b32.xlu1 %v4121_v43, %s4599_s26  ;;  %v4122_v23 = vcombine.low %v1811_v12, %v1821_v18  ;;  %v1614_v24 = vrot.slane %v1613_v13, 4  ;;  %v1623_v28 = vor.u32 %v1622_v19, %v1618_v4  ;;  %v2143_v29 = vrot.slane %v4134_v6, 5  ;;  %v4286_v43 = vld [vmem:[%s4653_s22 + $0x94] sm:$0xf]  ;;  %v4288_v12 = vld [vmem:[%s4653_s22 + $0x9c] sm:$0xf] }
  0x87   : > { %v2146_v30 = vrot.slane %v4135_v11, 5  ;;  %v4186_v31 = vrot.slane %v4160_v16, 9  ;;  %1970 = vrot.lane.b32.xlu0 %v4113_v1, %s4599_s26  ;;  %v2203_v34 = vsel %vm4655_vm2, %v2201_v26, %v2202_v15  ;;  %v2206_v35 = vrot.slane %v4161_v17, 5  ;;  %v5020_v11 = vpop.permute.xlu0 %1421  ;;  %v4289_v18 = vld [vmem:[%s4653_s22 + $0xa0] sm:$0xf] }
  0x88   : > { %v1619_v33 = vsel %vm4705_vm5, %v1614_v24, %v1618_v4  ;;  %v2209_v36 = vrot.slane %v4162_v22, 5  ;;  %v1624_v39 = vrot.slane %v1623_v28, 4  ;;  %v4201_v40 = vcombine.low %v2200_v25, %v2203_v34  ;;  %v4263_v4 = vld [vmem:[%s4653_s22 + $0x38] sm:$0x1]  ;;  %v4533_v24 = vld [vmem:[%s4653_s22 + $0x90] sm:$0xff]  }
  0x89   : > { %v2144_v41 = vsel %vm4655_vm2, %v4177_v21, %v2143_v29  ;;  %v2145_v42 = vrot.slane %v2143_v29, 4  ;;  %v2207_v47 = vsel %vm4655_vm2, %v4186_v31, %v2206_v35  ;;  %v2208_v48 = vrot.slane %v2206_v35, 4  ;;  %v4264_v29 = vld [vmem:[%s4653_s22 + $0x3c] sm:$0xf] }
  0x8a   : > { %1988 = vrot.lane.b32.xlu1 %v4122_v23, %s4599_s26  ;;  %v4178_v49 = vrot.slane %v4136_v27, 9  ;;  %v2150_v50 = vrot.slane %v4137_v32, 5  ;;  %v1629_v51 = vsel %vm4705_vm5, %v1624_v39, %v1628_v20  ;;  %v2153_v53 = vrot.slane %v4138_v37, 5  ;;  %v4290_v23 = vld [vmem:[%s4653_s22 + $0xa4] sm:$0x1] }
  0x8b   : > { %v2147_v52 = vsel %vm4655_vm2, %v2145_v42, %v2146_v30  ;;  %v2822_v54 = vshrl.u32 %v4285_v38, 16  ;;  %v4114_v55 = vcombine.low %v1619_v33, %v1629_v51  ;;  %v2210_v57 = vsel %vm4655_vm2, %v2208_v48, %v2209_v36  ;;  %v4265_v51 = vld [vmem:[%s4653_s22 + $0x40] sm:$0xf] }
  0x8c   : > { %v4193_v56 = vcombine.low %v2144_v41, %v2147_v52  ;;  %v2151_v58 = vsel %vm4655_vm2, %v4178_v49, %v2150_v50  ;;  %v4202_v60 = vcombine.low %v2207_v47, %v2210_v57  ;;  %v2152_v61 = vrot.slane %v2150_v50, 4  ;;  %v5023_v13 = vpop.permute.xlu1 %1256  ;;  %v4536_v57 = vld [vmem:[%s4653_s22 + $0x3c] sm:$0xff]  }
  0x8d   : > { %v2824_v62 = vrot.slane %v2822_v54, 4  ;;  %v2825_v63 = vshll.u32 %v4285_v38, 16  ;;  %1972 = vrot.lane.b32.xlu0 %v4114_v55, %s4599_s26  ;;  %v2831_v1 = vshll.u32 %v4286_v43, 16  ;;  %v2835_v2 = vshrl.u32 %v4286_v43, 16  ;;  %v4534_v38 = vld [vmem:[%s4653_s22 + $0x30] sm:$0xff]  }
  0x8e   : > { %2307 = vrot.lane.b32.xlu1 %v4201_v40, %s4600_s27  ;;  %v2841_v3 = vshll.u32 %v4287_v44, 16  ;;  %v2630_v6 = vshrl.u32 %v4261_v45, 16  ;;  %v2154_v7 = vsel %vm4655_vm2, %v2152_v61, %v2153_v53  ;;  %v2633_v9 = vshll.u32 %v4261_v45, 16  ;;  %v5034_v43 = vpop.permute.xlu0 %1240  ;;  %v4535_v45 = vld [vmem:[%s4653_s22 + $0x9c] sm:$0xff]   ;;  %v4266_v55 = vld [vmem:[%s4653_s22 + $0x44] sm:$0x1] }
  0x8f   : > { %v2827_v8 = vrot.slane %v2825_v63, 5  ;;  %v2639_v10 = vshll.u32 %v4262_v59, 16  ;;  %v4194_v14 = vcombine.low %v2151_v58, %v2154_v7  ;;  %v2833_v15 = vrot.slane %v2831_v1, 5 }
  0x90   : > { %v2837_v16 = vrot.slane %v2835_v2, 4  ;;  %v2843_v17 = vrot.slane %v2841_v3, 5  ;;  %v2632_v20 = vrot.slane %v2630_v6, 4  ;;  %v2635_v21 = vrot.slane %v2633_v9, 5 }
  0x91   : > { %v2828_v19 = vor.u32 %v2827_v8, %v2824_v62  ;;  %v2641_v22 = vrot.slane %v2639_v10, 5  ;;  %2291 = vrot.lane.b32.xlu0 %v4193_v56, %s4600_s27  ;;  %v2643_v26 = vshrl.u32 %v4262_v59, 16  ;;  %v2649_v27 = vshll.u32 %v4263_v4, 16  ;;  %v5036_v44 = vpop.permute.xlu1 %1258  ;;  %v4349_v62 = vld [vmem:[%s4653_s22 + $0x90] sm:$0xe] }
  0x92   : > { %2309 = vrot.lane.b32.xlu1 %v4202_v60, %s4600_s27  ;;  %v2838_v25 = vor.u32 %v2837_v16, %v2833_v15  ;;  %v2846_v28 = vshrl.u32 %v4288_v12, 16  ;;  %v2636_v31 = vor.u32 %v2635_v21, %v2632_v20  ;;  %v2849_v32 = vshll.u32 %v4288_v12, 16  ;;  %v4350_v4 = vld [vmem:[%s4653_s22 + $0x94] sm:$0xf]  ;;  %v4351_v10 = vld [vmem:[%s4653_s22 + $0x98] sm:$0x1]  ;;  %v5060_v20 = vpop.permute.xlu0 %1242 }
  0x93   : > { %v2829_v30 = vrot.slane %v2828_v19, 4  ;;  %v2855_v33 = vshll.u32 %v4289_v18, 16  ;;  %v2645_v35 = vrot.slane %v2643_v26, 4  ;;  %v2651_v36 = vrot.slane %v2649_v27, 5  ;;  %v4325_v12 = vld [vmem:[%s4653_s22 + $0x30] sm:$0xe] }
  0x94   : > { %v2839_v34 = vrot.slane %v2838_v25, 4  ;;  %v2848_v37 = vrot.slane %v2846_v28, 4  ;;  %v2637_v40 = vrot.slane %v2636_v31, 4  ;;  %v2851_v41 = vrot.slane %v2849_v32, 5  ;;  %v4327_v19 = vld [vmem:[%s4653_s22 + $0x38] sm:$0x1] }
  0x95   : > { %v2834_v39 = vsel %vm4705_vm5, %v2829_v30, %v2833_v15  ;;  %v2857_v42 = vrot.slane %v2855_v33, 5  ;;  %2293 = vrot.lane.b32.xlu0 %v4194_v14, %s4600_s27  ;;  %v2646_v48 = vor.u32 %v2645_v35, %v2641_v22  ;;  %v2859_v49 = vshrl.u32 %v4289_v18, 16  ;;  %v4326_v18 = vld [vmem:[%s4653_s22 + $0x34] sm:$0xf]  ;;  %v469_v30 = vld [vmem:[%s4653_s22 + $0x90] sm:$0xf] }
  0x96   : > { %2488 = vrot.lane.b32.xlu1 %v4533_v24, %s4601_s28  ;;  %v2844_v47 = vsel %vm4705_vm5, %v2839_v34, %v2843_v17  ;;  %v2865_v50 = vshll.u32 %v4290_v23, 16  ;;  %v2642_v53 = vsel %vm4705_vm5, %v2637_v40, %v2641_v22  ;;  %v2852_v54 = vor.u32 %v2851_v41, %v2848_v37  ;;  %v470_v35 = vld [vmem:[%s4653_s22 + $0x94] sm:$0xf]  ;;  %v471_v40 = vld [vmem:[%s4653_s22 + $0x98] sm:$0x1] }
  0x97   : > { %v4313_v52 = vcombine.low %v2834_v39, %v2844_v47  ;;  %v2654_v56 = vshrl.u32 %v4264_v29, 16  ;;  %v2647_v58 = vrot.slane %v2646_v48, 4  ;;  %v2861_v59 = vrot.slane %v2859_v49, 4  ;;  %v445_v41 = vld [vmem:[%s4653_s22 + $0x30] sm:$0xf] }
  0x98   : > { %v2867_v60 = vrot.slane %v2865_v50, 5  ;;  %v2657_v61 = vshll.u32 %v4264_v29, 16  ;;  %v2853_v63 = vrot.slane %v2852_v54, 4  ;;  %v2663_v2 = vshll.u32 %v4265_v51, 16  ;;  %v446_v49 = vld [vmem:[%s4653_s22 + $0x34] sm:$0xf] }
  0x99   : > { %v2656_v1 = vrot.slane %v2654_v56, 4  ;;  %v2667_v3 = vshrl.u32 %v4265_v51, 16  ;;  %2472 = vrot.lane.b32.xlu0 %v4534_v38, %s4601_s28  ;;  %v2652_v6 = vsel %vm4705_vm5, %v2647_v58, %v2651_v36  ;;  %v2862_v7 = vor.u32 %v2861_v59, %v2857_v42  ;;  %v5062_v21 = vpop.permute.xlu1 %918  ;;  %v447_v50 = vld [vmem:[%s4653_s22 + $0x38] sm:$0x1] }
  0x9a   : > { %2490 = vrot.lane.b32.xlu1 %v4535_v45, %s4601_s28  ;;  %v2659_v8 = vrot.slane %v2657_v61, 5  ;;  %v2673_v9 = vshll.u32 %v4266_v55, 16  ;;  %v4305_v14 = vcombine.low %v2642_v53, %v2652_v6  ;;  %v2858_v15 = vsel %vm4705_vm5, %v2853_v63, %v2857_v42  ;;  %v4540_v6 = vld [vmem:[%s4653_s22 + $0x60] sm:$0xff]  }
  0x9b   : > { %v2665_v16 = vrot.slane %v2663_v2, 5  ;;  %v2669_v17 = vrot.slane %v2667_v3, 4  ;;  %v2863_v22 = vrot.slane %v2862_v7, 4  ;;  %v4377_v25 = vrot.slane %v4349_v62, 9  ;;  %v4537_v2 = vld [vmem:[%s4653_s22 + $0xc] sm:$0xff]   ;;  %v4538_v3 = vld [vmem:[%s4653_s22] sm:$0xff]  }
  0x9c   : > { %v2660_v23 = vor.u32 %v2659_v8, %v2656_v1  ;;  %v2675_v24 = vrot.slane %v2673_v9, 5  ;;  %v3246_v27 = vrot.slane %v4350_v4, 5  ;;  %v3249_v28 = vrot.slane %v4351_v10, 5  ;;  %v5086_v55 = vpop.permute.xlu0 %916  ;;  %v4539_v4 = vld [vmem:[%s4653_s22 + $0x6c] sm:$0xff]   ;;  %v4549_v7 = vld [vmem:[%s4653_s22 + $0x78] sm:$0xff]   ;;  %v4553_v9 = vld [vmem:[%s4653_s22 + $0x84] sm:$0xff]  }
  0x9d   : > { %v2670_v26 = vor.u32 %v2669_v17, %v2665_v16  ;;  %v4369_v29 = vrot.slane %v4325_v12, 9  ;;  %2474 = vrot.lane.b32.xlu0 %v4536_v57, %s4601_s28  ;;  %v2868_v31 = vsel %vm4705_vm5, %v2863_v22, %v2867_v60  ;;  %v3190_v33 = vrot.slane %v4326_v18, 5  ;;  %v4550_v8 = vld [vmem:[%s4653_s22 + $0x18] sm:$0xff]   ;;  %418 = vst.msk [vmem:[#allocation2 + $0x8] sm:$0xff] %vm416_vm6, %v4537_v2  ;;  %417 = vst.msk [vmem:[#allocation2] sm:$0xff] %vm416_vm6, %v4538_v3 }
  0x9e   : > { %3033 = vrot.lane.b32.xlu1 %v4313_v52, %s4602_s29  ;;  %v2661_v32 = vrot.slane %v2660_v23, 4  ;;  %v3193_v34 = vrot.slane %v4327_v19, 5  ;;  %v4314_v36 = vcombine.low %v2858_v15, %v2868_v31  ;;  %v3247_v38 = vsel %vm4655_vm2, %v4377_v25, %v3246_v27  ;;  %v4353_v23 = vld [vmem:[%s4653_s22 + $0xa0] sm:$0xf]  ;;  %v4328_v25 = vld [vmem:[%s4653_s22 + $0x3c] sm:$0xe] }
  0x9f   : > { %v2671_v37 = vrot.slane %v2670_v26, 4  ;;  %v3248_v39 = vrot.slane %v3246_v27, 4  ;;  %v5078_v45 = vsel %vm4655_vm2, %v4369_v29, %v3190_v33  ;;  %v3192_v47 = vrot.slane %v3190_v33, 4  ;;  %v4554_v26 = vld [vmem:[%s4653_s22 + $0x24] sm:$0xff]   ;;  %426 = vst.msk [vmem:[#allocation2 + $0x48] sm:$0xff] %vm416_vm6, %v4539_v4  ;;  %425 = vst.msk [vmem:[#allocation2 + $0x40] sm:$0xff] %vm416_vm6, %v4540_v6 }
  0xa0   : > { %v2666_v42 = vsel %vm4705_vm5, %v2661_v32, %v2665_v16  ;;  %v773_v48 = vshrl.u32 %v469_v30, 16  ;;  %v776_v53 = vshll.u32 %v469_v30, 16  ;;  %v782_v54 = vshll.u32 %v470_v35, 16  ;;  %v5105_v16 = vld [vmem:[%s4653_s22 + $0x9c] sm:$0xe]  ;;  %427 = vst.msk [vmem:[#allocation2 + $0x50] sm:$0xff] %vm416_vm6, %v4549_v7 }
  0xa1   : > { %v2676_v51 = vsel %vm4705_vm5, %v2671_v37, %v2675_v24  ;;  %v3250_v52 = vsel %vm4655_vm2, %v3248_v39, %v3249_v28  ;;  %v5088_v56 = vpop.permute.xlu1 %934  ;;  %3017 = vrot.lane.b32.xlu0 %v4305_v14, %s4602_s29  ;;  %v3194_v59 = vsel %vm4655_vm2, %v3192_v47, %v3193_v34  ;;  %v786_v1 = vshrl.u32 %v470_v35, 16  ;;  %v5109_v24 = vld [vmem:[%s4653_s22 + $0xa4] sm:$0x1]  ;;  %v4329_v35 = vld [vmem:[%s4653_s22 + $0x40] sm:$0xf]  ;;  %419 = vst.msk [vmem:[#allocation2 + $0x10] sm:$0xff] %vm416_vm6, %v4550_v8 }
  0xa2   : > { %3035 = vrot.lane.b32.xlu1 %v4314_v36, %s4602_s29  ;;  %v4306_v57 = vcombine.low %v2666_v42, %v2676_v51  ;;  %v4393_v58 = vcombine.low %v3247_v38, %v3250_v52  ;;  %v775_v60 = vrot.slane %v773_v48, 4  ;;  %v4385_v61 = vcombine.low %v5078_v45, %v3194_v59  ;;  %v4330_v39 = vld [vmem:[%s4653_s22 + $0x44] sm:$0x1]  ;;  %428 = vst.msk [vmem:[#allocation2 + $0x58] sm:$0xff] %vm416_vm6, %v4553_v9  ;;  %v472_v51 = vld [vmem:[%s4653_s22 + $0x9c] sm:$0xf] }
  0xa3   : > { %v778_v62 = vrot.slane %v776_v53, 5  ;;  %v5095_v63 = vrot.slane %v782_v54, 5  ;;  %v792_v10 = vshll.u32 %v471_v40, 16  ;;  %v581_v12 = vshrl.u32 %v445_v41, 16  ;;  %420 = vst.msk [vmem:[#allocation2 + $0x18] sm:$0xff] %vm416_vm6, %v4554_v26 }
  0xa4   : > { %v584_v14 = vshll.u32 %v445_v41, 16  ;;  %v590_v15 = vshll.u32 %v446_v49, 16  ;;  %v788_v18 = vrot.slane %v786_v1, 4  ;;  %v594_v19 = vshrl.u32 %v446_v49, 16  ;;  %966 = vst.msk [vmem:[#allocation2 + $0x8] sm:$0xff] %vm964_vm7, %v5062_v21  ;;  %965 = vst.msk [vmem:[#allocation2] sm:$0xff] %vm964_vm7, %v5086_v55 }
  0xa5   : > { %v779_v17 = vor.u32 %v778_v62, %v775_v60  ;;  %v600_v22 = vshll.u32 %v447_v50, 16  ;;  %3019 = vrot.lane.b32.xlu0 %v4306_v57, %s4602_s29  ;;  %v794_v27 = vrot.slane %v792_v10, 5  ;;  %v583_v28 = vrot.slane %v581_v12, 4  ;;  %v5117_v37 = vpop.permute.xlu1 %1439  ;;  %974 = vst.msk [vmem:[#allocation2 + $0x48] sm:$0xff] %vm964_vm7, %v5088_v56  ;;  %v473_v55 = vld [vmem:[%s4653_s22 + $0xa0] sm:$0xf] }
  0xa6   : > { %3354 = vrot.lane.b32.xlu1 %v4393_v58, %s4603_s30  ;;  %v586_v29 = vrot.slane %v584_v14, 5  ;;  %v592_v30 = vrot.slane %v590_v15, 5  ;;  %v789_v32 = vor.u32 %v788_v18, %v5095_v63  ;;  %v596_v33 = vrot.slane %v594_v19, 4  ;;  %v933_v36 = vpop.permute.xlu0 %932  ;;  %1289 = vst.msk [vmem:[#allocation2] sm:$0xff] %vm1288_vm8, %v5034_v43  ;;  %1290 = vst.msk [vmem:[#allocation2 + $0x8] sm:$0xff] %vm1288_vm8, %v5060_v20 }
  0xa7   : > { %v780_v31 = vrot.slane %v779_v17, 4  ;;  %v602_v34 = vrot.slane %v600_v22, 5  ;;  %v4378_v45 = vrot.slane %v5105_v16, 9  ;;  %v3253_v48 = vrot.slane %v4353_v23, 5  ;;  %973 = vst.msk [vmem:[#allocation2 + $0x40] sm:$0xff] %vm964_vm7, %v933_v36 }
  0xa8   : > { %v587_v38 = vor.u32 %v586_v29, %v583_v28  ;;  %v790_v41 = vrot.slane %v789_v32, 4  ;;  %v597_v42 = vor.u32 %v596_v33, %v592_v30  ;;  %v3256_v49 = vrot.slane %v5109_v24, 5  ;;  %1298 = vst.msk [vmem:[#allocation2 + $0x48] sm:$0xff] %vm1288_vm8, %v5036_v44  ;;  %1297 = vst.msk [vmem:[#allocation2 + $0x40] sm:$0xff] %vm1288_vm8, %v5023_v13  ;;  %v474_v60 = vld [vmem:[%s4653_s22 + $0xa4] sm:$0x1] }
  0xa9   : > { %v785_v40 = vsel %vm4705_vm5, %v780_v31, %v5095_v63  ;;  %3338 = vrot.lane.b32.xlu0 %v4385_v61, %s4603_s30  ;;  %v4370_v50 = vrot.slane %v4328_v25, 9  ;;  %v3197_v21 = vrot.slane %v4329_v35, 5  ;;  %v3200_v54 = vrot.slane %v4330_v39, 5  ;;  %v448_v4 = vld [vmem:[%s4653_s22 + $0x3c] sm:$0xf]  ;;  %1479 = vst.msk [vmem:[#allocation2 + $0x48] sm:$0xff] %vm1469_vm9, %v5117_v37 }
  0xaa   : > { %v588_v47 = vrot.slane %v587_v38, 4  ;;  %v795_v52 = vsel %vm4705_vm5, %v790_v41, %v794_v27  ;;  %v598_v53 = vrot.slane %v597_v42, 4  ;;  %v1424_v56 = vpop.permute.xlu0 %1423  ;;  %v3254_v43 = vsel %vm4655_vm2, %v4378_v45, %v3253_v48  ;;  %v5162_v62 = vpop.permute.xlu1 %1982  ;;  %v449_v6 = vld [vmem:[%s4653_s22 + $0x40] sm:$0xf]  ;;  %v450_v12 = vld [vmem:[%s4653_s22 + $0x44] sm:$0x1] }
  0xab   : > { %v3979_v57 = vcombine.low %v785_v40, %v795_v52  ;;  %v3255_v20 = vrot.slane %v3253_v48, 4  ;;  %v3198_v44 = vsel %vm4655_vm2, %v4370_v50, %v3197_v21  ;;  %v3199_v13 = vrot.slane %v3197_v21, 4  ;;  %v1017_v18 = vld [vmem:[%s4653_s22 + $0x90] sm:$0xe]  ;;  %v1018_v19 = vld [vmem:[%s4653_s22 + $0x94] sm:$0xf] }
  0xac   : > { %v593_v58 = vsel %vm4705_vm5, %v588_v47, %v592_v30  ;;  %v603_v59 = vsel %vm4705_vm5, %v598_v53, %v602_v34  ;;  %v797_v61 = vshrl.u32 %v472_v51, 16  ;;  %v800_v2 = vshll.u32 %v472_v51, 16  ;;  %v1019_v27 = vld [vmem:[%s4653_s22 + $0x98] sm:$0x1]  ;;  %v993_v32 = vld [vmem:[%s4653_s22 + $0x30] sm:$0xe] }
  0xad   : > { %940 = vrot.lane.b32.xlu1 %v3979_v57, %s4598_s25  ;;  %v3971_v63 = vcombine.low %v593_v58, %v603_v59  ;;  %v3257_v1 = vsel %vm4655_vm2, %v3255_v20, %v3256_v49  ;;  %v806_v3 = vshll.u32 %v473_v55, 16  ;;  %v3201_v8 = vsel %vm4655_vm2, %v3199_v13, %v3200_v54  ;;  %v994_v38 = vld [vmem:[%s4653_s22 + $0x34] sm:$0xf]  ;;  %v995_v47 = vld [vmem:[%s4653_s22 + $0x38] sm:$0x1]  ;;  %1470 = vst.msk [vmem:[#allocation2] sm:$0xff] %vm1469_vm9, %v5020_v11 }
  0xae   : > { %v4394_v7 = vcombine.low %v3254_v43, %v3257_v1  ;;  %v799_v9 = vrot.slane %v797_v61, 4  ;;  %v810_v10 = vshrl.u32 %v473_v55, 16  ;;  %v4386_v14 = vcombine.low %v3198_v44, %v3201_v8  ;;  %v5175_v22 = vpop.permute.xlu0 %1966  ;;  %v4564_v40 = vld [vmem:[%s4653_s22 + $0x90] sm:$0xff]   ;;  %1478 = vst.msk [vmem:[#allocation2 + $0x40] sm:$0xff] %vm1469_vm9, %v5001_v46  ;;  %1471 = vst.msk [vmem:[#allocation2 + $0x8] sm:$0xff] %vm1469_vm9, %v1424_v56 }
  0xaf   : > { %924 = vrot.lane.b32.xlu0 %v3971_v63, %s4598_s25  ;;  %v802_v15 = vrot.slane %v800_v2, 5  ;;  %v808_v16 = vrot.slane %v806_v3, 5  ;;  %v816_v17 = vshll.u32 %v474_v60, 16  ;;  %v605_v24 = vshrl.u32 %v448_v4, 16  ;;  %v1020_v52 = vld [vmem:[%s4653_s22 + $0x9c] sm:$0xe] }
  0xb0   : > { %v812_v23 = vrot.slane %v810_v10, 4  ;;  %v608_v25 = vshll.u32 %v448_v4, 16  ;;  %v614_v26 = vshll.u32 %v449_v6, 16  ;;  %v618_v30 = vshrl.u32 %v449_v6, 16  ;;  %429 = vst.msk [vmem:[#allocation2 + $0x60] sm:$0xff] %vm416_vm6, %v4564_v40  ;;  %v4565_v53 = vld [vmem:[%s4653_s22 + $0x30] sm:$0xff]  }
  0xb1   : > { %3356 = vrot.lane.b32.xlu1 %v4394_v7, %s4603_s30  ;;  %v803_v28 = vor.u32 %v802_v15, %v799_v9  ;;  %v818_v29 = vrot.slane %v816_v17, 5  ;;  %v624_v31 = vshll.u32 %v450_v12, 16  ;;  %v607_v34 = vrot.slane %v605_v24, 4  ;;  %v1021_v11 = vld [vmem:[%s4653_s22 + $0xa0] sm:$0xf]  ;;  %421 = vst.msk [vmem:[#allocation2 + $0x20] sm:$0xff] %vm416_vm6, %v4565_v53 }
  0xb2   : > { %v813_v33 = vor.u32 %v812_v23, %v808_v16  ;;  %v610_v35 = vrot.slane %v608_v25, 5  ;;  %v616_v36 = vrot.slane %v614_v26, 5  ;;  %v1985_v39 = vpop.permute.xlu1 %1984  ;;  %v620_v42 = vrot.slane %v618_v30, 4  ;;  %v5198_v57 = vld [vmem:[%s4653_s22 + $0xa4] sm:$0x1]  ;;  %2023 = vst.msk [vmem:[#allocation2 + $0x40] sm:$0xff] %vm2014_vm10, %v5162_v62 }
  0xb3   : > { %3340 = vrot.lane.b32.xlu0 %v4386_v14, %s4603_s30  ;;  %v804_v41 = vrot.slane %v803_v28, 4  ;;  %v626_v45 = vrot.slane %v624_v31, 5  ;;  %v3995_v50 = vrot.slane %v1017_v18, 9  ;;  %v1166_v51 = vrot.slane %v1018_v19, 5  ;;  %v996_v46 = vld [vmem:[%s4653_s22 + $0x3c] sm:$0xe] }
  0xb4   : > { %v814_v48 = vrot.slane %v813_v33, 4  ;;  %v611_v49 = vor.u32 %v610_v35, %v607_v34  ;;  %v621_v37 = vor.u32 %v620_v42, %v616_v36  ;;  %v1169_v54 = vrot.slane %v1019_v27, 5  ;;  %v997_v44 = vld [vmem:[%s4653_s22 + $0x40] sm:$0xf]  ;;  %v998_v13 = vld [vmem:[%s4653_s22 + $0x44] sm:$0x1] }
  0xb5   : > { %v809_v21 = vsel %vm4705_vm5, %v804_v41, %v808_v16  ;;  %v3987_v55 = vrot.slane %v993_v32, 9  ;;  %v1167_v20 = vsel %vm4655_vm2, %v3995_v50, %v1166_v51  ;;  %v1168_v59 = vrot.slane %v1166_v51, 4  ;;  %v4099_v3 = vld [vmem:[%s4653_s22 + $0x9c] sm:$0xf]  ;;  %v4100_v8 = vld [vmem:[%s4653_s22 + $0xa0] sm:$0xf] }
  0xb6   : > { %v1969_v56 = vpop.permute.xlu0 %1968  ;;  %v819_v58 = vsel %vm4705_vm5, %v814_v48, %v818_v29  ;;  %v612_v43 = vrot.slane %v611_v49, 4  ;;  %v2304_v60 = vpop.permute.xlu1 %2303  ;;  %v622_v63 = vrot.slane %v621_v37, 4  ;;  %v1110_v1 = vrot.slane %v994_v38, 5  ;;  %2015 = vst.msk [vmem:[#allocation2] sm:$0xff] %vm2014_vm10, %v5175_v22  ;;  %2024 = vst.msk [vmem:[#allocation2 + $0x48] sm:$0xff] %vm2014_vm10, %v1985_v39  ;;  %v4566_v17 = vld [vmem:[%s4653_s22 + $0x9c] sm:$0xff]  }
  0xb7   : > { %v3980_v61 = vcombine.low %v809_v21, %v819_v58  ;;  %v1113_v2 = vrot.slane %v995_v47, 5  ;;  %v1170_v6 = vsel %vm4655_vm2, %v1168_v59, %v1169_v54  ;;  %v3996_v7 = vrot.slane %v1020_v52, 9  ;;  %2016 = vst.msk [vmem:[#allocation2 + $0x8] sm:$0xff] %vm2014_vm10, %v1969_v56  ;;  %v4101_v16 = vld [vmem:[%s4653_s22 + $0xa4] sm:$0x1]  ;;  %v4567_v26 = vld [vmem:[%s4653_s22 + $0x3c] sm:$0xff]  }
  0xb8   : > { %v617_v4 = vsel %vm4705_vm5, %v612_v43, %v616_v36  ;;  %v627_v9 = vsel %vm4705_vm5, %v622_v63, %v626_v45  ;;  %v4011_v10 = vcombine.low %v1167_v20, %v1170_v6  ;;  %v1111_v12 = vsel %vm4655_vm2, %v3987_v55, %v1110_v1  ;;  %v4075_v28 = vld [vmem:[%s4653_s22 + $0x3c] sm:$0xf]  ;;  %430 = vst.msk [vmem:[#allocation2 + $0x68] sm:$0xff] %vm416_vm6, %v4566_v17  ;;  %v4076_v33 = vld [vmem:[%s4653_s22 + $0x40] sm:$0xf] }
  0xb9   : > { %942 = vrot.lane.b32.xlu1 %v3980_v61, %s4598_s25  ;;  %v1112_v14 = vrot.slane %v1110_v1, 4  ;;  %v3972_v18 = vcombine.low %v617_v4, %v627_v9  ;;  %v1173_v19 = vrot.slane %v1021_v11, 5  ;;  %v1176_v23 = vrot.slane %v5198_v57, 5  ;;  %2344 = vst.msk [vmem:[#allocation2 + $0x40] sm:$0xff] %vm2335_vm11, %v2304_v60  ;;  %v4077_v52 = vld [vmem:[%s4653_s22 + $0x44] sm:$0x1] }
  0xba   : > { %v2288_v15 = vpop.permute.xlu0 %2287  ;;  %v3988_v24 = vrot.slane %v996_v46, 9  ;;  %v2306_v25 = vpop.permute.xlu1 %2305  ;;  %v1117_v22 = vrot.slane %v997_v44, 5  ;;  %v1120_v27 = vrot.slane %v998_v13, 5  ;;  %v1823_v32 = vshrl.u32 %v4099_v3, 16  ;;  %422 = vst.msk [vmem:[#allocation2 + $0x28] sm:$0xff] %vm416_vm6, %v4567_v26  ;;  %v4541_v55 = vld [vmem:[%s4653_s22 + $0x9c] sm:$0xff]  }
  0xbb   : > { %v1114_v62 = vsel %vm4655_vm2, %v1112_v14, %v1113_v2  ;;  %926 = vrot.lane.b32.xlu0 %v3972_v18, %s4598_s25  ;;  %v1174_v30 = vsel %vm4655_vm2, %v3996_v7, %v1173_v19  ;;  %v1175_v31 = vrot.slane %v1173_v19, 4  ;;  %2336 = vst.msk [vmem:[#allocation2] sm:$0xff] %vm2335_vm11, %v2288_v15  ;;  %2345 = vst.msk [vmem:[#allocation2 + $0x48] sm:$0xff] %vm2335_vm11, %v2306_v25  ;;  %v1826_v38 = vshll.u32 %v4099_v3, 16  ;;  %v4102_v43 = vld [vmem:[%s4653_s22 + $0xa8] sm:$0xf] }
  0xbc   : > { %v4003_v29 = vcombine.low %v1111_v12, %v1114_v62  ;;  %v1118_v34 = vsel %vm4655_vm2, %v3988_v24, %v1117_v22  ;;  %v1119_v35 = vrot.slane %v1117_v22, 4  ;;  %v1832_v39 = vshll.u32 %v4100_v8, 16  ;;  %v4103_v13 = vld [vmem:[%s4653_s22 + $0xac] sm:$0xf]  ;;  %v4542_v3 = vld [vmem:[%s4653_s22 + $0x3c] sm:$0xff]  }
  0xbd   : > { %1264 = vrot.lane.b32.xlu1 %v4011_v10, %s4597_s24  ;;  %v1177_v40 = vsel %vm4655_vm2, %v1175_v31, %v1176_v23  ;;  %v1825_v41 = vrot.slane %v1823_v32, 4  ;;  %v1836_v42 = vshrl.u32 %v4100_v8, 16  ;;  %v1842_v45 = vshll.u32 %v4101_v16, 16  ;;  %v4543_v9 = vld [vmem:[%s4653_s22 + $0xa8] sm:$0xff]   ;;  %v4104_v15 = vld [vmem:[%s4653_s22 + $0xb0] sm:$0x1] }
  0xbe   : > { %v2290_v36 = vpop.permute.xlu0 %2289  ;;  %v2485_v47 = vpop.permute.xlu1 %2484  ;;  %v4012_v48 = vcombine.low %v1174_v30, %v1177_v40  ;;  %v1121_v49 = vsel %vm4655_vm2, %v1119_v35, %v1120_v27  ;;  %v1828_v50 = vrot.slane %v1826_v38, 5  ;;  %v1834_v51 = vrot.slane %v1832_v39, 5  ;;  %v4078_v17 = vld [vmem:[%s4653_s22 + $0x48] sm:$0xf]  ;;  %v4079_v26 = vld [vmem:[%s4653_s22 + $0x4c] sm:$0xf] }
  0xbf   : > { %2337 = vst.msk [vmem:[#allocation2 + $0x8] sm:$0xff] %vm2335_vm11, %v2290_v36  ;;  %1248 = vrot.lane.b32.xlu0 %v4003_v29, %s4597_s24  ;;  %v4004_v53 = vcombine.low %v1118_v34, %v1121_v49  ;;  %v1838_v21 = vrot.slane %v1836_v42, 4  ;;  %v1844_v37 = vrot.slane %v1842_v45, 5  ;;  %v1631_v54 = vshrl.u32 %v4075_v28, 16  ;;  %v4080_v30 = vld [vmem:[%s4653_s22 + $0x50] sm:$0x1] }
  0xc0   : > { %v1829_v11 = vor.u32 %v1828_v50, %v1825_v41  ;;  %v1634_v57 = vshll.u32 %v4075_v28, 16  ;;  %v1640_v46 = vshll.u32 %v4076_v33, 16  ;;  %v1644_v56 = vshrl.u32 %v4076_v33, 16  ;;  %2525 = vst.msk [vmem:[#allocation2 + $0x40] sm:$0xff] %vm2516_vm12, %v2485_v47  ;;  %v4163_v31 = vld [vmem:[%s4653_s22 + $0x9c] sm:$0xe] }
  0xc1   : > { %1266 = vrot.lane.b32.xlu1 %v4012_v48, %s4597_s24  ;;  %v1839_v20 = vor.u32 %v1838_v21, %v1834_v51  ;;  %v1633_v59 = vrot.slane %v1631_v54, 4  ;;  %v1650_v44 = vshll.u32 %v4077_v52, 16  ;;  %v1847_v7 = vshrl.u32 %v4102_v43, 16  ;;  %v4544_v32 = vld [vmem:[%s4653_s22 + $0x48] sm:$0xff]   ;;  %v4164_v38 = vld [vmem:[%s4653_s22 + $0xa0] sm:$0xf] }
  0xc2   : > { %v2469_v58 = vpop.permute.xlu0 %2468  ;;  %v2487_v60 = vpop.permute.xlu1 %2486  ;;  %v1830_v61 = vrot.slane %v1829_v11, 4  ;;  %v1636_v63 = vrot.slane %v1634_v57, 5  ;;  %v1642_v1 = vrot.slane %v1640_v46, 5  ;;  %v1646_v2 = vrot.slane %v1644_v56, 4  ;;  %v4165_v39 = vld [vmem:[%s4653_s22 + $0xa4] sm:$0x1] }
  0xc3   : > { %2517 = vst.msk [vmem:[#allocation2] sm:$0xff] %vm2516_vm12, %v2469_v58  ;;  %2526 = vst.msk [vmem:[#allocation2 + $0x48] sm:$0xff] %vm2516_vm12, %v2487_v60  ;;  %1250 = vrot.lane.b32.xlu0 %v4004_v53, %s4597_s24  ;;  %v1840_v4 = vrot.slane %v1839_v20, 4  ;;  %v1652_v6 = vrot.slane %v1650_v44, 5  ;;  %v1850_v8 = vshll.u32 %v4102_v43, 16  ;;  %v1856_v16 = vshll.u32 %v4103_v13, 16 }
  0xc4   : > { %v1835_v10 = vsel %vm4705_vm5, %v1830_v61, %v1834_v51  ;;  %v1637_v12 = vor.u32 %v1636_v63, %v1633_v59  ;;  %v1647_v14 = vor.u32 %v1646_v2, %v1642_v1  ;;  %v1849_v23 = vrot.slane %v1847_v7, 4  ;;  %v4139_v47 = vld [vmem:[%s4653_s22 + $0x3c] sm:$0xe]  ;;  %v4140_v48 = vld [vmem:[%s4653_s22 + $0x40] sm:$0xf] }
  0xc5   : > { %1445 = vrot.lane.b32.xlu1 %v4541_v55, %s4596_s23  ;;  %v1845_v19 = vsel %vm4705_vm5, %v1840_v4, %v1844_v37  ;;  %v1852_v24 = vrot.slane %v1850_v8, 5  ;;  %v1860_v25 = vshrl.u32 %v4103_v13, 16  ;;  %v1858_v29 = vrot.slane %v1856_v16, 5  ;;  %v4141_v13 = vld [vmem:[%s4653_s22 + $0x44] sm:$0x1] }
  0xc6   : > { %v2471_v18 = vpop.permute.xlu0 %2470  ;;  %v5270_v62 = vpop.permute.xlu1 %3029  ;;  %v4123_v22 = vcombine.low %v1835_v10, %v1845_v19  ;;  %v1638_v27 = vrot.slane %v1637_v12, 4  ;;  %v1648_v28 = vrot.slane %v1647_v14, 4  ;;  %v1866_v35 = vshll.u32 %v4104_v15, 16  ;;  %v4166_v2 = vld [vmem:[%s4653_s22 + $0xa8] sm:$0xe] }
  0xc7   : > { %2518 = vst.msk [vmem:[#allocation2 + $0x8] sm:$0xff] %vm2516_vm12, %v2471_v18  ;;  %1429 = vrot.lane.b32.xlu0 %v4542_v3, %s4596_s23  ;;  %v1853_v33 = vor.u32 %v1852_v24, %v1849_v23  ;;  %v1862_v34 = vrot.slane %v1860_v25, 4  ;;  %v1655_v36 = vshrl.u32 %v4078_v17, 16  ;;  %v1658_v42 = vshll.u32 %v4078_v17, 16  ;;  %v4167_v8 = vld [vmem:[%s4653_s22 + $0xac] sm:$0xf] }
  0xc8   : > { %v1643_v40 = vsel %vm4705_vm5, %v1638_v27, %v1642_v1  ;;  %v1653_v41 = vsel %vm4705_vm5, %v1648_v28, %v1652_v6  ;;  %v1664_v45 = vshll.u32 %v4079_v26, 16  ;;  %v1868_v53 = vrot.slane %v1866_v35, 5  ;;  %v4142_v17 = vld [vmem:[%s4653_s22 + $0x48] sm:$0xe]  ;;  %v4143_v25 = vld [vmem:[%s4653_s22 + $0x4c] sm:$0xf] }
  0xc9   : > { %1447 = vrot.lane.b32.xlu1 %v4543_v9, %s4596_s23  ;;  %v4115_v50 = vcombine.low %v1643_v40, %v1653_v41  ;;  %v1854_v51 = vrot.slane %v1853_v33, 4  ;;  %v1863_v52 = vor.u32 %v1862_v34, %v1858_v29  ;;  %v1657_v37 = vrot.slane %v1655_v36, 4  ;;  %v4168_v9 = vld [vmem:[%s4653_s22 + $0xb0] sm:$0x1]  ;;  %3070 = vst.msk [vmem:[#allocation2 + $0x40] sm:$0xff] %vm3061_vm13, %v5270_v62 }
  0xca   : > { %v3014_v49 = vpop.permute.xlu0 %3013  ;;  %v1660_v54 = vrot.slane %v1658_v42, 5  ;;  %v1666_v55 = vrot.slane %v1664_v45, 5  ;;  %v1668_v11 = vshrl.u32 %v4079_v26, 16  ;;  %v1674_v56 = vshll.u32 %v4080_v30, 16  ;;  %v4291_v30 = vld [vmem:[%s4653_s22 + $0xa8] sm:$0xf] }
  0xcb   : > { %v3032_v21 = vpop.permute.xlu1 %3031  ;;  %1431 = vrot.lane.b32.xlu0 %v4544_v32, %s4596_s23  ;;  %v1859_v57 = vsel %vm4705_vm5, %v1854_v51, %v1858_v29  ;;  %v1864_v46 = vrot.slane %v1863_v52, 4  ;;  %v4187_v58 = vrot.slane %v4163_v31, 9  ;;  %v2213_v59 = vrot.slane %v4164_v38, 5  ;;  %3062 = vst.msk [vmem:[#allocation2] sm:$0xff] %vm3061_vm13, %v3014_v49  ;;  %v4144_v29 = vld [vmem:[%s4653_s22 + $0x50] sm:$0x1] }
  0xcc   : > { %v1661_v43 = vor.u32 %v1660_v54, %v1657_v37  ;;  %v1670_v20 = vrot.slane %v1668_v11, 4  ;;  %v2216_v44 = vrot.slane %v4165_v39, 5  ;;  %v1676_v61 = vrot.slane %v1674_v56, 5  ;;  %3071 = vst.msk [vmem:[#allocation2 + $0x48] sm:$0xff] %vm3061_vm13, %v3032_v21  ;;  %v4292_v35 = vld [vmem:[%s4653_s22 + $0xac] sm:$0xf] }
  0xcd   : > { %1990 = vrot.lane.b32.xlu1 %v4123_v22, %s4599_s26  ;;  %v1869_v60 = vsel %vm4705_vm5, %v1864_v46, %v1868_v53  ;;  %v4179_v63 = vrot.slane %v4139_v47, 9  ;;  %v2157_v1 = vrot.slane %v4140_v48, 5  ;;  %v2214_v7 = vsel %vm4655_vm2, %v4187_v58, %v2213_v59  ;;  %v4293_v41 = vld [vmem:[%s4653_s22 + $0xb0] sm:$0x1]  ;;  %v4267_v48 = vld [vmem:[%s4653_s22 + $0x48] sm:$0xf] }
  0xce   : > { %v4124_v3 = vcombine.low %v1859_v57, %v1869_v60  ;;  %v1662_v4 = vrot.slane %v1661_v43, 4  ;;  %v1671_v6 = vor.u32 %v1670_v20, %v1666_v55  ;;  %v2215_v12 = vrot.slane %v2213_v59, 4  ;;  %v4268_v11 = vld [vmem:[%s4653_s22 + $0x4c] sm:$0xf]  ;;  %v4269_v58 = vld [vmem:[%s4653_s22 + $0x50] sm:$0x1] }
  0xcf   : > { %v3016_v10 = vpop.permute.xlu0 %3015  ;;  %1974 = vrot.lane.b32.xlu0 %v4115_v50, %s4599_s26  ;;  %v5300_v14 = vsel %vm4655_vm2, %v4179_v63, %v2157_v1  ;;  %v2159_v15 = vrot.slane %v2157_v1, 4  ;;  %v2160_v16 = vrot.slane %v4141_v13, 5  ;;  %v3351_v18 = vpop.permute.xlu1 %3350  ;;  %v4188_v24 = vrot.slane %v4166_v2, 9  ;;  %v4545_v59 = vld [vmem:[%s4653_s22 + $0xa8] sm:$0xff]   ;;  %v4294_v63 = vld [vmem:[%s4653_s22 + $0xb4] sm:$0xf] }
  0xd0   : > { %v1667_v19 = vsel %vm4705_vm5, %v1662_v4, %v1666_v55  ;;  %v1672_v23 = vrot.slane %v1671_v6, 4  ;;  %v2217_v26 = vsel %vm4655_vm2, %v2215_v12, %v2216_v44  ;;  %v2220_v27 = vrot.slane %v4167_v8, 5  ;;  %3063 = vst.msk [vmem:[#allocation2 + $0x8] sm:$0xff] %vm3061_vm13, %v3016_v10  ;;  %v4295_v12 = vld [vmem:[%s4653_s22 + $0xb8] sm:$0xf] }
  0xd1   : > { %1992 = vrot.lane.b32.xlu1 %v4124_v3, %s4599_s26  ;;  %v2161_v22 = vsel %vm4655_vm2, %v2159_v15, %v2160_v16  ;;  %v2223_v28 = vrot.slane %v4168_v9, 5  ;;  %v4203_v32 = vcombine.low %v2214_v7, %v2217_v26  ;;  %v4180_v34 = vrot.slane %v4142_v17, 9  ;;  %3391 = vst.msk [vmem:[#allocation2 + $0x40] sm:$0xff] %vm3382_vm14, %v3351_v18  ;;  %v4296_v16 = vld [vmem:[%s4653_s22 + $0xbc] sm:$0x1]  ;;  %v4547_v18 = vld [vmem:[%s4653_s22 + $0xb4] sm:$0xff]  }
  0xd2   : > { %v1677_v31 = vsel %vm4705_vm5, %v1672_v23, %v1676_v61  ;;  %v4195_v33 = vcombine.low %v5300_v14, %v2161_v22  ;;  %v2221_v38 = vsel %vm4655_vm2, %v4188_v24, %v2220_v27  ;;  %v2222_v39 = vrot.slane %v2220_v27, 4 }
  0xd3   : > { %v3335_v62 = vpop.permute.xlu0 %3334  ;;  %v4116_v36 = vcombine.low %v1667_v19, %v1677_v31  ;;  %v2164_v40 = vrot.slane %v4143_v25, 5  ;;  %v2167_v42 = vrot.slane %v4144_v29, 5  ;;  %v2870_v45 = vshrl.u32 %v4291_v30, 16 }
  0xd4   : > { %v2873_v47 = vshll.u32 %v4291_v30, 16  ;;  %v2224_v49 = vsel %vm4655_vm2, %v2222_v39, %v2223_v28  ;;  %3383 = vst.msk [vmem:[#allocation2] sm:$0xff] %vm3382_vm14, %v3335_v62  ;;  %v2879_v53 = vshll.u32 %v4292_v35, 16  ;;  %v2883_v55 = vshrl.u32 %v4292_v35, 16  ;;  %v4546_v28 = vld [vmem:[%s4653_s22 + $0x48] sm:$0xff]  }
  0xd5   : > { %2311 = vrot.lane.b32.xlu1 %v4203_v32, %s4600_s27  ;;  %1976 = vrot.lane.b32.xlu0 %v4116_v36, %s4599_s26  ;;  %v2165_v50 = vsel %vm4655_vm2, %v4180_v34, %v2164_v40  ;;  %v2166_v51 = vrot.slane %v2164_v40, 4  ;;  %v4204_v21 = vcombine.low %v2221_v38, %v2224_v49  ;;  %v2872_v37 = vrot.slane %v2870_v45, 4  ;;  %v4271_v38 = vld [vmem:[%s4653_s22 + $0x58] sm:$0xf]  ;;  %v4272_v45 = vld [vmem:[%s4653_s22 + $0x5c] sm:$0x1] }
  0xd6   : > { %v937_v52 = vpop.permute.xlu1 %936  ;;  %v2875_v54 = vrot.slane %v2873_v47, 5  ;;  %v2881_v46 = vrot.slane %v2879_v53, 5  ;;  %v2889_v56 = vshll.u32 %v4293_v41, 16  ;;  %v2678_v43 = vshrl.u32 %v4267_v48, 16 }
  0xd7   : > { %975 = vst.msk [vmem:[#allocation2 + $0x50] sm:$0xff] %vm964_vm7, %v937_v52  ;;  %v2168_v57 = vsel %vm4655_vm2, %v2166_v51, %v2167_v42  ;;  %v2885_v60 = vrot.slane %v2883_v55, 4  ;;  %v2681_v61 = vshll.u32 %v4267_v48, 16  ;;  %v2687_v3 = vshll.u32 %v4268_v11, 16  ;;  %v4548_v52 = vld [vmem:[%s4653_s22 + $0x54] sm:$0xff]  }
  0xd8   : > { %v4196_v20 = vcombine.low %v2165_v50, %v2168_v57  ;;  %v2876_v13 = vor.u32 %v2875_v54, %v2872_v37  ;;  %v2891_v1 = vrot.slane %v2889_v56, 5  ;;  %v2680_v2 = vrot.slane %v2678_v43, 4  ;;  %v3407_v27 = vld [vmem:[#allocation2 + $0x40] sm:$0xff]  ;;  %v4555_v51 = vld [vmem:[%s5874_s1 + $0x10] ss:$0 sps:$4 sm:$0x33]  }
  0xd9   : > { %2313 = vrot.lane.b32.xlu1 %v4204_v21, %s4600_s27  ;;  %2295 = vrot.lane.b32.xlu0 %v4195_v33, %s4600_s27  ;;  %v2691_v4 = vshrl.u32 %v4268_v11, 16  ;;  %v2886_v8 = vor.u32 %v2885_v60, %v2881_v46  ;;  %v2683_v9 = vrot.slane %v2681_v61, 5  ;;  %v2697_v10 = vshll.u32 %v4269_v58, 16  ;;  %v4270_v33 = vld [vmem:[%s4653_s22 + $0x54] sm:$0xf] }
  0xda   : > { %v921_v44 = vpop.permute.xlu0 %920  ;;  %v3353_v6 = vpop.permute.xlu1 %3352  ;;  %v2877_v7 = vrot.slane %v2876_v13, 4  ;;  %v2689_v14 = vrot.slane %v2687_v3, 5  ;;  %v2894_v17 = vshrl.u32 %v4294_v63, 16  ;;  %v2897_v31 = vshll.u32 %v4294_v63, 16  ;;  %4464 = vmatprep.mubr.msk.bf16.mxu1 %vm3435_vm15, %v3407_v27  ;;  %v4355_v55 = vld [vmem:[%s4653_s22 + $0xa8] sm:$0xe]  ;;  %4486 = vmatprep.subr.msk.bf16.mxu0 %vm3484_vm0, %v4555_v51 }
  0xdb   : > { %967 = vst.msk [vmem:[#allocation2 + $0x10] sm:$0xff] %vm964_vm7, %v921_v44  ;;  %v2693_v15 = vrot.slane %v2691_v4, 4  ;;  %v2887_v23 = vrot.slane %v2886_v8, 4  ;;  %v2684_v24 = vor.u32 %v2683_v9, %v2680_v2  ;;  %v2699_v25 = vrot.slane %v2697_v10, 5  ;;  %v3399_v22 = vld [vmem:[#allocation2] sm:$0xff]  ;;  %4487 = vmatprep.subr.msk.bf16.mxu1 %vm3484_vm0, %v4555_v51 }
  0xdc   : > { %3392 = vst.msk [vmem:[#allocation2 + $0x48] sm:$0xff] %vm3382_vm14, %v3353_v6  ;;  %v2882_v19 = vsel %vm4705_vm5, %v2877_v7, %v2881_v46  ;;  %4448 = vmatprep.mubr.msk.bf16.mxu0 %vm3435_vm15, %v3399_v22  ;;  %v2896_v30 = vrot.slane %v2894_v17, 4  ;;  %v2903_v32 = vshll.u32 %v4295_v12, 16  ;;  %v2907_v35 = vshrl.u32 %v4295_v12, 16  ;;  %v4356_v43 = vld [vmem:[%s4653_s22 + $0xac] sm:$0xf] }
  0xdd   : > { %2492 = vrot.lane.b32.xlu1 %v4545_v59, %s4601_s28  ;;  %2297 = vrot.lane.b32.xlu0 %v4196_v20, %s4600_s27  ;;  %v2694_v29 = vor.u32 %v2693_v15, %v2689_v14  ;;  %v2892_v34 = vsel %vm4705_vm5, %v2887_v23, %v2891_v1  ;;  %v2685_v62 = vrot.slane %v2684_v24, 4  ;;  %v2913_v36 = vshll.u32 %v4296_v16, 16  ;;  %v4357_v20 = vld [vmem:[%s4653_s22 + $0xb0] sm:$0x1]  ;;  %v4331_v61 = vld [vmem:[%s4653_s22 + $0x48] sm:$0xe] }
  0xde   : > { %v3337_v26 = vpop.permute.xlu0 %3336  ;;  %v4315_v39 = vcombine.low %v2882_v19, %v2892_v34  ;;  %v2899_v41 = vrot.slane %v2897_v31, 5  ;;  %v2905_v42 = vrot.slane %v2903_v32, 5  ;;  %v2909_v48 = vrot.slane %v2907_v35, 4  ;;  %v4332_v4 = vld [vmem:[%s4653_s22 + $0x4c] sm:$0xf] }
  0xdf   : > { %3384 = vst.msk [vmem:[#allocation2 + $0x8] sm:$0xff] %vm3382_vm14, %v3337_v26  ;;  %v2695_v40 = vrot.slane %v2694_v29, 4  ;;  %v2690_v47 = vsel %vm4705_vm5, %v2685_v62, %v2689_v14  ;;  %v2915_v49 = vrot.slane %v2913_v36, 5  ;;  %v2702_v50 = vshrl.u32 %v4270_v33, 16  ;;  %v4333_v10 = vld [vmem:[%s4653_s22 + $0x50] sm:$0x1] }
  0xe0   : > { %v2900_v21 = vor.u32 %v2899_v41, %v2896_v30  ;;  %v2705_v37 = vshll.u32 %v4270_v33, 16  ;;  %v2711_v54 = vshll.u32 %v4271_v38, 16  ;;  %v2910_v57 = vor.u32 %v2909_v48, %v2905_v42  ;;  %v476_v19 = vld [vmem:[%s4653_s22 + $0xac] sm:$0xf]  ;;  %v477_v33 = vld [vmem:[%s4653_s22 + $0xb0] sm:$0x1] }
  0xe1   : > { %2494 = vrot.lane.b32.xlu1 %v4547_v18, %s4601_s28  ;;  %2476 = vrot.lane.b32.xlu0 %v4546_v28, %s4601_s28  ;;  %v2700_v53 = vsel %vm4705_vm5, %v2695_v40, %v2699_v25  ;;  %v2704_v46 = vrot.slane %v2702_v50, 4  ;;  %v2715_v56 = vshrl.u32 %v4271_v38, 16  ;;  %v2721_v60 = vshll.u32 %v4272_v45, 16  ;;  %v475_v18 = vld [vmem:[%s4653_s22 + $0xa8] sm:$0xf] }
  0xe2   : > { %v4307_v11 = vcombine.low %v2690_v47, %v2700_v53  ;;  %v2901_v59 = vrot.slane %v2900_v21, 4  ;;  %v2707_v44 = vrot.slane %v2705_v37, 5  ;;  %v2713_v13 = vrot.slane %v2711_v54, 5  ;;  %v451_v34 = vld [vmem:[%s4653_s22 + $0x48] sm:$0xf] }
  0xe3   : > { %v2911_v63 = vrot.slane %v2910_v57, 4  ;;  %v2717_v1 = vrot.slane %v2715_v56, 4  ;;  %v4379_v3 = vrot.slane %v4355_v55, 9  ;;  %v2723_v8 = vrot.slane %v2721_v60, 5  ;;  %v3408_v27 = vld [vmem:[#allocation2 + $0x48] sm:$0xff] }
  0xe4   : > { %v939_v58 = vpop.permute.xlu1 %938  ;;  %v2906_v6 = vsel %vm4705_vm5, %v2901_v59, %v2905_v42  ;;  %v2708_v7 = vor.u32 %v2707_v44, %v2704_v46  ;;  %v3486_v9 = vsel %vm3484_vm0, %v4555_v51, 0  ;;  %v3260_v15 = vrot.slane %v4356_v43, 5  ;;  %v452_v62 = vld [vmem:[%s4653_s22 + $0x4c] sm:$0xf]  ;;  %v453_v40 = vld [vmem:[%s4653_s22 + $0x50] sm:$0x1] }
  0xe5   : > { %976 = vst.msk [vmem:[#allocation2 + $0x58] sm:$0xff] %vm964_vm7, %v939_v58  ;;  %3037 = vrot.lane.b32.xlu1 %v4315_v39, %s4602_s29  ;;  %v923_v2 = vpop.permute.xlu0 %922  ;;  %2478 = vrot.lane.b32.xlu0 %v4548_v52, %s4601_s28  ;;  %v2916_v12 = vsel %vm4705_vm5, %v2911_v63, %v2915_v49  ;;  %v2718_v14 = vor.u32 %v2717_v1, %v2713_v13  ;;  %v3263_v16 = vrot.slane %v4357_v20, 5  ;;  %v4371_v25 = vrot.slane %v4331_v61, 9  ;;  %v4568_v53 = vld [vmem:[%s4653_s22 + $0xa8] sm:$0xff]   ;;  %v4358_v57 = vld [vmem:[%s4653_s22 + $0xb4] sm:$0xe] }
  0xe6   : > { %968 = vst.msk [vmem:[#allocation2 + $0x18] sm:$0xff] %vm964_vm7, %v923_v2  ;;  %4447 = vmatpush3.bf16.msra.mxu0 %v3486_v9  ;;  %v4316_v23 = vcombine.low %v2906_v6, %v2916_v12  ;;  %v2709_v24 = vrot.slane %v2708_v7, 4  ;;  %4485 = vmatpush3.bf16.msra.mxu1 %v3486_v9  ;;  %v3204_v26 = vrot.slane %v4332_v4, 5  ;;  %v3400_v22 = vld [vmem:[#allocation2 + $0x8] sm:$0xff]  ;;  %v3261_v29 = vsel %vm4655_vm2, %v4379_v3, %v3260_v15  ;;  %v4359_v46 = vld [vmem:[%s4653_s22 + $0xb8] sm:$0xf] }
  0xe7   : > { %v2719_v28 = vrot.slane %v2718_v14, 4  ;;  %v3262_v30 = vrot.slane %v3260_v15, 4  ;;  %v3207_v31 = vrot.slane %v4333_v10, 5  ;;  %v821_v39 = vshrl.u32 %v475_v18, 16  ;;  %v4569_v56 = vld [vmem:[%s4653_s22 + $0x48] sm:$0xff]   ;;  %431 = vst.msk [vmem:[#allocation2 + $0x70] sm:$0xff] %vm416_vm6, %v4568_v53 }
  0xe8   : > { %v1261_v17 = vpop.permute.xlu1 %1260  ;;  %v2714_v35 = vsel %vm4705_vm5, %v2709_v24, %v2713_v13  ;;  %v3205_v36 = vsel %vm4655_vm2, %v4371_v25, %v3204_v26  ;;  %v3206_v38 = vrot.slane %v3204_v26, 4  ;;  %v824_v45 = vshll.u32 %v475_v18, 16  ;;  %v4360_v44 = vld [vmem:[%s4653_s22 + $0xbc] sm:$0x1]  ;;  %v4334_v1 = vld [vmem:[%s4653_s22 + $0x54] sm:$0xe] }
  0xe9   : > { %1299 = vst.msk [vmem:[#allocation2 + $0x50] sm:$0xff] %vm1288_vm8, %v1261_v17  ;;  %v1245_v32 = vpop.permute.xlu0 %1244  ;;  %3021 = vrot.lane.b32.xlu0 %v4307_v11, %s4602_s29  ;;  %3039 = vrot.lane.b32.xlu1 %v4316_v23, %s4602_s29  ;;  %v2724_v41 = vsel %vm4705_vm5, %v2719_v28, %v2723_v8  ;;  %v3264_v42 = vsel %vm4655_vm2, %v3262_v30, %v3263_v16  ;;  %v830_v47 = vshll.u32 %v476_v19, 16  ;;  %v823_v52 = vrot.slane %v821_v39, 4  ;;  %v4335_v8 = vld [vmem:[%s4653_s22 + $0x58] sm:$0xf] }
  0xea   : > { %1291 = vst.msk [vmem:[#allocation2 + $0x10] sm:$0xff] %vm1288_vm8, %v1245_v32  ;;  %4449 = vmatmul.mubr.msk.bf16.vlgmr.msra.gmra.mrb[0].mxu0 %vm3435_vm15, %v3400_v22  ;;  %4465 = vmatmul.mubr.msk.bf16.vlgmr.msra.gmra.mrb[0].mxu1 %vm3435_vm15, %v3408_v27  ;;  %v4308_v49 = vcombine.low %v2714_v35, %v2724_v41  ;;  %v4395_v50 = vcombine.low %v3261_v29, %v3264_v42  ;;  %v826_v37 = vrot.slane %v824_v45, 5  ;;  %v834_v55 = vshrl.u32 %v476_v19, 16  ;;  %v4336_v15 = vld [vmem:[%s4653_s22 + $0x5c] sm:$0x1]  ;;  %v4570_v39 = vld [vmem:[%s4653_s22 + $0xb4] sm:$0xff]  }
  0xeb   : > { %v3208_v51 = vsel %vm4655_vm2, %v3206_v38, %v3207_v31  ;;  %v832_v54 = vrot.slane %v830_v47, 5  ;;  %v840_v58 = vshll.u32 %v477_v33, 16  ;;  %v629_v43 = vshrl.u32 %v451_v34, 16  ;;  %423 = vst.msk [vmem:[#allocation2 + $0x30] sm:$0xff] %vm416_vm6, %v4569_v56  ;;  %v478_v24 = vld [vmem:[%s4653_s22 + $0xb4] sm:$0xf] }
  0xec   : > { %v1263_v48 = vpop.permute.xlu1 %1262  ;;  %v4387_v21 = vcombine.low %v3205_v36, %v3208_v51  ;;  %v632_v20 = vshll.u32 %v451_v34, 16  ;;  %v638_v59 = vshll.u32 %v452_v62, 16  ;;  %v827_v13 = vor.u32 %v826_v37, %v823_v52  ;;  %v479_v35 = vld [vmem:[%s4653_s22 + $0xb8] sm:$0xf]  ;;  %v480_v47 = vld [vmem:[%s4653_s22 + $0xbc] sm:$0x1] }
  0xed   : > { %1300 = vst.msk [vmem:[#allocation2 + $0x58] sm:$0xff] %vm1288_vm8, %v1263_v48  ;;  %v1247_v11 = vpop.permute.xlu0 %1246  ;;  %3023 = vrot.lane.b32.xlu0 %v4308_v49, %s4602_s29  ;;  %3358 = vrot.lane.b32.xlu1 %v4395_v50, %s4603_s30  ;;  %v836_v60 = vrot.slane %v834_v55, 4  ;;  %v642_v61 = vshrl.u32 %v452_v62, 16  ;;  %v648_v63 = vshll.u32 %v453_v40, 16  ;;  %v842_v3 = vrot.slane %v840_v58, 5 }
  0xee   : > { %1292 = vst.msk [vmem:[#allocation2 + $0x18] sm:$0xff] %vm1288_vm8, %v1247_v11  ;;  %v631_v4 = vrot.slane %v629_v43, 4  ;;  %v634_v6 = vrot.slane %v632_v20, 5  ;;  %v640_v7 = vrot.slane %v638_v59, 5  ;;  %v828_v9 = vrot.slane %v827_v13, 4 }
  0xef   : > { %v837_v10 = vor.u32 %v836_v60, %v832_v54  ;;  %v644_v12 = vrot.slane %v642_v61, 4  ;;  %v650_v14 = vrot.slane %v648_v63, 5  ;;  %v4380_v18 = vrot.slane %v4358_v57, 9  ;;  %v454_v48 = vld [vmem:[%s4653_s22 + $0x54] sm:$0xf]  ;;  %432 = vst.msk [vmem:[#allocation2 + $0x78] sm:$0xff] %vm416_vm6, %v4570_v39 }
  0xf0   : > { %v1442_v2 = vpop.permute.xlu1 %1441  ;;  %v635_v17 = vor.u32 %v634_v6, %v631_v4  ;;  %v3267_v19 = vrot.slane %v4359_v46, 5  ;;  %v3270_v23 = vrot.slane %v4360_v44, 5  ;;  %v833_v25 = vsel %vm4705_vm5, %v828_v9, %v832_v54  ;;  %v455_v53 = vld [vmem:[%s4653_s22 + $0x58] sm:$0xf]  ;;  %v456_v57 = vld [vmem:[%s4653_s22 + $0x5c] sm:$0x1] }
  0xf1   : > { %1480 = vst.msk [vmem:[#allocation2 + $0x50] sm:$0xff] %vm1469_vm9, %v1442_v2  ;;  %v1426_v16 = vpop.permute.xlu0 %1425  ;;  %3342 = vrot.lane.b32.xlu0 %v4387_v21, %s4603_s30  ;;  %v838_v26 = vrot.slane %v837_v10, 4  ;;  %v645_v22 = vor.u32 %v644_v12, %v640_v7  ;;  %v4372_v27 = vrot.slane %v4334_v1, 9  ;;  %v3211_v32 = vrot.slane %v4335_v8, 5  ;;  %v4571_v46 = vld [vmem:[%s4653_s22 + $0x54] sm:$0xff]  }
  0xf2   : > { %1472 = vst.msk [vmem:[#allocation2 + $0x10] sm:$0xff] %vm1469_vm9, %v1426_v16  ;;  %v636_v29 = vrot.slane %v635_v17, 4  ;;  %v3268_v30 = vsel %vm4655_vm2, %v4380_v18, %v3267_v19  ;;  %v3269_v31 = vrot.slane %v3267_v19, 4  ;;  %v3214_v62 = vrot.slane %v4336_v15, 5  ;;  %v1023_v59 = vld [vmem:[%s4653_s22 + $0xa8] sm:$0xe] }
  0xf3   : > { %v843_v33 = vsel %vm4705_vm5, %v838_v26, %v842_v3  ;;  %v646_v34 = vrot.slane %v645_v22, 4  ;;  %v845_v36 = vshrl.u32 %v478_v24, 16  ;;  %v3212_v45 = vsel %vm4655_vm2, %v4372_v27, %v3211_v32  ;;  %v1024_v1 = vld [vmem:[%s4653_s22 + $0xac] sm:$0xf]  ;;  %424 = vst.msk [vmem:[#allocation2 + $0x38] sm:$0xff] %vm416_vm6, %v4571_v46 }
  0xf4   : > { %v1444_v28 = vpop.permute.xlu1 %1443  ;;  %v3981_v40 = vcombine.low %v833_v25, %v843_v33  ;;  %v641_v41 = vsel %vm4705_vm5, %v636_v29, %v640_v7  ;;  %v3271_v42 = vsel %vm4655_vm2, %v3269_v31, %v3270_v23  ;;  %v3213_v51 = vrot.slane %v3211_v32, 4  ;;  %v1025_v7 = vld [vmem:[%s4653_s22 + $0xb0] sm:$0x1]  ;;  %v999_v15 = vld [vmem:[%s4653_s22 + $0x48] sm:$0xe] }
  0xf5   : > { %1481 = vst.msk [vmem:[#allocation2 + $0x58] sm:$0xff] %vm1469_vm9, %v1444_v28  ;;  %v1428_v38 = vpop.permute.xlu0 %1427  ;;  %v651_v49 = vsel %vm4705_vm5, %v646_v34, %v650_v14  ;;  %v4396_v50 = vcombine.low %v3268_v30, %v3271_v42  ;;  %v847_v52 = vrot.slane %v845_v36, 4  ;;  %v848_v54 = vshll.u32 %v478_v24, 16  ;;  %v1000_v16 = vld [vmem:[%s4653_s22 + $0x4c] sm:$0xf] }
  0xf6   : > { %1473 = vst.msk [vmem:[#allocation2 + $0x18] sm:$0xff] %vm1469_vm9, %v1428_v38  ;;  %944 = vrot.lane.b32.xlu1 %v3981_v40, %s4598_s25  ;;  %v3973_v37 = vcombine.low %v641_v41, %v651_v49  ;;  %v854_v55 = vshll.u32 %v479_v35, 16  ;;  %v858_v11 = vshrl.u32 %v479_v35, 16  ;;  %v3215_v56 = vsel %vm4655_vm2, %v3213_v51, %v3214_v62  ;;  %v1001_v24 = vld [vmem:[%s4653_s22 + $0x50] sm:$0x1] }
  0xf7   : > { %v864_v58 = vshll.u32 %v480_v47, 16  ;;  %v653_v43 = vshrl.u32 %v454_v48, 16  ;;  %v656_v20 = vshll.u32 %v454_v48, 16  ;;  %v4388_v13 = vcombine.low %v3212_v45, %v3215_v56  ;;  %v1026_v25 = vld [vmem:[%s4653_s22 + $0xb4] sm:$0xe] }
  0xf8   : > { %v1987_v21 = vpop.permute.xlu1 %1986  ;;  %928 = vrot.lane.b32.xlu0 %v3973_v37, %s4598_s25  ;;  %v850_v60 = vrot.slane %v848_v54, 5  ;;  %v856_v61 = vrot.slane %v854_v55, 5  ;;  %v860_v63 = vrot.slane %v858_v11, 4  ;;  %v662_v6 = vshll.u32 %v455_v53, 16  ;;  %v1027_v29 = vld [vmem:[%s4653_s22 + $0xb8] sm:$0xf] }
  0xf9   : > { %2025 = vst.msk [vmem:[#allocation2 + $0x50] sm:$0xff] %vm2014_vm10, %v1987_v21  ;;  %v1971_v44 = vpop.permute.xlu0 %1970  ;;  %v866_v2 = vrot.slane %v864_v58, 5  ;;  %v655_v3 = vrot.slane %v653_v43, 4  ;;  %v658_v4 = vrot.slane %v656_v20, 5  ;;  %v666_v12 = vshrl.u32 %v455_v53, 16 }
  0xfa   : > { %2017 = vst.msk [vmem:[#allocation2 + $0x10] sm:$0xff] %vm2014_vm10, %v1971_v44  ;;  %3360 = vrot.lane.b32.xlu1 %v4396_v50, %s4603_s30  ;;  %v851_v9 = vor.u32 %v850_v60, %v847_v52  ;;  %v861_v10 = vor.u32 %v860_v63, %v856_v61  ;;  %v672_v14 = vshll.u32 %v456_v57, 16  ;;  %v664_v18 = vrot.slane %v662_v6, 5  ;;  %v1028_v30 = vld [vmem:[%s4653_s22 + $0xbc] sm:$0x1] }
  0xfb   : > { %v659_v17 = vor.u32 %v658_v4, %v655_v3  ;;  %v3997_v19 = vrot.slane %v1023_v59, 9  ;;  %v1180_v23 = vrot.slane %v1024_v1, 5  ;;  %v668_v27 = vrot.slane %v666_v12, 4  ;;  %v1002_v62 = vld [vmem:[%s4653_s22 + $0x54] sm:$0xe] }
  0xfc   : > { %v1989_v8 = vpop.permute.xlu1 %1988  ;;  %3344 = vrot.lane.b32.xlu0 %v4388_v13, %s4603_s30  ;;  %v852_v26 = vrot.slane %v851_v9, 4  ;;  %v862_v22 = vrot.slane %v861_v10, 4  ;;  %v674_v28 = vrot.slane %v672_v14, 5  ;;  %v1183_v34 = vrot.slane %v1025_v7, 5  ;;  %v1003_v35 = vld [vmem:[%s4653_s22 + $0x58] sm:$0xf] }
  0xfd   : > { %2026 = vst.msk [vmem:[#allocation2 + $0x58] sm:$0xff] %vm2014_vm10, %v1989_v8  ;;  %v660_v31 = vrot.slane %v659_v17, 4  ;;  %v1181_v32 = vsel %vm4655_vm2, %v3997_v19, %v1180_v23  ;;  %v1182_v33 = vrot.slane %v1180_v23, 4  ;;  %v669_v41 = vor.u32 %v668_v27, %v664_v18  ;;  %v1004_v45 = vld [vmem:[%s4653_s22 + $0x5c] sm:$0x1] }
  0xfe   : > { %v857_v39 = vsel %vm4705_vm5, %v852_v26, %v856_v61  ;;  %v867_v40 = vsel %vm4705_vm5, %v862_v22, %v866_v2  ;;  %v3989_v42 = vrot.slane %v999_v15, 9  ;;  %v1124_v50 = vrot.slane %v1000_v16, 5  ;;  %v4105_v51 = vld [vmem:[%s4653_s22 + $0xb4] sm:$0xf]  ;;  %v4106_v54 = vld [vmem:[%s4653_s22 + $0xb8] sm:$0xf] }
  0xff   : > { %v1973_v36 = vpop.permute.xlu0 %1972  ;;  %v3982_v47 = vcombine.low %v857_v39, %v867_v40  ;;  %v665_v48 = vsel %vm4705_vm5, %v660_v31, %v664_v18  ;;  %v1184_v49 = vsel %vm4655_vm2, %v1182_v33, %v1183_v34  ;;  %v670_v52 = vrot.slane %v669_v41, 4  ;;  %v4107_v43 = vld [vmem:[%s4653_s22 + $0xbc] sm:$0x1]  ;;  %v4081_v2 = vld [vmem:[%s4653_s22 + $0x54] sm:$0xf] }
 0x100   : > { %v2308_v38 = vpop.permute.xlu1 %2307  ;;  %2018 = vst.msk [vmem:[#allocation2 + $0x18] sm:$0xff] %vm2014_vm10, %v1973_v36  ;;  %v4013_v53 = vcombine.low %v1181_v32, %v1184_v49  ;;  %v1127_v21 = vrot.slane %v1001_v24, 5  ;;  %v3998_v37 = vrot.slane %v1026_v25, 9  ;;  %v1125_v55 = vsel %vm4655_vm2, %v3989_v42, %v1124_v50  ;;  %v4082_v3 = vld [vmem:[%s4653_s22 + $0x58] sm:$0xf] }
 0x101   : > { %2346 = vst.msk [vmem:[#allocation2 + $0x50] sm:$0xff] %vm2335_vm11, %v2308_v38  ;;  %946 = vrot.lane.b32.xlu1 %v3982_v47, %s4598_s25  ;;  %v1126_v11 = vrot.slane %v1124_v50, 4  ;;  %v1187_v57 = vrot.slane %v1027_v29, 5  ;;  %v1190_v46 = vrot.slane %v1028_v30, 5  ;;  %v675_v20 = vsel %vm4705_vm5, %v670_v52, %v674_v28  ;;  %v4083_v24 = vld [vmem:[%s4653_s22 + $0x5c] sm:$0x1] }
 0x102   : > { %v3990_v59 = vrot.slane %v1002_v62, 9  ;;  %v1131_v44 = vrot.slane %v1003_v35, 5  ;;  %v1134_v13 = vrot.slane %v1004_v45, 5  ;;  %v3974_v60 = vcombine.low %v665_v48, %v675_v20  ;;  %v4108_v28 = vld [vmem:[%s4653_s22 + $0xc0] sm:$0xf]  ;;  %v4556_v33 = vld [vmem:[%s4653_s22 + $0xb4] sm:$0xff]  }
 0x103   : > { %v2292_v56 = vpop.permute.xlu0 %2291  ;;  %v1128_v61 = vsel %vm4655_vm2, %v1126_v11, %v1127_v21  ;;  %v1188_v63 = vsel %vm4655_vm2, %v3998_v37, %v1187_v57  ;;  %v1189_v1 = vrot.slane %v1187_v57, 4  ;;  %v1871_v8 = vshrl.u32 %v4105_v51, 16  ;;  %v4109_v39 = vld [vmem:[%s4653_s22 + $0xc4] sm:$0xf]  ;;  %v4110_v52 = vld [vmem:[%s4653_s22 + $0xc8] sm:$0x1] }
 0x104   : > { %v2310_v58 = vpop.permute.xlu1 %2309  ;;  %2338 = vst.msk [vmem:[#allocation2 + $0x10] sm:$0xff] %vm2335_vm11, %v2292_v56  ;;  %v4005_v4 = vcombine.low %v1125_v55, %v1128_v61  ;;  %v1132_v6 = vsel %vm4655_vm2, %v3990_v59, %v1131_v44  ;;  %v1133_v7 = vrot.slane %v1131_v44, 4  ;;  %930 = vrot.lane.b32.xlu0 %v3974_v60, %s4598_s25  ;;  %v1874_v12 = vshll.u32 %v4105_v51, 16  ;;  %v4084_v11 = vld [vmem:[%s4653_s22 + $0x60] sm:$0xf] }
 0x105   : > { %2347 = vst.msk [vmem:[#allocation2 + $0x58] sm:$0xff] %vm2335_vm11, %v2310_v58  ;;  %1268 = vrot.lane.b32.xlu1 %v4013_v53, %s4597_s24  ;;  %v1191_v9 = vsel %vm4655_vm2, %v1189_v1, %v1190_v46  ;;  %v1880_v14 = vshll.u32 %v4106_v54, 16  ;;  %v1884_v15 = vshrl.u32 %v4106_v54, 16  ;;  %v1873_v19 = vrot.slane %v1871_v8, 4  ;;  %v4557_v53 = vld [vmem:[%s4653_s22 + $0x54] sm:$0xff]   ;;  %v4558_v57 = vld [vmem:[%s4653_s22 + $0xc0] sm:$0xff]  }
 0x106   : > { %v4014_v17 = vcombine.low %v1188_v63, %v1191_v9  ;;  %v1135_v18 = vsel %vm4655_vm2, %v1133_v7, %v1134_v13  ;;  %v1890_v23 = vshll.u32 %v4107_v43, 16  ;;  %v1876_v26 = vrot.slane %v1874_v12, 5  ;;  %v4085_v20 = vld [vmem:[%s4653_s22 + $0x64] sm:$0xf]  ;;  %v4086_v1 = vld [vmem:[%s4653_s22 + $0x68] sm:$0x1] }
 0x107   : > { %v2294_v10 = vpop.permute.xlu0 %2293  ;;  %v4006_v25 = vcombine.low %v1132_v6, %v1135_v18  ;;  %v1882_v22 = vrot.slane %v1880_v14, 5  ;;  %v1886_v27 = vrot.slane %v1884_v15, 4  ;;  %v1679_v30 = vshrl.u32 %v4081_v2, 16  ;;  %v4170_v9 = vld [vmem:[%s4653_s22 + $0xb8] sm:$0xf] }
 0x108   : > { %v2489_v16 = vpop.permute.xlu1 %2488  ;;  %2339 = vst.msk [vmem:[#allocation2 + $0x18] sm:$0xff] %vm2335_vm11, %v2294_v10  ;;  %v1892_v29 = vrot.slane %v1890_v23, 5  ;;  %v1682_v31 = vshll.u32 %v4081_v2, 16  ;;  %v1688_v32 = vshll.u32 %v4082_v3, 16  ;;  %1252 = vrot.lane.b32.xlu0 %v4005_v4, %s4597_s24  ;;  %v1877_v34 = vor.u32 %v1876_v26, %v1873_v19  ;;  %v4169_v2 = vld [vmem:[%s4653_s22 + $0xb4] sm:$0xe] }
 0x109   : > { %2527 = vst.msk [vmem:[#allocation2 + $0x50] sm:$0xff] %vm2516_vm12, %v2489_v16  ;;  %1270 = vrot.lane.b32.xlu1 %v4014_v17, %s4597_s24  ;;  %v1887_v62 = vor.u32 %v1886_v27, %v1882_v22  ;;  %v1692_v35 = vshrl.u32 %v4082_v3, 16  ;;  %v1698_v36 = vshll.u32 %v4083_v24, 16  ;;  %v1681_v41 = vrot.slane %v1679_v30, 4  ;;  %v4559_v3 = vld [vmem:[%s4653_s22 + $0x60] sm:$0xff]  }
 0x10a   : > { %v1684_v42 = vrot.slane %v1682_v31, 5  ;;  %v1690_v45 = vrot.slane %v1688_v32, 5  ;;  %v1895_v47 = vshrl.u32 %v4108_v28, 16  ;;  %v1878_v48 = vrot.slane %v1877_v34, 4  ;;  %v4171_v10 = vld [vmem:[%s4653_s22 + $0xbc] sm:$0x1] }
 0x10b   : > { %v2473_v38 = vpop.permute.xlu0 %2472  ;;  %v1888_v49 = vrot.slane %v1887_v62, 4  ;;  %v1694_v50 = vrot.slane %v1692_v35, 4  ;;  %v1700_v51 = vrot.slane %v1698_v36, 5  ;;  %v1898_v54 = vshll.u32 %v4108_v28, 16  ;;  %v4145_v17 = vld [vmem:[%s4653_s22 + $0x54] sm:$0xe] }
 0x10c   : > { %v2491_v40 = vpop.permute.xlu1 %2490  ;;  %2519 = vst.msk [vmem:[#allocation2 + $0x10] sm:$0xff] %vm2516_vm12, %v2473_v38  ;;  %v1685_v21 = vor.u32 %v1684_v42, %v1681_v41  ;;  %v1897_v37 = vrot.slane %v1895_v47, 4  ;;  %v1904_v55 = vshll.u32 %v4109_v39, 16  ;;  %1254 = vrot.lane.b32.xlu0 %v4006_v25, %s4597_s24  ;;  %v1883_v46 = vsel %vm4705_vm5, %v1878_v48, %v1882_v22  ;;  %v4146_v30 = vld [vmem:[%s4653_s22 + $0x58] sm:$0xf] }
 0x10d   : > { %2528 = vst.msk [vmem:[#allocation2 + $0x58] sm:$0xff] %vm2516_vm12, %v2491_v40  ;;  %1449 = vrot.lane.b32.xlu1 %v4556_v33, %s4596_s23  ;;  %v1893_v56 = vsel %vm4705_vm5, %v1888_v49, %v1892_v29  ;;  %v1695_v58 = vor.u32 %v1694_v50, %v1690_v45  ;;  %v1908_v43 = vshrl.u32 %v4109_v39, 16  ;;  %v1900_v61 = vrot.slane %v1898_v54, 5  ;;  %v4147_v62 = vld [vmem:[%s4653_s22 + $0x5c] sm:$0x1] }
 0x10e   : > { %v4125_v13 = vcombine.low %v1883_v46, %v1893_v56  ;;  %v1686_v60 = vrot.slane %v1685_v21, 4  ;;  %v1906_v63 = vrot.slane %v1904_v55, 5  ;;  %v1914_v7 = vshll.u32 %v4110_v52, 16  ;;  %v4172_v40 = vld [vmem:[%s4653_s22 + $0xc0] sm:$0xe] }
 0x10f   : > { %v2475_v59 = vpop.permute.xlu0 %2474  ;;  %v1696_v4 = vrot.slane %v1695_v58, 4  ;;  %v1910_v6 = vrot.slane %v1908_v43, 4  ;;  %v1703_v8 = vshrl.u32 %v4084_v11, 16  ;;  %v1901_v14 = vor.u32 %v1900_v61, %v1897_v37  ;;  %v4173_v41 = vld [vmem:[%s4653_s22 + $0xc4] sm:$0xf] }
 0x110   : > { %v3034_v44 = vpop.permute.xlu1 %3033  ;;  %2520 = vst.msk [vmem:[#allocation2 + $0x18] sm:$0xff] %vm2516_vm12, %v2475_v59  ;;  %v1691_v12 = vsel %vm4705_vm5, %v1686_v60, %v1690_v45  ;;  %v1706_v15 = vshll.u32 %v4084_v11, 16  ;;  %v1712_v16 = vshll.u32 %v4085_v20, 16  ;;  %1433 = vrot.lane.b32.xlu0 %v4557_v53, %s4596_s23  ;;  %v1916_v23 = vrot.slane %v1914_v7, 5  ;;  %v4174_v49 = vld [vmem:[%s4653_s22 + $0xc8] sm:$0x1] }
 0x111   : > { %3072 = vst.msk [vmem:[#allocation2 + $0x50] sm:$0xff] %vm3061_vm13, %v3034_v44  ;;  %1451 = vrot.lane.b32.xlu1 %v4558_v57, %s4596_s23  ;;  %v1701_v18 = vsel %vm4705_vm5, %v1696_v4, %v1700_v51  ;;  %v1911_v19 = vor.u32 %v1910_v6, %v1906_v63  ;;  %v1705_v24 = vrot.slane %v1703_v8, 4  ;;  %v1902_v27 = vrot.slane %v1901_v14, 4  ;;  %v4148_v54 = vld [vmem:[%s4653_s22 + $0x60] sm:$0xe] }
 0x112   : > { %v4117_v22 = vcombine.low %v1691_v12, %v1701_v18  ;;  %v1708_v28 = vrot.slane %v1706_v15, 5  ;;  %v5544_v29 = vrot.slane %v1712_v16, 5  ;;  %v1716_v32 = vshrl.u32 %v4085_v20, 16  ;;  %v4149_v56 = vld [vmem:[%s4653_s22 + $0x64] sm:$0xf] }
 0x113   : > { %v3018_v25 = vpop.permute.xlu0 %3017  ;;  %v1912_v31 = vrot.slane %v1911_v19, 4  ;;  %v1722_v33 = vshll.u32 %v4086_v1, 16  ;;  %v4189_v34 = vrot.slane %v4169_v2, 9  ;;  %v1907_v35 = vsel %vm4705_vm5, %v1902_v27, %v1906_v63  ;;  %v4150_v44 = vld [vmem:[%s4653_s22 + $0x68] sm:$0x1] }
 0x114   : > { %v3036_v26 = vpop.permute.xlu1 %3035  ;;  %3064 = vst.msk [vmem:[#allocation2 + $0x10] sm:$0xff] %vm3061_vm13, %v3018_v25  ;;  %v1709_v36 = vor.u32 %v1708_v28, %v1705_v24  ;;  %v2227_v38 = vrot.slane %v4170_v9, 5  ;;  %v2230_v39 = vrot.slane %v4171_v10, 5  ;;  %1435 = vrot.lane.b32.xlu0 %v4559_v3, %s4596_s23  ;;  %v1718_v45 = vrot.slane %v1716_v32, 4  ;;  %v4298_v3 = vld [vmem:[%s4653_s22 + $0xc4] sm:$0xf] }
 0x115   : > { %3073 = vst.msk [vmem:[#allocation2 + $0x58] sm:$0xff] %vm3061_vm13, %v3036_v26  ;;  %1994 = vrot.lane.b32.xlu1 %v4125_v13, %s4599_s26  ;;  %v1917_v42 = vsel %vm4705_vm5, %v1912_v31, %v1916_v23  ;;  %v1724_v47 = vrot.slane %v1722_v33, 5  ;;  %v4181_v48 = vrot.slane %v4145_v17, 9  ;;  %v2171_v11 = vrot.slane %v4146_v30, 5  ;;  %v4297_v13 = vld [vmem:[%s4653_s22 + $0xc0] sm:$0xf] }
 0x116   : > { %v4126_v52 = vcombine.low %v1907_v35, %v1917_v42  ;;  %v1710_v53 = vrot.slane %v1709_v36, 4  ;;  %v2228_v21 = vsel %vm4655_vm2, %v4189_v34, %v2227_v38  ;;  %v2229_v37 = vrot.slane %v2227_v38, 4  ;;  %v4299_v4 = vld [vmem:[%s4653_s22 + $0xc8] sm:$0x1]  ;;  %v4273_v6 = vld [vmem:[%s4653_s22 + $0x60] sm:$0xf] }
 0x117   : > { %v3020_v50 = vpop.permute.xlu0 %3019  ;;  %v1719_v55 = vor.u32 %v1718_v45, %v5544_v29  ;;  %v2174_v57 = vrot.slane %v4147_v62, 5  ;;  %v4190_v46 = vrot.slane %v4172_v40, 9  ;;  %v2234_v20 = vrot.slane %v4173_v41, 5  ;;  %v4274_v12 = vld [vmem:[%s4653_s22 + $0x64] sm:$0xf] }
 0x118   : > { %v3355_v51 = vpop.permute.xlu1 %3354  ;;  %3065 = vst.msk [vmem:[#allocation2 + $0x18] sm:$0xff] %vm3061_vm13, %v3020_v50  ;;  %v1715_v58 = vsel %vm4705_vm5, %v1710_v53, %v5544_v29  ;;  %v2231_v43 = vsel %vm4655_vm2, %v2229_v37, %v2230_v39  ;;  %v2237_v59 = vrot.slane %v4174_v49, 5  ;;  %1978 = vrot.lane.b32.xlu0 %v4117_v22, %s4599_s26  ;;  %v2172_v63 = vsel %vm4655_vm2, %v4181_v48, %v2171_v11  ;;  %v4275_v29 = vld [vmem:[%s4653_s22 + $0x68] sm:$0x1]  ;;  %v4300_v40 = vld [vmem:[%s4653_s22 + $0xcc] sm:$0xf] }
 0x119   : > { %3393 = vst.msk [vmem:[#allocation2 + $0x50] sm:$0xff] %vm3382_vm14, %v3355_v51  ;;  %1996 = vrot.lane.b32.xlu1 %v4126_v52, %s4599_s26  ;;  %v1720_v60 = vrot.slane %v1719_v55, 4  ;;  %v4205_v61 = vcombine.low %v2228_v21, %v2231_v43  ;;  %v2173_v1 = vrot.slane %v2171_v11, 4  ;;  %v2235_v7 = vsel %vm4655_vm2, %v4190_v46, %v2234_v20  ;;  %v4301_v48 = vld [vmem:[%s4653_s22 + $0xd0] sm:$0xf]  ;;  %v4560_v49 = vld [vmem:[%s4653_s22 + $0xc0] sm:$0xff]  }
 0x11a   : > { %v2236_v8 = vrot.slane %v2234_v20, 4  ;;  %v4182_v9 = vrot.slane %v4148_v54, 9  ;;  %v2178_v10 = vrot.slane %v4149_v56, 5  ;;  %v2181_v16 = vrot.slane %v4150_v44, 5  ;;  %v4302_v43 = vld [vmem:[%s4653_s22 + $0xd4] sm:$0x1] }
 0x11b   : > { %v3339_v2 = vpop.permute.xlu0 %3338  ;;  %v1725_v14 = vsel %vm4705_vm5, %v1720_v60, %v1724_v47  ;;  %v2175_v15 = vsel %vm4655_vm2, %v2173_v1, %v2174_v57  ;;  %v2918_v17 = vshrl.u32 %v4297_v13, 16  ;;  %v2921_v28 = vshll.u32 %v4297_v13, 16  ;;  %v4562_v1 = vld [vmem:[%s4653_s22 + $0xcc] sm:$0xff]  }
 0x11c   : > { %3385 = vst.msk [vmem:[#allocation2 + $0x10] sm:$0xff] %vm3382_vm14, %v3339_v2  ;;  %v4118_v18 = vcombine.low %v1715_v58, %v1725_v14  ;;  %v4197_v19 = vcombine.low %v2172_v63, %v2175_v15  ;;  %v2238_v23 = vsel %vm4655_vm2, %v2236_v8, %v2237_v59  ;;  %v2179_v24 = vsel %vm4655_vm2, %v4182_v9, %v2178_v10  ;;  %v4276_v63 = vld [vmem:[%s4653_s22 + $0x6c] sm:$0xf]  ;;  %v4277_v14 = vld [vmem:[%s4653_s22 + $0x70] sm:$0xf] }
 0x11d   : > { %2315 = vrot.lane.b32.xlu1 %v4205_v61, %s4600_s27  ;;  %v4206_v25 = vcombine.low %v2235_v7, %v2238_v23  ;;  %v2180_v26 = vrot.slane %v2178_v10, 4  ;;  %v2920_v27 = vrot.slane %v2918_v17, 4  ;;  %v2927_v31 = vshll.u32 %v4298_v3, 16  ;;  %v4561_v7 = vld [vmem:[%s4653_s22 + $0x60] sm:$0xff]  }
 0x11e   : > { %1980 = vrot.lane.b32.xlu0 %v4118_v18, %s4599_s26  ;;  %v2931_v32 = vshrl.u32 %v4298_v3, 16  ;;  %v2937_v33 = vshll.u32 %v4299_v4, 16  ;;  %v2726_v34 = vshrl.u32 %v4273_v6, 16  ;;  %v2923_v36 = vrot.slane %v2921_v28, 5  ;;  %v4278_v18 = vld [vmem:[%s4653_s22 + $0x74] sm:$0x1] }
 0x11f   : > { %v941_v22 = vpop.permute.xlu1 %940  ;;  %v2182_v62 = vsel %vm4655_vm2, %v2180_v26, %v2181_v16  ;;  %v2729_v38 = vshll.u32 %v4273_v6, 16  ;;  %v2735_v39 = vshll.u32 %v4274_v12, 16  ;;  %v2929_v42 = vrot.slane %v2927_v31, 5  ;;  %v4361_v23 = vld [vmem:[%s4653_s22 + $0xc0] sm:$0xe] }
 0x120   : > { %v3409_v30 = vld [vmem:[#allocation2 + $0x50] sm:$0xff]  ;;  %977 = vst.msk [vmem:[#allocation2 + $0x60] sm:$0xff] %vm964_vm7, %v941_v22  ;;  %v4198_v41 = vcombine.low %v2179_v24, %v2182_v62  ;;  %v2933_v45 = vrot.slane %v2931_v32, 4  ;;  %v2939_v47 = vrot.slane %v2937_v33, 5  ;;  %v2924_v50 = vor.u32 %v2923_v36, %v2920_v27  ;;  %v4362_v27 = vld [vmem:[%s4653_s22 + $0xc4] sm:$0xf] }
 0x121   : > { %4468 = vmatprep.mubr.msk.bf16.mxu1 %vm3435_vm15, %v3409_v30  ;;  %v925_v35 = vpop.permute.xlu0 %924  ;;  %2317 = vrot.lane.b32.xlu1 %v4206_v25, %s4600_s27  ;;  %v2728_v51 = vrot.slane %v2726_v34, 4  ;;  %v2731_v52 = vrot.slane %v2729_v38, 5  ;;  %v5604_v53 = vrot.slane %v2735_v39, 5  ;;  %v2739_v55 = vshrl.u32 %v4274_v12, 16  ;;  %v4363_v28 = vld [vmem:[%s4653_s22 + $0xc8] sm:$0x1] }
 0x122   : > { %969 = vst.msk [vmem:[#allocation2 + $0x20] sm:$0xff] %vm964_vm7, %v925_v35  ;;  %2299 = vrot.lane.b32.xlu0 %v4197_v19, %s4600_s27  ;;  %v2934_v54 = vor.u32 %v2933_v45, %v2929_v42  ;;  %v2745_v11 = vshll.u32 %v4275_v29, 16  ;;  %v2942_v57 = vshrl.u32 %v4300_v40, 16  ;;  %v2925_v46 = vrot.slane %v2924_v50, 4  ;;  %v4563_v29 = vld [vmem:[%s4653_s22 + $0x6c] sm:$0xff]  }
 0x123   : > { %v3357_v21 = vpop.permute.xlu1 %3356  ;;  %v3401_v37 = vld [vmem:[#allocation2 + $0x10] sm:$0xff]  ;;  %v2732_v56 = vor.u32 %v2731_v52, %v2728_v51  ;;  %v2945_v20 = vshll.u32 %v4300_v40, 16  ;;  %v2951_v59 = vshll.u32 %v4301_v48, 16  ;;  %v2741_v13 = vrot.slane %v2739_v55, 4  ;;  %v4337_v40 = vld [vmem:[%s4653_s22 + $0x60] sm:$0xe] }
 0x124   : > { %3394 = vst.msk [vmem:[#allocation2 + $0x58] sm:$0xff] %vm3382_vm14, %v3357_v21  ;;  %4452 = vmatprep.mubr.msk.bf16.mxu0 %vm3435_vm15, %v3401_v37  ;;  %v2935_v44 = vrot.slane %v2934_v54, 4  ;;  %v2747_v60 = vrot.slane %v2745_v11, 5  ;;  %v2944_v61 = vrot.slane %v2942_v57, 4  ;;  %v2930_v2 = vsel %vm4705_vm5, %v2925_v46, %v2929_v42  ;;  %v4364_v54 = vld [vmem:[%s4653_s22 + $0xcc] sm:$0xe] }
 0x125   : > { %v3341_v58 = vpop.permute.xlu0 %3340  ;;  %2496 = vrot.lane.b32.xlu1 %v4560_v49, %s4601_s28  ;;  %v2733_v3 = vrot.slane %v2732_v56, 4  ;;  %v2947_v4 = vrot.slane %v2945_v20, 5  ;;  %v5616_v6 = vrot.slane %v2951_v59, 5  ;;  %v2742_v9 = vor.u32 %v2741_v13, %v5604_v53  ;;  %v4339_v49 = vld [vmem:[%s4653_s22 + $0x68] sm:$0x1] }
 0x126   : > { %3386 = vst.msk [vmem:[#allocation2 + $0x18] sm:$0xff] %vm3382_vm14, %v3341_v58  ;;  %2301 = vrot.lane.b32.xlu0 %v4198_v41, %s4600_s27  ;;  %v2940_v8 = vsel %vm4705_vm5, %v2935_v44, %v2939_v47  ;;  %v2955_v10 = vshrl.u32 %v4301_v48, 16  ;;  %v2961_v12 = vshll.u32 %v4302_v43, 16  ;;  %v2750_v19 = vshrl.u32 %v4276_v63, 16  ;;  %v4338_v41 = vld [vmem:[%s4653_s22 + $0x64] sm:$0xf] }
 0x127   : > { %v4317_v15 = vcombine.low %v2930_v2, %v2940_v8  ;;  %v2738_v16 = vsel %vm4705_vm5, %v2733_v3, %v5604_v53  ;;  %v2948_v17 = vor.u32 %v2947_v4, %v2944_v61  ;;  %v2743_v24 = vrot.slane %v2742_v9, 4  ;;  %v4365_v58 = vld [vmem:[%s4653_s22 + $0xd0] sm:$0xf]  ;;  %v4366_v13 = vld [vmem:[%s4653_s22 + $0xd4] sm:$0x1] }
 0x128   : > { %v2957_v25 = vrot.slane %v2955_v10, 4  ;;  %v2963_v26 = vrot.slane %v2961_v12, 5  ;;  %v2753_v22 = vshll.u32 %v4276_v63, 16  ;;  %v2752_v31 = vrot.slane %v2750_v19, 4  ;;  %v4341_v8 = vld [vmem:[%s4653_s22 + $0x70] sm:$0xf] }
 0x129   : > { %2498 = vrot.lane.b32.xlu1 %v4562_v1, %s4601_s28  ;;  %v2949_v30 = vrot.slane %v2948_v17, 4  ;;  %v2759_v32 = vshll.u32 %v4277_v14, 16  ;;  %v2763_v33 = vshrl.u32 %v4277_v14, 16  ;;  %v2748_v35 = vsel %vm4705_vm5, %v2743_v24, %v2747_v60 }
 0x12a   : > { %2480 = vrot.lane.b32.xlu0 %v4561_v7, %s4601_s28  ;;  %v2958_v36 = vor.u32 %v2957_v25, %v5616_v6  ;;  %v2755_v38 = vrot.slane %v2753_v22, 5  ;;  %v2769_v39 = vshll.u32 %v4278_v18, 16  ;;  %v4309_v42 = vcombine.low %v2738_v16, %v2748_v35  ;;  %v4340_v7 = vld [vmem:[%s4653_s22 + $0x6c] sm:$0xe] }
 0x12b   : > { %v943_v34 = vpop.permute.xlu1 %942  ;;  %v3410_v62 = vld [vmem:[#allocation2 + $0x58] sm:$0xff]  ;;  %v2954_v45 = vsel %vm4705_vm5, %v2949_v30, %v5616_v6  ;;  %v2761_v47 = vrot.slane %v2759_v32, 5  ;;  %v2765_v48 = vrot.slane %v2763_v33, 4  ;;  %v4381_v37 = vrot.slane %v4361_v23, 9 }
 0x12c   : > { %978 = vst.msk [vmem:[#allocation2 + $0x68] sm:$0xff] %vm964_vm7, %v943_v34  ;;  %4469 = vmatmul.mubr.msk.bf16.gmra.mrb[4].mxu1 %vm3435_vm15, %v3410_v62  ;;  %v2959_v51 = vrot.slane %v2958_v36, 4  ;;  %v2756_v52 = vor.u32 %v2755_v38, %v2752_v31  ;;  %v2771_v53 = vrot.slane %v2769_v39, 5  ;;  %v3274_v11 = vrot.slane %v4362_v27, 5 }
 0x12d   : > { %v3402_v50 = vld [vmem:[#allocation2 + $0x18] sm:$0xff]  ;;  %v927_v21 = vpop.permute.xlu0 %926  ;;  %3041 = vrot.lane.b32.xlu1 %v4317_v15, %s4602_s29  ;;  %v2766_v55 = vor.u32 %v2765_v48, %v2761_v47  ;;  %v3277_v57 = vrot.slane %v4363_v28, 5  ;;  %v4373_v46 = vrot.slane %v4337_v40, 9  ;;  %v3218_v59 = vrot.slane %v4338_v41, 5  ;;  %v4342_v15 = vld [vmem:[%s4653_s22 + $0x74] sm:$0x1] }
 0x12e   : > { %4453 = vmatmul.mubr.msk.bf16.gmra.mrb[4].mxu0 %vm3435_vm15, %v3402_v50  ;;  %970 = vst.msk [vmem:[#allocation2 + $0x28] sm:$0xff] %vm964_vm7, %v927_v21  ;;  %2482 = vrot.lane.b32.xlu0 %v4563_v29, %s4601_s28  ;;  %v2964_v43 = vsel %vm4705_vm5, %v2959_v51, %v2963_v26  ;;  %v2757_v20 = vrot.slane %v2756_v52, 4  ;;  %v3221_v44 = vrot.slane %v4339_v49, 5  ;;  %v3275_v63 = vsel %vm4655_vm2, %v4381_v37, %v3274_v11 }
 0x12f   : > { %v1265_v56 = vpop.permute.xlu1 %1264  ;;  %v4318_v60 = vcombine.low %v2954_v45, %v2964_v43  ;;  %v2767_v61 = vrot.slane %v2766_v55, 4  ;;  %v3276_v1 = vrot.slane %v3274_v11, 4  ;;  %v3220_v3 = vrot.slane %v3218_v59, 4 }
 0x130   : > { %1301 = vst.msk [vmem:[#allocation2 + $0x60] sm:$0xff] %vm1288_vm8, %v1265_v56  ;;  %v2762_v2 = vsel %vm4705_vm5, %v2757_v20, %v2761_v47  ;;  %v4382_v6 = vrot.slane %v4364_v54, 9  ;;  %v3281_v12 = vrot.slane %v4365_v58, 5  ;;  %v3284_v14 = vrot.slane %v4366_v13, 5 }
 0x131   : > { %v1249_v4 = vpop.permute.xlu0 %1248  ;;  %3043 = vrot.lane.b32.xlu1 %v4318_v60, %s4602_s29  ;;  %v2772_v9 = vsel %vm4705_vm5, %v2767_v61, %v2771_v53  ;;  %v3278_v10 = vsel %vm4655_vm2, %v3276_v1, %v3277_v57  ;;  %v3219_v19 = vsel %vm4655_vm2, %v4373_v46, %v3218_v59  ;;  %v3222_v5 = vsel %vm4655_vm2, %v3220_v3, %v3221_v44 }
 0x132   : > { %1293 = vst.msk [vmem:[#allocation2 + $0x20] sm:$0xff] %vm1288_vm8, %v1249_v4  ;;  %3025 = vrot.lane.b32.xlu0 %v4309_v42, %s4602_s29  ;;  %v4310_v17 = vcombine.low %v2762_v2, %v2772_v9  ;;  %v4397_v18 = vcombine.low %v3275_v63, %v3278_v10  ;;  %v3282_v23 = vsel %vm4655_vm2, %v4382_v6, %v3281_v12  ;;  %v3283_v24 = vrot.slane %v3281_v12, 4 }
 0x133   : > { %v1267_v16 = vpop.permute.xlu1 %1266  ;;  %v4374_v25 = vrot.slane %v4340_v7, 9  ;;  %v3225_v26 = vrot.slane %v4341_v8, 5  ;;  %v3228_v22 = vrot.slane %v4342_v15, 5  ;;  %v4389_v31 = vcombine.low %v3219_v19, %v3222_v5 }
 0x134   : > { %1302 = vst.msk [vmem:[#allocation2 + $0x68] sm:$0xff] %vm1288_vm8, %v1267_v16  ;;  %v3285_v28 = vsel %vm4655_vm2, %v3283_v24, %v3284_v14 }
 0x135   : > { %v1251_v27 = vpop.permute.xlu0 %1250  ;;  %3362 = vrot.lane.b32.xlu1 %v4397_v18, %s4603_s30  ;;  %v3227_v29 = vrot.slane %v3225_v26, 4  ;;  %v4398_v32 = vcombine.low %v3282_v23, %v3285_v28  ;;  %v3226_v33 = vsel %vm4655_vm2, %v4374_v25, %v3225_v26 }
 0x136   : > { %1294 = vst.msk [vmem:[#allocation2 + $0x28] sm:$0xff] %vm1288_vm8, %v1251_v27  ;;  %3027 = vrot.lane.b32.xlu0 %v4310_v17, %s4602_s29 }
 0x137   : > { %v1446_v30 = vpop.permute.xlu1 %1445  ;;  %v3229_v34 = vsel %vm4655_vm2, %v3227_v29, %v3228_v22 }
 0x138   : > { %1482 = vst.msk [vmem:[#allocation2 + $0x60] sm:$0xff] %vm1469_vm9, %v1446_v30  ;;  %v4390_v36 = vcombine.low %v3226_v33, %v3229_v34 }
 0x139   : > { %v1430_v62 = vpop.permute.xlu0 %1429  ;;  %3364 = vrot.lane.b32.xlu1 %v4398_v32, %s4603_s30 }
 0x13a   : > { %1474 = vst.msk [vmem:[#allocation2 + $0x20] sm:$0xff] %vm1469_vm9, %v1430_v62  ;;  %3346 = vrot.lane.b32.xlu0 %v4389_v31, %s4603_s30  ;;  %v5755_v62 = vld [vmem:[%s5875_s2] ss:$0 sm:$0xff] }
 0x13b   : > { %v1448_v35 = vpop.permute.xlu1 %1447 }
 0x13c   : > { %1483 = vst.msk [vmem:[#allocation2 + $0x68] sm:$0xff] %vm1469_vm9, %v1448_v35 }
 0x13d   : > { %v1432_v38 = vpop.permute.xlu0 %1431 }
 0x13e   : > { %1475 = vst.msk [vmem:[#allocation2 + $0x28] sm:$0xff] %vm1469_vm9, %v1432_v38  ;;  %3348 = vrot.lane.b32.xlu0 %v4390_v36, %s4603_s30  ;;  %v5760_v36 = vld [vmem:[%s5876_s3] ss:$0 sm:$0xff] }
 0x13f   : > { %v1991_v39 = vpop.permute.xlu1 %1990 }
 0x140   : > { %2027 = vst.msk [vmem:[#allocation2 + $0x60] sm:$0xff] %vm2014_vm10, %v1991_v39 }
 0x141   : > { %v1975_v0 = vpop.permute.xlu0 %1974 }
 0x142   : > { %2019 = vst.msk [vmem:[#allocation2 + $0x20] sm:$0xff] %vm2014_vm10, %v1975_v0 }
 0x143   : > { %v1993_v40 = vpop.permute.xlu1 %1992 }
 0x144   : > { %2028 = vst.msk [vmem:[#allocation2 + $0x68] sm:$0xff] %vm2014_vm10, %v1993_v40 }
 0x147   : > { %v2312_v41 = vpop.permute.xlu1 %2311  ;;  %v1977_v42 = vpop.permute.xlu0 %1976 }
 0x148   : > { %2348 = vst.msk [vmem:[#allocation2 + $0x60] sm:$0xff] %vm2335_vm11, %v2312_v41 }
 0x149   : > { %2020 = vst.msk [vmem:[#allocation2 + $0x28] sm:$0xff] %vm2014_vm10, %v1977_v42 }
 0x14b   : > { %v2314_v45 = vpop.permute.xlu1 %2313  ;;  %v2296_v47 = vpop.permute.xlu0 %2295 }
 0x14c   : > { %2349 = vst.msk [vmem:[#allocation2 + $0x68] sm:$0xff] %vm2335_vm11, %v2314_v45  ;;  %2340 = vst.msk [vmem:[#allocation2 + $0x20] sm:$0xff] %vm2335_vm11, %v2296_v47 }
 0x14f   : > { %v2493_v48 = vpop.permute.xlu1 %2492  ;;  %v2298_v49 = vpop.permute.xlu0 %2297 }
 0x150   : > { %2529 = vst.msk [vmem:[#allocation2 + $0x60] sm:$0xff] %vm2516_vm12, %v2493_v48 }
 0x151   : > { %2341 = vst.msk [vmem:[#allocation2 + $0x28] sm:$0xff] %vm2335_vm11, %v2298_v49 }
 0x153   : > { %v2495_v50 = vpop.permute.xlu1 %2494  ;;  %v2477_v51 = vpop.permute.xlu0 %2476 }
 0x154   : > { %2530 = vst.msk [vmem:[#allocation2 + $0x68] sm:$0xff] %vm2516_vm12, %v2495_v50  ;;  %2521 = vst.msk [vmem:[#allocation2 + $0x20] sm:$0xff] %vm2516_vm12, %v2477_v51 }
 0x157   : > { %v3038_v52 = vpop.permute.xlu1 %3037  ;;  %v2479_v53 = vpop.permute.xlu0 %2478 }
 0x158   : > { %3074 = vst.msk [vmem:[#allocation2 + $0x60] sm:$0xff] %vm3061_vm13, %v3038_v52 }
 0x159   : > { %2522 = vst.msk [vmem:[#allocation2 + $0x28] sm:$0xff] %vm2516_vm12, %v2479_v53 }
 0x15b   : > { %v3022_v21 = vpop.permute.xlu0 %3021  ;;  %v3040_v37 = vpop.permute.xlu1 %3039 }
 0x15c   : > { %3066 = vst.msk [vmem:[#allocation2 + $0x20] sm:$0xff] %vm3061_vm13, %v3022_v21  ;;  %3075 = vst.msk [vmem:[#allocation2 + $0x68] sm:$0xff] %vm3061_vm13, %v3040_v37 }
 0x15f   : > { %v3024_v54 = vpop.permute.xlu0 %3023  ;;  %v3359_v55 = vpop.permute.xlu1 %3358 }
 0x160   : > { %3067 = vst.msk [vmem:[#allocation2 + $0x28] sm:$0xff] %vm3061_vm13, %v3024_v54 }
 0x161   : > { %3395 = vst.msk [vmem:[#allocation2 + $0x60] sm:$0xff] %vm3382_vm14, %v3359_v55 }
 0x163   : > { %v3343_v11 = vpop.permute.xlu0 %3342 }
 0x164   : > { %3387 = vst.msk [vmem:[#allocation2 + $0x20] sm:$0xff] %vm3382_vm14, %v3343_v11 }
 0x168   : > { %v3411_v57 = vld [vmem:[#allocation2 + $0x60] sm:$0xff]  ;;  %v945_v46 = vpop.permute.xlu1 %944 }
 0x169   : > { %4472 = vmatprep.mubr.msk.bf16.mxu1 %vm3435_vm15, %v3411_v57  ;;  %979 = vst.msk [vmem:[#allocation2 + $0x70] sm:$0xff] %vm964_vm7, %v945_v46 }
 0x16a   : > { %v929_v56 = vpop.permute.xlu0 %928 }
 0x16b   : > { %v3403_v58 = vld [vmem:[#allocation2 + $0x20] sm:$0xff]  ;;  %971 = vst.msk [vmem:[#allocation2 + $0x30] sm:$0xff] %vm964_vm7, %v929_v56 }
 0x16c   : > { %4456 = vmatprep.mubr.msk.bf16.mxu0 %vm3435_vm15, %v3403_v58  ;;  %v3361_v43 = vpop.permute.xlu1 %3360 }
 0x16d   : > { %3396 = vst.msk [vmem:[#allocation2 + $0x68] sm:$0xff] %vm3382_vm14, %v3361_v43 }
 0x16e   : > { %v3345_v20 = vpop.permute.xlu0 %3344 }
 0x16f   : > { %3388 = vst.msk [vmem:[#allocation2 + $0x28] sm:$0xff] %vm3382_vm14, %v3345_v20 }
 0x173   : > { %v947_v59 = vpop.permute.xlu1 %946 }
 0x174   : > { %980 = vst.msk [vmem:[#allocation2 + $0x78] sm:$0xff] %vm964_vm7, %v947_v59  ;;  %v3412_v44 = vld [vmem:[#allocation2 + $0x68] sm:$0xff] }
 0x175   : > { %4473 = vmatmul.mubr.msk.bf16.gmra.mrb[8].mxu1 %vm3435_vm15, %v3412_v44 }
 0x176   : > { %v3404_v13 = vld [vmem:[#allocation2 + $0x28] sm:$0xff]  ;;  %v931_v60 = vpop.permute.xlu0 %930 }
 0x177   : > { %v1269_v61 = vpop.permute.xlu1 %1268  ;;  %4457 = vmatmul.mubr.msk.bf16.gmra.mrb[8].mxu0 %vm3435_vm15, %v3404_v13  ;;  %972 = vst.msk [vmem:[#allocation2 + $0x38] sm:$0xff] %vm964_vm7, %v931_v60 }
 0x178   : > { %1303 = vst.msk [vmem:[#allocation2 + $0x70] sm:$0xff] %vm1288_vm8, %v1269_v61 }
 0x17a   : > { %v1253_v63 = vpop.permute.xlu0 %1252 }
 0x17b   : > { %v1271_v1 = vpop.permute.xlu1 %1270  ;;  %1295 = vst.msk [vmem:[#allocation2 + $0x30] sm:$0xff] %vm1288_vm8, %v1253_v63 }
 0x17c   : > { %1304 = vst.msk [vmem:[#allocation2 + $0x78] sm:$0xff] %vm1288_vm8, %v1271_v1 }
 0x17e   : > { %v1255_v2 = vpop.permute.xlu0 %1254 }
 0x17f   : > { %v1450_v3 = vpop.permute.xlu1 %1449  ;;  %1296 = vst.msk [vmem:[#allocation2 + $0x38] sm:$0xff] %vm1288_vm8, %v1255_v2 }
 0x180   : > { %1484 = vst.msk [vmem:[#allocation2 + $0x70] sm:$0xff] %vm1469_vm9, %v1450_v3 }
 0x182   : > { %v1434_v4 = vpop.permute.xlu0 %1433 }
 0x183   : > { %v1452_v6 = vpop.permute.xlu1 %1451  ;;  %1476 = vst.msk [vmem:[#allocation2 + $0x30] sm:$0xff] %vm1469_vm9, %v1434_v4 }
 0x184   : > { %1485 = vst.msk [vmem:[#allocation2 + $0x78] sm:$0xff] %vm1469_vm9, %v1452_v6 }
 0x186   : > { %v1436_v7 = vpop.permute.xlu0 %1435 }
 0x187   : > { %v1995_v8 = vpop.permute.xlu1 %1994  ;;  %1477 = vst.msk [vmem:[#allocation2 + $0x38] sm:$0xff] %vm1469_vm9, %v1436_v7 }
 0x188   : > { %2029 = vst.msk [vmem:[#allocation2 + $0x70] sm:$0xff] %vm2014_vm10, %v1995_v8 }
 0x18a   : > { %v1979_v9 = vpop.permute.xlu0 %1978 }
 0x18b   : > { %v1997_v10 = vpop.permute.xlu1 %1996  ;;  %2021 = vst.msk [vmem:[#allocation2 + $0x30] sm:$0xff] %vm2014_vm10, %v1979_v9 }
 0x18c   : > { %2030 = vst.msk [vmem:[#allocation2 + $0x78] sm:$0xff] %vm2014_vm10, %v1997_v10 }
 0x18f   : > { %v2316_v12 = vpop.permute.xlu1 %2315 }
 0x190   : > { %v1981_v14 = vpop.permute.xlu0 %1980  ;;  %2350 = vst.msk [vmem:[#allocation2 + $0x70] sm:$0xff] %vm2335_vm11, %v2316_v12 }
 0x191   : > { %2022 = vst.msk [vmem:[#allocation2 + $0x38] sm:$0xff] %vm2014_vm10, %v1981_v14 }
 0x193   : > { %v2318_v15 = vpop.permute.xlu1 %2317 }
 0x194   : > { %v2300_v16 = vpop.permute.xlu0 %2299  ;;  %2351 = vst.msk [vmem:[#allocation2 + $0x78] sm:$0xff] %vm2335_vm11, %v2318_v15 }
 0x195   : > { %2342 = vst.msk [vmem:[#allocation2 + $0x30] sm:$0xff] %vm2335_vm11, %v2300_v16 }
 0x197   : > { %v2497_v17 = vpop.permute.xlu1 %2496 }
 0x198   : > { %v2302_v18 = vpop.permute.xlu0 %2301  ;;  %2531 = vst.msk [vmem:[#allocation2 + $0x70] sm:$0xff] %vm2516_vm12, %v2497_v17 }
 0x199   : > { %2343 = vst.msk [vmem:[#allocation2 + $0x38] sm:$0xff] %vm2335_vm11, %v2302_v18 }
 0x19b   : > { %v2499_v19 = vpop.permute.xlu1 %2498 }
 0x19c   : > { %v2481_v5 = vpop.permute.xlu0 %2480  ;;  %2532 = vst.msk [vmem:[#allocation2 + $0x78] sm:$0xff] %vm2516_vm12, %v2499_v19 }
 0x19d   : > { %2523 = vst.msk [vmem:[#allocation2 + $0x30] sm:$0xff] %vm2516_vm12, %v2481_v5 }
 0x19f   : > { %v3042_v23 = vpop.permute.xlu1 %3041 }
 0x1a0   : > { %v2483_v24 = vpop.permute.xlu0 %2482  ;;  %3076 = vst.msk [vmem:[#allocation2 + $0x70] sm:$0xff] %vm3061_vm13, %v3042_v23 }
 0x1a1   : > { %2524 = vst.msk [vmem:[#allocation2 + $0x38] sm:$0xff] %vm2516_vm12, %v2483_v24 }
 0x1a3   : > { %v3044_v25 = vpop.permute.xlu1 %3043 }
 0x1a4   : > { %v3026_v26 = vpop.permute.xlu0 %3025  ;;  %3077 = vst.msk [vmem:[#allocation2 + $0x78] sm:$0xff] %vm3061_vm13, %v3044_v25 }
 0x1a5   : > { %3068 = vst.msk [vmem:[#allocation2 + $0x30] sm:$0xff] %vm3061_vm13, %v3026_v26 }
 0x1a7   : > { %v3363_v22 = vpop.permute.xlu1 %3362 }
 0x1a8   : > { %v3028_v27 = vpop.permute.xlu0 %3027  ;;  %3397 = vst.msk [vmem:[#allocation2 + $0x70] sm:$0xff] %vm3382_vm14, %v3363_v22 }
 0x1a9   : > { %3069 = vst.msk [vmem:[#allocation2 + $0x38] sm:$0xff] %vm3061_vm13, %v3028_v27 }
 0x1ab   : > { %v3365_v28 = vpop.permute.xlu1 %3364 }
 0x1ac   : > { %v3347_v29 = vpop.permute.xlu0 %3346  ;;  %3398 = vst.msk [vmem:[#allocation2 + $0x78] sm:$0xff] %vm3382_vm14, %v3365_v28 }
 0x1ad   : > { %3389 = vst.msk [vmem:[#allocation2 + $0x30] sm:$0xff] %vm3382_vm14, %v3347_v29 }
 0x1af   : > { %v3413_v30 = vld [vmem:[#allocation2 + $0x70] sm:$0xff] }
 0x1b0   : > { %v3349_v31 = vpop.permute.xlu0 %3348  ;;  %4476 = vmatprep.mubr.msk.bf16.mxu1 %vm3435_vm15, %v3413_v30 }
 0x1b1   : > { %3390 = vst.msk [vmem:[#allocation2 + $0x38] sm:$0xff] %vm3382_vm14, %v3349_v31 }
 0x1b3   : > { %v3414_v32 = vld [vmem:[#allocation2 + $0x78] sm:$0xff] }
 0x1b4   : > { %v3405_v33 = vld [vmem:[#allocation2 + $0x30] sm:$0xff]  ;;  %4477 = vmatmul.mubr.msk.bf16.gmra.mrb[12].mxu1 %vm3435_vm15, %v3414_v32 }
 0x1b5   : > { %4460 = vmatprep.mubr.msk.bf16.mxu0 %vm3435_vm15, %v3405_v33 }
 0x1b8   : > { %v3406_v34 = vld [vmem:[#allocation2 + $0x38] sm:$0xff] }
 0x1b9   : > { %4461 = vmatmul.mubr.msk.bf16.gmra.mrb[12].mxu0 %vm3435_vm15, %v3406_v34 }
 0x1bd   : > { %v4450_v35 = vpop.f32.mrb[0].mxu0  ;;  %v4466_v38 = vpop.f32.mrb[0].mxu1 }
 0x1be   : > { %v3658_v39 = vmul.f32 %v4450_v35, %v5755_v62  ;;  %v3674_v0 = vmul.f32 %v4466_v38, %v5755_v62  ;;  %v3522_v40 = vpop.f32.mrb[1].mxu0  ;;  %v3586_v41 = vpop.f32.mrb[1].mxu1 }
 0x1bf   : > { %v3656_v42 = vmul.f32 %v5755_v62, %v3522_v40  ;;  %v3672_v45 = vmul.f32 %v5755_v62, %v3586_v41  ;;  %v4451_v47 = vpop.f32.mrb[2].mxu0  ;;  %v4467_v48 = vpop.f32.mrb[2].mxu1 }
 0x1c0   : > { %v3697_v49 = vadd.f32 %v5760_v36, %v3658_v39  ;;  %v3713_v50 = vadd.f32 %v5760_v36, %v3674_v0  ;;  %v3659_v51 = vmul.f32 %v4451_v47, %v5755_v62  ;;  %v3675_v52 = vmul.f32 %v4467_v48, %v5755_v62  ;;  %v3525_v53 = vpop.f32.mrb[3].mxu0  ;;  %v3589_v21 = vpop.f32.mrb[3].mxu1 }
 0x1c1   : > { %v3695_v37 = vadd.f32 %v5760_v36, %v3656_v42  ;;  %v3711_v54 = vadd.f32 %v5760_v36, %v3672_v45  ;;  %v3657_v55 = vmul.f32 %v5755_v62, %v3525_v53  ;;  %v3673_v11 = vmul.f32 %v5755_v62, %v3589_v21 }
 0x1c2   : > { %v3729_v57 = vmax.f32 %v3697_v49, 0.0  ;;  %v3745_v46 = vmax.f32 %v3713_v50, 0.0  ;;  %v3698_v56 = vadd.f32 %v5760_v36, %v3659_v51  ;;  %v3714_v58 = vadd.f32 %v5760_v36, %v3675_v52 }
 0x1c3   : > { %v3727_v43 = vmax.f32 %v3695_v37, 0.0  ;;  %v3743_v20 = vmax.f32 %v3711_v54, 0.0  ;;  %v3696_v59 = vadd.f32 %v5760_v36, %v3657_v55  ;;  %v3712_v44 = vadd.f32 %v5760_v36, %v3673_v11 }
 0x1c4   : > { %3761 = vst [vmem:[%s5774_s21 + $0x10] sm:$0xff] %v3729_v57  ;;  %3777 = vst [vmem:[%s5774_s21 + $0x90] sm:$0xff] %v3745_v46  ;;  %v3730_v13 = vmax.f32 %v3698_v56, 0.0  ;;  %v3746_v60 = vmax.f32 %v3714_v58, 0.0 }
 0x1c5   : > { %3759 = vst [vmem:[%s5774_s21] sm:$0xff] %v3727_v43  ;;  %3775 = vst [vmem:[%s5774_s21 + $0x80] sm:$0xff] %v3743_v20  ;;  %v3728_v61 = vmax.f32 %v3696_v59, 0.0  ;;  %v3744_v63 = vmax.f32 %v3712_v44, 0.0 }
 0x1c6   : > { %3762 = vst [vmem:[%s5774_s21 + $0x18] sm:$0xff] %v3730_v13  ;;  %3778 = vst [vmem:[%s5774_s21 + $0x98] sm:$0xff] %v3746_v60 }
 0x1c7   : > { %3760 = vst [vmem:[%s5774_s21 + $0x8] sm:$0xff] %v3728_v61  ;;  %3776 = vst [vmem:[%s5774_s21 + $0x88] sm:$0xff] %v3744_v63 }
 0x1ff   : > { %v4470_v1 = vpop.f32.mrb[4].mxu1 }
 0x200   : > { %v3678_v2 = vmul.f32 %v4470_v1, %v5755_v62  ;;  %v3602_v3 = vpop.f32.mrb[5].mxu1 }
 0x201   : > { %v4454_v4 = vpop.f32.mrb[4].mxu0  ;;  %v3676_v6 = vmul.f32 %v5755_v62, %v3602_v3  ;;  %v4471_v7 = vpop.f32.mrb[6].mxu1 }
 0x202   : > { %v3662_v8 = vmul.f32 %v4454_v4, %v5755_v62  ;;  %v3717_v9 = vadd.f32 %v5760_v36, %v3678_v2  ;;  %v3538_v10 = vpop.f32.mrb[5].mxu0  ;;  %v3679_v12 = vmul.f32 %v4471_v7, %v5755_v62  ;;  %v3605_v14 = vpop.f32.mrb[7].mxu1 }
 0x203   : > { %v3660_v15 = vmul.f32 %v5755_v62, %v3538_v10  ;;  %v3715_v16 = vadd.f32 %v5760_v36, %v3676_v6  ;;  %v4455_v17 = vpop.f32.mrb[6].mxu0  ;;  %v3677_v18 = vmul.f32 %v5755_v62, %v3605_v14 }
 0x204   : > { %v3701_v19 = vadd.f32 %v5760_v36, %v3662_v8  ;;  %v3749_v5 = vmax.f32 %v3717_v9, 0.0  ;;  %v3663_v23 = vmul.f32 %v4455_v17, %v5755_v62  ;;  %v3718_v24 = vadd.f32 %v5760_v36, %v3679_v12  ;;  %v3541_v25 = vpop.f32.mrb[7].mxu0 }
 0x205   : > { %v3699_v26 = vadd.f32 %v5760_v36, %v3660_v15  ;;  %v3747_v22 = vmax.f32 %v3715_v16, 0.0  ;;  %v3661_v27 = vmul.f32 %v5755_v62, %v3541_v25  ;;  %v3716_v28 = vadd.f32 %v5760_v36, %v3677_v18 }
 0x206   : > { %v3733_v29 = vmax.f32 %v3701_v19, 0.0  ;;  %3781 = vst [vmem:[%s5774_s21 + $0xb0] sm:$0xff] %v3749_v5  ;;  %v3702_v30 = vadd.f32 %v5760_v36, %v3663_v23  ;;  %v3750_v31 = vmax.f32 %v3718_v24, 0.0 }
 0x207   : > { %v3731_v32 = vmax.f32 %v3699_v26, 0.0  ;;  %3779 = vst [vmem:[%s5774_s21 + $0xa0] sm:$0xff] %v3747_v22  ;;  %v3700_v33 = vadd.f32 %v5760_v36, %v3661_v27  ;;  %v3748_v34 = vmax.f32 %v3716_v28, 0.0 }
 0x208   : > { %3765 = vst [vmem:[%s5774_s21 + $0x30] sm:$0xff] %v3733_v29  ;;  %v3734_v35 = vmax.f32 %v3702_v30, 0.0  ;;  %3782 = vst [vmem:[%s5774_s21 + $0xb8] sm:$0xff] %v3750_v31 }
 0x209   : > { %3763 = vst [vmem:[%s5774_s21 + $0x20] sm:$0xff] %v3731_v32  ;;  %v3732_v38 = vmax.f32 %v3700_v33, 0.0  ;;  %3780 = vst [vmem:[%s5774_s21 + $0xa8] sm:$0xff] %v3748_v34 }
 0x20a   : > { %3766 = vst [vmem:[%s5774_s21 + $0x38] sm:$0xff] %v3734_v35 }
 0x20b   : > { %3764 = vst [vmem:[%s5774_s21 + $0x28] sm:$0xff] %v3732_v38 }
 0x248   : > { %v4474_v39 = vpop.f32.mrb[8].mxu1 }
 0x249   : > { %v3682_v0 = vmul.f32 %v4474_v39, %v5755_v62  ;;  %v3618_v40 = vpop.f32.mrb[9].mxu1 }
 0x24a   : > { %v4458_v41 = vpop.f32.mrb[8].mxu0  ;;  %v3680_v42 = vmul.f32 %v5755_v62, %v3618_v40  ;;  %v4475_v45 = vpop.f32.mrb[10].mxu1 }
 0x24b   : > { %v3666_v47 = vmul.f32 %v4458_v41, %v5755_v62  ;;  %v3721_v48 = vadd.f32 %v5760_v36, %v3682_v0  ;;  %v3554_v49 = vpop.f32.mrb[9].mxu0  ;;  %v3683_v50 = vmul.f32 %v4475_v45, %v5755_v62  ;;  %v3621_v51 = vpop.f32.mrb[11].mxu1 }
 0x24c   : > { %v3664_v52 = vmul.f32 %v5755_v62, %v3554_v49  ;;  %v3719_v53 = vadd.f32 %v5760_v36, %v3680_v42  ;;  %v4459_v21 = vpop.f32.mrb[10].mxu0  ;;  %v3681_v37 = vmul.f32 %v5755_v62, %v3621_v51 }
 0x24d   : > { %v3705_v54 = vadd.f32 %v5760_v36, %v3666_v47  ;;  %v3753_v55 = vmax.f32 %v3721_v48, 0.0  ;;  %v3667_v11 = vmul.f32 %v4459_v21, %v5755_v62  ;;  %v3722_v57 = vadd.f32 %v5760_v36, %v3683_v50  ;;  %v3557_v46 = vpop.f32.mrb[11].mxu0 }
 0x24e   : > { %v3703_v56 = vadd.f32 %v5760_v36, %v3664_v52  ;;  %v3751_v58 = vmax.f32 %v3719_v53, 0.0  ;;  %v3665_v43 = vmul.f32 %v5755_v62, %v3557_v46  ;;  %v3720_v20 = vadd.f32 %v5760_v36, %v3681_v37 }
 0x24f   : > { %v3737_v59 = vmax.f32 %v3705_v54, 0.0  ;;  %3785 = vst [vmem:[%s5774_s21 + $0xd0] sm:$0xff] %v3753_v55  ;;  %v3706_v44 = vadd.f32 %v5760_v36, %v3667_v11  ;;  %v3754_v13 = vmax.f32 %v3722_v57, 0.0 }
 0x250   : > { %v3735_v60 = vmax.f32 %v3703_v56, 0.0  ;;  %3783 = vst [vmem:[%s5774_s21 + $0xc0] sm:$0xff] %v3751_v58  ;;  %v3704_v61 = vadd.f32 %v5760_v36, %v3665_v43  ;;  %v3752_v63 = vmax.f32 %v3720_v20, 0.0 }
 0x251   : > { %3769 = vst [vmem:[%s5774_s21 + $0x50] sm:$0xff] %v3737_v59  ;;  %v3738_v1 = vmax.f32 %v3706_v44, 0.0  ;;  %3786 = vst [vmem:[%s5774_s21 + $0xd8] sm:$0xff] %v3754_v13 }
 0x252   : > { %3767 = vst [vmem:[%s5774_s21 + $0x40] sm:$0xff] %v3735_v60  ;;  %v3736_v2 = vmax.f32 %v3704_v61, 0.0  ;;  %3784 = vst [vmem:[%s5774_s21 + $0xc8] sm:$0xff] %v3752_v63 }
 0x253   : > { %3770 = vst [vmem:[%s5774_s21 + $0x58] sm:$0xff] %v3738_v1 }
 0x254   : > { %3768 = vst [vmem:[%s5774_s21 + $0x48] sm:$0xff] %v3736_v2 }
 0x287   : > { %v4478_v3 = vpop.f32.mrb[12].mxu1 }
 0x288   : > { %v3686_v4 = vmul.f32 %v4478_v3, %v5755_v62  ;;  %v3634_v6 = vpop.f32.mrb[13].mxu1 }
 0x289   : > { %v3684_v7 = vmul.f32 %v5755_v62, %v3634_v6  ;;  %v4479_v8 = vpop.f32.mrb[14].mxu1 }
 0x28a   : > { %v3725_v9 = vadd.f32 %v5760_v36, %v3686_v4  ;;  %v3687_v10 = vmul.f32 %v4479_v8, %v5755_v62  ;;  %v3637_v12 = vpop.f32.mrb[15].mxu1 }
 0x28b   : > { %v3723_v14 = vadd.f32 %v5760_v36, %v3684_v7  ;;  %v3685_v15 = vmul.f32 %v5755_v62, %v3637_v12 }
 0x28c   : > { %v4462_v16 = vpop.f32.mrb[12].mxu0  ;;  %v3757_v17 = vmax.f32 %v3725_v9, 0.0  ;;  %v3726_v18 = vadd.f32 %v5760_v36, %v3687_v10 }
 0x28d   : > { %v3670_v19 = vmul.f32 %v4462_v16, %v5755_v62  ;;  %v3570_v5 = vpop.f32.mrb[13].mxu0  ;;  %v3755_v23 = vmax.f32 %v3723_v14, 0.0  ;;  %v3724_v24 = vadd.f32 %v5760_v36, %v3685_v15 }
 0x28e   : > { %3789 = vst [vmem:[%s5774_s21 + $0xf0] sm:$0xff] %v3757_v17  ;;  %v3668_v25 = vmul.f32 %v5755_v62, %v3570_v5  ;;  %v4463_v26 = vpop.f32.mrb[14].mxu0  ;;  %v3758_v22 = vmax.f32 %v3726_v18, 0.0 }
 0x28f   : > { %v3709_v27 = vadd.f32 %v5760_v36, %v3670_v19  ;;  %3787 = vst [vmem:[%s5774_s21 + $0xe0] sm:$0xff] %v3755_v23  ;;  %v3671_v28 = vmul.f32 %v4463_v26, %v5755_v62  ;;  %v3573_v29 = vpop.f32.mrb[15].mxu0  ;;  %v3756_v30 = vmax.f32 %v3724_v24, 0.0 }
 0x290   : > { %v3707_v31 = vadd.f32 %v5760_v36, %v3668_v25  ;;  %3790 = vst [vmem:[%s5774_s21 + $0xf8] sm:$0xff] %v3758_v22  ;;  %v3669_v32 = vmul.f32 %v5755_v62, %v3573_v29 }
 0x291   : > { %v3741_v33 = vmax.f32 %v3709_v27, 0.0  ;;  %v3710_v34 = vadd.f32 %v5760_v36, %v3671_v28  ;;  %3788 = vst [vmem:[%s5774_s21 + $0xe8] sm:$0xff] %v3756_v30 }
 0x292   : > { %v3739_v35 = vmax.f32 %v3707_v31, 0.0  ;;  %v3708_v38 = vadd.f32 %v5760_v36, %v3669_v32 }
 0x293   : > { %3773 = vst [vmem:[%s5774_s21 + $0x70] sm:$0xff] %v3741_v33  ;;  %v3742_v39 = vmax.f32 %v3710_v34, 0.0 }
 0x294   : > { %3771 = vst [vmem:[%s5774_s21 + $0x60] sm:$0xff] %v3739_v35  ;;  %v3740_v0 = vmax.f32 %v3708_v38, 0.0 }
 0x295   : > { %3774 = vst [vmem:[%s5774_s21 + $0x78] sm:$0xff] %v3742_v39 }
 0x296   : > { %3772 = vst [vmem:[%s5774_s21 + $0x68] sm:$0xff] %v3740_v0 }
 0x297 PF: > { %s14_s17 = sadd.s32 1, %s4594_s17   ;;  %s5882_s15 = smov %s4590_s16 }
 0x298   : > { %p11_p5 = scmp.ge.s32.totalorder %s14_s17, 4   ;;  %s5883_s16 = smov %s5885_s18 }
 0x29a   :  { %13 = sbr.rel (!%p11_p5) target bundleno = 2 (0x2), region = 78 }

</bundles_post_ra>
